<compile_context>
chip_gen: v7x
topology: tpu7x:2x2x1
jax: 0.10.0
libtpu: 0.0.40
codegen_flags: <defaults>
</compile_context>

<pallas_src>
import jax
import jax.numpy as jnp
from jax.experimental import pallas as pl
from jax.experimental.pallas import tpu as pltpu

# ---------------- tiny synthetic BART config ----------------
VOCAB = 64
D_MODEL = 32
N_HEADS = 4
HEAD_DIM = D_MODEL // N_HEADS
D_FFN = 64
MAX_POS = 32
PAD_ID = 1
DECODER_START_ID = 2
EPS = 1e-5
NEG = -1e9


# ---------------- fused forward kernel ----------------
def _build_bart_kernel(treedef, n_leaves, b, t_enc, t_dec):
    n_enc = b * t_enc
    n_dec = b * t_dec
    n_all = n_enc + n_dec

    def mm(a, w):
        # bf16 MXU inputs, f32 accumulation (fast on v5e/v6e/v7x).
        return jnp.dot(a.astype(jnp.bfloat16), w.astype(jnp.bfloat16),
                       preferred_element_type=jnp.float32)

    def bmm(spec, a, w):
        return jnp.einsum(spec, a.astype(jnp.bfloat16), w.astype(jnp.bfloat16),
                          preferred_element_type=jnp.float32)

    def layer_norm(x, w):                      # w: [2, D] (gamma; beta)
        g = w[0:1, :]
        beta = w[1:2, :]
        mean = jnp.mean(x, axis=-1, keepdims=True)
        xc = x - mean
        var = jnp.mean(xc * xc, axis=-1, keepdims=True)
        return xc * jax.lax.rsqrt(var + EPS) * g + beta

    def kernel(*refs):
        ids_ref, amask_ref, labels_ref = refs[:3]
        param_refs = refs[3:3 + n_leaves]
        logits_ref = refs[3 + n_leaves]
        loss_ref = refs[4 + n_leaves]

        # All parameters live in VMEM for the whole kernel.
        p = jax.tree_util.tree_unflatten(treedef, [r[...] for r in param_refs])
        tok_emb = p["tok_emb"]                                        # [V, D]

        # ------------- fused token embedding (enc + dec in one matmul) -------
        ids = ids_ref[...]                                            # [n_all, 1]
        oh = (jax.lax.broadcasted_iota(jnp.int32, (n_all, VOCAB), 1)
              == ids).astype(jnp.float32)
        e_all = mm(oh, tok_emb)                                       # [n_all, D]
        e_enc = (e_all[:n_enc].reshape(b, t_enc, D_MODEL)
                 + p["pos_enc"][:t_enc][None]).reshape(n_enc, D_MODEL)
        e_dec = (e_all[n_enc:].reshape(b, t_dec, D_MODEL)
                 + p["pos_dec"][:t_dec][None]).reshape(n_dec, D_MODEL)

        def attn_core(q2, k2, v2, wo, bo, mask3, tq, tk):
            scale = 1.0 / (HEAD_DIM ** 0.5)
            ctx_heads = []
            for h in range(N_HEADS):                                  # static unroll
                sl = slice(h * HEAD_DIM, (h + 1) * HEAD_DIM)
                qh = q2[:, sl].reshape(b, tq, HEAD_DIM)
                kh = k2[:, sl].reshape(b, tk, HEAD_DIM)
                vh = v2[:, sl].reshape(b, tk, HEAD_DIM)
                s = bmm("bqd,bkd->bqk", qh, kh) * scale + mask3       # [b, tq, tk]
                s = s - jnp.max(s, axis=-1, keepdims=True)
                prob = jnp.exp(s)
                prob = prob * pl.reciprocal(
                    jnp.sum(prob, axis=-1, keepdims=True), approx=True)
                ctx = bmm("bqk,bkd->bqd", prob, vh)                   # [b, tq, hd]
                ctx_heads.append(ctx.reshape(b * tq, HEAD_DIM))
            ctx2 = jnp.concatenate(ctx_heads, axis=-1)                # [b*tq, D]
            return mm(ctx2, wo) + bo                                  # one projection

        def self_attention(x2, blk, mask3, t):
            qkv = mm(x2, blk["qkv_w"]) + blk["qkv_b"]                 # fused QKV
            q2 = qkv[:, :D_MODEL]
            k2 = qkv[:, D_MODEL:2 * D_MODEL]
            v2 = qkv[:, 2 * D_MODEL:]
            return attn_core(q2, k2, v2, blk["o_w"], blk["o_b"], mask3, t, t)

        def cross_attention(xq2, xkv2, blk, mask3, tq, tk):
            q2 = mm(xq2, blk["xq_w"]) + blk["xq_b"]
            kv = mm(xkv2, blk["xkv_w"]) + blk["xkv_b"]                # fused KV
            k2 = kv[:, :D_MODEL]
            v2 = kv[:, D_MODEL:]
            return attn_core(q2, k2, v2, blk["xo_w"], blk["xo_b"], mask3, tq, tk)

        def ffn(x2, blk):
            # TODO(synk): HF BART uses exact (erf) gelu; tanh approximation here.
            hidden = jax.nn.gelu(mm(x2, blk["fc1_w"]) + blk["fc1_b"],
                                 approximate=True)
            return mm(hidden, blk["fc2_w"]) + blk["fc2_b"]

        # ---------------- encoder ----------------
        amask = amask_ref[...].astype(jnp.float32)                    # [b, t_enc]
        enc_mask3 = (1.0 - amask)[:, None, :] * NEG                   # [b, 1, t_enc]

        h = layer_norm(e_enc, p["ln_emb_enc"])
        pe = p["enc"]
        h = layer_norm(h + self_attention(h, pe, enc_mask3, t_enc), pe["ln1"])
        enc_out = layer_norm(h + ffn(h, pe), pe["ln2"])

        # ---------------- decoder ----------------
        rows = jax.lax.broadcasted_iota(jnp.int32, (t_dec, t_dec), 0)
        cols = jax.lax.broadcasted_iota(jnp.int32, (t_dec, t_dec), 1)
        causal3 = jnp.where(rows >= cols, 0.0, NEG)[None]             # [1, td, td]
        # TODO(synk): decoder padding positions are not additionally masked
        #             (matches HF default when only labels are supplied).

        d = layer_norm(e_dec, p["ln_emb_dec"])
        pd = p["dec"]
        d = layer_norm(d + self_attention(d, pd, causal3, t_dec), pd["ln1"])
        d = layer_norm(
            d + cross_attention(d, enc_out, pd, enc_mask3, t_dec, t_enc),
            pd["ln2"])
        d = layer_norm(d + ffn(d, pd), pd["ln3"])

        # -------- tied LM head + cross-entropy (fused, logits stay in VMEM) ----
        logits = jax.lax.dot_general(
            d.astype(jnp.bfloat16), tok_emb.astype(jnp.bfloat16),
            (((1,), (1,)), ((), ())),
            preferred_element_type=jnp.float32) + p["final_bias"]     # [n_dec, V]
        logits_ref[...] = logits.astype(logits_ref.dtype)

        labels = labels_ref[...]                                      # [n_dec, 1]
        m = jnp.max(logits, axis=-1, keepdims=True)
        lse = m + jnp.log(jnp.sum(jnp.exp(logits - m), axis=-1, keepdims=True))
        vid = jax.lax.broadcasted_iota(jnp.int32, (n_dec, VOCAB), 1)
        onehot = (vid == labels).astype(jnp.float32)
        label_logit = jnp.sum(onehot * logits, axis=-1, keepdims=True)
        valid = (labels != -100).astype(jnp.float32)                  # HF ignore_index
        per_tok = (lse - label_logit) * valid
        loss = jnp.sum(per_tok) / jnp.maximum(jnp.sum(valid), 1.0)
        loss_ref[...] = loss.reshape(1, 1)

    return kernel


# ---------------- parameter init & packing ----------------
def init_params(key):
    keys = iter(jax.random.split(key, 32))

    def lin(i, o):
        return {"w": jax.random.normal(next(keys), (i, o), jnp.float32) * 0.02,
                "b": jnp.zeros((o,), jnp.float32)}

    def ln():
        return {"g": jnp.ones((D_MODEL,), jnp.float32),
                "b": jnp.zeros((D_MODEL,), jnp.float32)}

    def attn_block():
        return {"q": lin(D_MODEL, D_MODEL), "k": lin(D_MODEL, D_MODEL),
                "v": lin(D_MODEL, D_MODEL), "o": lin(D_MODEL, D_MODEL)}

    return {
        "tok_emb": jax.random.normal(next(keys), (VOCAB, D_MODEL), jnp.float32) * 0.02,
        "pos_emb_enc": jax.random.normal(next(keys), (MAX_POS, D_MODEL), jnp.float32) * 0.02,
        "pos_emb_dec": jax.random.normal(next(keys), (MAX_POS, D_MODEL), jnp.float32) * 0.02,
        "ln_emb_enc": ln(), "ln_emb_dec": ln(),
        "enc": {"self_attn": attn_block(), "ln1": ln(),
                "fc1": lin(D_MODEL, D_FFN), "fc2": lin(D_FFN, D_MODEL), "ln2": ln()},
        "dec": {"self_attn": attn_block(), "ln1": ln(),
                "cross_attn": attn_block(), "ln2": ln(),
                "fc1": lin(D_MODEL, D_FFN), "fc2": lin(D_FFN, D_MODEL), "ln3": ln()},
        "final_logits_bias": jnp.zeros((VOCAB,), jnp.float32),
    }


def _pack_params(params):
    """Fuse QKV / KV weights, make every leaf >=2D, stack LayerNorm params."""
    def ln_pack(p):
        return jnp.stack([p["g"], p["b"]], axis=0)                    # [2, D]

    def row(v):
        return v.reshape(1, -1)

    enc, dec = params["enc"], params["dec"]
    esa, dsa, dca = enc["self_attn"], dec["self_attn"], dec["cross_attn"]

    return {
        "tok_emb": params["tok_emb"],
        "pos_enc": params["pos_emb_enc"],
        "pos_dec": params["pos_emb_dec"],
        "ln_emb_enc": ln_pack(params["ln_emb_enc"]),
        "ln_emb_dec": ln_pack(params["ln_emb_dec"]),
        "final_bias": row(params["final_logits_bias"]),
        "enc": {
            "qkv_w": jnp.concatenate([esa["q"]["w"], esa["k"]["w"], esa["v"]["w"]], axis=1),
            "qkv_b": row(jnp.concatenate([esa["q"]["b"], esa["k"]["b"], esa["v"]["b"]], axis=0)),
            "o_w": esa["o"]["w"], "o_b": row(esa["o"]["b"]),
            "ln1": ln_pack(enc["ln1"]),
            "fc1_w": enc["fc1"]["w"], "fc1_b": row(enc["fc1"]["b"]),
            "fc2_w": enc["fc2"]["w"], "fc2_b": row(enc["fc2"]["b"]),
            "ln2": ln_pack(enc["ln2"]),
        },
        "dec": {
            "qkv_w": jnp.concatenate([dsa["q"]["w"], dsa["k"]["w"], dsa["v"]["w"]], axis=1),
            "qkv_b": row(jnp.concatenate([dsa["q"]["b"], dsa["k"]["b"], dsa["v"]["b"]], axis=0)),
            "o_w": dsa["o"]["w"], "o_b": row(dsa["o"]["b"]),
            "ln1": ln_pack(dec["ln1"]),
            "xq_w": dca["q"]["w"], "xq_b": row(dca["q"]["b"]),
            "xkv_w": jnp.concatenate([dca["k"]["w"], dca["v"]["w"]], axis=1),
            "xkv_b": row(jnp.concatenate([dca["k"]["b"], dca["v"]["b"]], axis=0)),
            "xo_w": dca["o"]["w"], "xo_b": row(dca["o"]["b"]),
            "ln2": ln_pack(dec["ln2"]),
            "fc1_w": dec["fc1"]["w"], "fc1_b": row(dec["fc1"]["b"]),
            "fc2_w": dec["fc2"]["w"], "fc2_b": row(dec["fc2"]["b"]),
            "ln3": ln_pack(dec["ln3"]),
        },
    }


# ---------------- model forward (single fused pallas_call) ----------------
def bart_forward(params, input_ids, attention_mask, labels):
    b, t_enc = input_ids.shape
    t_dec = labels.shape[1]

    # HF-style shift-right of labels to form decoder inputs (tiny int prep).
    dec_ids = jnp.concatenate(
        [jnp.full((b, 1), DECODER_START_ID, labels.dtype), labels[:, :-1]], axis=1)
    dec_ids = jnp.where(dec_ids == -100, PAD_ID, dec_ids)

    # Concatenate encoder + decoder token ids so the in-kernel embedding gather
    # is a single one-hot matmul.
    ids_all = jnp.concatenate(
        [input_ids.reshape(-1), dec_ids.reshape(-1)], axis=0
    ).reshape(-1, 1).astype(jnp.int32)

    packed = _pack_params(params)
    leaves, treedef = jax.tree_util.tree_flatten(packed)
    kernel = _build_bart_kernel(treedef, len(leaves), b, t_enc, t_dec)

    logits2, loss = pl.pallas_call(
        kernel,
        out_shape=(jax.ShapeDtypeStruct((b * t_dec, VOCAB), jnp.float32),
                   jax.ShapeDtypeStruct((1, 1), jnp.float32)),
        compiler_params=pltpu.CompilerParams(vmem_limit_bytes=32 * 1024 * 1024),
    )(ids_all,
      attention_mask.astype(jnp.int32),
      labels.reshape(b * t_dec, 1).astype(jnp.int32),
      *leaves)

    return {"loss": loss[0, 0], "logits": logits2.reshape(b, t_dec, VOCAB)}


if __name__ == "__main__":
    key = jax.random.PRNGKey(0)
    pkey, ikey, lkey = jax.random.split(key, 3)
    params = init_params(pkey)

    B, T = 2, 8
    input_ids = jax.random.randint(ikey, (B, T), 3, VOCAB, dtype=jnp.int32)
    attention_mask = jnp.ones((B, T), jnp.int32).at[1, 6:].set(0)
    labels = jax.random.randint(lkey, (B, T), 3, VOCAB, dtype=jnp.int32)

    out = jax.jit(bart_forward)(params, input_ids, attention_mask, labels)
    jax.block_until_ready(out)
    assert out["logits"].shape == (B, T, VOCAB)
    assert out["loss"].shape == ()
    print("KERNEL_OK")
</pallas_src>

<mosaic_0001>
module attributes {stable_mosaic.version = 11 : i64} {
  func.func @kernel(%arg0: memref<32x1xi32, #tpu.memory_space<vmem>>, %arg1: memref<2x8xi32, #tpu.memory_space<vmem>>, %arg2: memref<16x1xi32, #tpu.memory_space<vmem>>, %arg3: memref<1x64xf32, #tpu.memory_space<vmem>>, %arg4: memref<32x64xf32, #tpu.memory_space<vmem>>, %arg5: memref<1x32xf32, #tpu.memory_space<vmem>>, %arg6: memref<64x32xf32, #tpu.memory_space<vmem>>, %arg7: memref<2x32xf32, #tpu.memory_space<vmem>>, %arg8: memref<2x32xf32, #tpu.memory_space<vmem>>, %arg9: memref<2x32xf32, #tpu.memory_space<vmem>>, %arg10: memref<1x32xf32, #tpu.memory_space<vmem>>, %arg11: memref<32x32xf32, #tpu.memory_space<vmem>>, %arg12: memref<1x96xf32, #tpu.memory_space<vmem>>, %arg13: memref<32x96xf32, #tpu.memory_space<vmem>>, %arg14: memref<1x64xf32, #tpu.memory_space<vmem>>, %arg15: memref<32x64xf32, #tpu.memory_space<vmem>>, %arg16: memref<1x32xf32, #tpu.memory_space<vmem>>, %arg17: memref<32x32xf32, #tpu.memory_space<vmem>>, %arg18: memref<1x32xf32, #tpu.memory_space<vmem>>, %arg19: memref<32x32xf32, #tpu.memory_space<vmem>>, %arg20: memref<1x64xf32, #tpu.memory_space<vmem>>, %arg21: memref<32x64xf32, #tpu.memory_space<vmem>>, %arg22: memref<1x32xf32, #tpu.memory_space<vmem>>, %arg23: memref<64x32xf32, #tpu.memory_space<vmem>>, %arg24: memref<2x32xf32, #tpu.memory_space<vmem>>, %arg25: memref<2x32xf32, #tpu.memory_space<vmem>>, %arg26: memref<1x32xf32, #tpu.memory_space<vmem>>, %arg27: memref<32x32xf32, #tpu.memory_space<vmem>>, %arg28: memref<1x96xf32, #tpu.memory_space<vmem>>, %arg29: memref<32x96xf32, #tpu.memory_space<vmem>>, %arg30: memref<1x64xf32, #tpu.memory_space<vmem>>, %arg31: memref<2x32xf32, #tpu.memory_space<vmem>>, %arg32: memref<2x32xf32, #tpu.memory_space<vmem>>, %arg33: memref<32x32xf32, #tpu.memory_space<vmem>>, %arg34: memref<32x32xf32, #tpu.memory_space<vmem>>, %arg35: memref<64x32xf32, #tpu.memory_space<vmem>>, %arg36: memref<16x64xf32, #tpu.memory_space<vmem>>, %arg37: memref<1x1xf32, #tpu.memory_space<vmem>>) attributes {dimension_semantics = [], scalar_prefetch = 0 : i64, scratch_operands = 0 : i64, tpu.core_type = #tpu.core_type<tc>} {
    %c0 = arith.constant 0 : index
    %c0_0 = arith.constant 0 : index
    %0 = vector.load %arg3[%c0, %c0_0] : memref<1x64xf32, #tpu.memory_space<vmem>>, vector<1x64xf32>
    %c0_1 = arith.constant 0 : index
    %c0_2 = arith.constant 0 : index
    %1 = vector.load %arg4[%c0_1, %c0_2] : memref<32x64xf32, #tpu.memory_space<vmem>>, vector<32x64xf32>
    %c0_3 = arith.constant 0 : index
    %c0_4 = arith.constant 0 : index
    %2 = vector.load %arg5[%c0_3, %c0_4] : memref<1x32xf32, #tpu.memory_space<vmem>>, vector<1x32xf32>
    %c0_5 = arith.constant 0 : index
    %c0_6 = arith.constant 0 : index
    %3 = vector.load %arg6[%c0_5, %c0_6] : memref<64x32xf32, #tpu.memory_space<vmem>>, vector<64x32xf32>
    %c0_7 = arith.constant 0 : index
    %c0_8 = arith.constant 0 : index
    %4 = vector.load %arg7[%c0_7, %c0_8] : memref<2x32xf32, #tpu.memory_space<vmem>>, vector<2x32xf32>
    %c0_9 = arith.constant 0 : index
    %c0_10 = arith.constant 0 : index
    %5 = vector.load %arg8[%c0_9, %c0_10] : memref<2x32xf32, #tpu.memory_space<vmem>>, vector<2x32xf32>
    %c0_11 = arith.constant 0 : index
    %c0_12 = arith.constant 0 : index
    %6 = vector.load %arg9[%c0_11, %c0_12] : memref<2x32xf32, #tpu.memory_space<vmem>>, vector<2x32xf32>
    %c0_13 = arith.constant 0 : index
    %c0_14 = arith.constant 0 : index
    %7 = vector.load %arg10[%c0_13, %c0_14] : memref<1x32xf32, #tpu.memory_space<vmem>>, vector<1x32xf32>
    %c0_15 = arith.constant 0 : index
    %c0_16 = arith.constant 0 : index
    %8 = vector.load %arg11[%c0_15, %c0_16] : memref<32x32xf32, #tpu.memory_space<vmem>>, vector<32x32xf32>
    %c0_17 = arith.constant 0 : index
    %c0_18 = arith.constant 0 : index
    %9 = vector.load %arg12[%c0_17, %c0_18] : memref<1x96xf32, #tpu.memory_space<vmem>>, vector<1x96xf32>
    %c0_19 = arith.constant 0 : index
    %c0_20 = arith.constant 0 : index
    %10 = vector.load %arg13[%c0_19, %c0_20] : memref<32x96xf32, #tpu.memory_space<vmem>>, vector<32x96xf32>
    %c0_21 = arith.constant 0 : index
    %c0_22 = arith.constant 0 : index
    %11 = vector.load %arg14[%c0_21, %c0_22] : memref<1x64xf32, #tpu.memory_space<vmem>>, vector<1x64xf32>
    %c0_23 = arith.constant 0 : index
    %c0_24 = arith.constant 0 : index
    %12 = vector.load %arg15[%c0_23, %c0_24] : memref<32x64xf32, #tpu.memory_space<vmem>>, vector<32x64xf32>
    %c0_25 = arith.constant 0 : index
    %c0_26 = arith.constant 0 : index
    %13 = vector.load %arg16[%c0_25, %c0_26] : memref<1x32xf32, #tpu.memory_space<vmem>>, vector<1x32xf32>
    %c0_27 = arith.constant 0 : index
    %c0_28 = arith.constant 0 : index
    %14 = vector.load %arg17[%c0_27, %c0_28] : memref<32x32xf32, #tpu.memory_space<vmem>>, vector<32x32xf32>
    %c0_29 = arith.constant 0 : index
    %c0_30 = arith.constant 0 : index
    %15 = vector.load %arg18[%c0_29, %c0_30] : memref<1x32xf32, #tpu.memory_space<vmem>>, vector<1x32xf32>
    %c0_31 = arith.constant 0 : index
    %c0_32 = arith.constant 0 : index
    %16 = vector.load %arg19[%c0_31, %c0_32] : memref<32x32xf32, #tpu.memory_space<vmem>>, vector<32x32xf32>
    %c0_33 = arith.constant 0 : index
    %c0_34 = arith.constant 0 : index
    %17 = vector.load %arg20[%c0_33, %c0_34] : memref<1x64xf32, #tpu.memory_space<vmem>>, vector<1x64xf32>
    %c0_35 = arith.constant 0 : index
    %c0_36 = arith.constant 0 : index
    %18 = vector.load %arg21[%c0_35, %c0_36] : memref<32x64xf32, #tpu.memory_space<vmem>>, vector<32x64xf32>
    %c0_37 = arith.constant 0 : index
    %c0_38 = arith.constant 0 : index
    %19 = vector.load %arg22[%c0_37, %c0_38] : memref<1x32xf32, #tpu.memory_space<vmem>>, vector<1x32xf32>
    %c0_39 = arith.constant 0 : index
    %c0_40 = arith.constant 0 : index
    %20 = vector.load %arg23[%c0_39, %c0_40] : memref<64x32xf32, #tpu.memory_space<vmem>>, vector<64x32xf32>
    %c0_41 = arith.constant 0 : index
    %c0_42 = arith.constant 0 : index
    %21 = vector.load %arg24[%c0_41, %c0_42] : memref<2x32xf32, #tpu.memory_space<vmem>>, vector<2x32xf32>
    %c0_43 = arith.constant 0 : index
    %c0_44 = arith.constant 0 : index
    %22 = vector.load %arg25[%c0_43, %c0_44] : memref<2x32xf32, #tpu.memory_space<vmem>>, vector<2x32xf32>
    %c0_45 = arith.constant 0 : index
    %c0_46 = arith.constant 0 : index
    %23 = vector.load %arg26[%c0_45, %c0_46] : memref<1x32xf32, #tpu.memory_space<vmem>>, vector<1x32xf32>
    %c0_47 = arith.constant 0 : index
    %c0_48 = arith.constant 0 : index
    %24 = vector.load %arg27[%c0_47, %c0_48] : memref<32x32xf32, #tpu.memory_space<vmem>>, vector<32x32xf32>
    %c0_49 = arith.constant 0 : index
    %c0_50 = arith.constant 0 : index
    %25 = vector.load %arg28[%c0_49, %c0_50] : memref<1x96xf32, #tpu.memory_space<vmem>>, vector<1x96xf32>
    %c0_51 = arith.constant 0 : index
    %c0_52 = arith.constant 0 : index
    %26 = vector.load %arg29[%c0_51, %c0_52] : memref<32x96xf32, #tpu.memory_space<vmem>>, vector<32x96xf32>
    %c0_53 = arith.constant 0 : index
    %c0_54 = arith.constant 0 : index
    %27 = vector.load %arg30[%c0_53, %c0_54] : memref<1x64xf32, #tpu.memory_space<vmem>>, vector<1x64xf32>
    %c0_55 = arith.constant 0 : index
    %c0_56 = arith.constant 0 : index
    %28 = vector.load %arg31[%c0_55, %c0_56] : memref<2x32xf32, #tpu.memory_space<vmem>>, vector<2x32xf32>
    %c0_57 = arith.constant 0 : index
    %c0_58 = arith.constant 0 : index
    %29 = vector.load %arg32[%c0_57, %c0_58] : memref<2x32xf32, #tpu.memory_space<vmem>>, vector<2x32xf32>
    %c0_59 = arith.constant 0 : index
    %c0_60 = arith.constant 0 : index
    %30 = vector.load %arg33[%c0_59, %c0_60] : memref<32x32xf32, #tpu.memory_space<vmem>>, vector<32x32xf32>
    %c0_61 = arith.constant 0 : index
    %c0_62 = arith.constant 0 : index
    %31 = vector.load %arg34[%c0_61, %c0_62] : memref<32x32xf32, #tpu.memory_space<vmem>>, vector<32x32xf32>
    %c0_63 = arith.constant 0 : index
    %c0_64 = arith.constant 0 : index
    %32 = vector.load %arg35[%c0_63, %c0_64] : memref<64x32xf32, #tpu.memory_space<vmem>>, vector<64x32xf32>
    %c0_65 = arith.constant 0 : index
    %c0_66 = arith.constant 0 : index
    %33 = vector.load %arg0[%c0_65, %c0_66] : memref<32x1xi32, #tpu.memory_space<vmem>>, vector<32x1xi32>
    %34 = tpu.iota {dimensions = array<i32: 1>} : vector<32x64xi32>
    %35 = vector.broadcast %33 : vector<32x1xi32> to vector<32x64xi32>
    %36 = arith.cmpi eq, %34, %35 : vector<32x64xi32>
    %37 = arith.extui %36 : vector<32x64xi1> to vector<32x64xi32>
    %38 = arith.sitofp %37 : vector<32x64xi32> to vector<32x64xf32>
    %39 = arith.truncf %38 : vector<32x64xf32> to vector<32x64xbf16>
    %40 = arith.truncf %32 : vector<64x32xf32> to vector<64x32xbf16>
    %cst = arith.constant dense<0.000000e+00> : vector<32x32xf32>
    %41 = tpu.matmul %39, %40, %cst {dimension_numbers = #tpu.dot_dimension_numbers<[1], [0], [0], [1], [0, 0, 1, 1], [], []>} : vector<32x64xbf16>, vector<64x32xbf16>, vector<32x32xf32> -> vector<32x32xf32>
    %42 = vector.extract_strided_slice %41 {offsets = [0, 0], sizes = [16, 32], strides = [1, 1]} : vector<32x32xf32> to vector<16x32xf32>
    %43 = vector.shape_cast %42 : vector<16x32xf32> to vector<2x8x32xf32>
    %44 = vector.extract_strided_slice %31 {offsets = [0, 0], sizes = [8, 32], strides = [1, 1]} : vector<32x32xf32> to vector<8x32xf32>
    %45 = vector.shape_cast %44 : vector<8x32xf32> to vector<1x8x32xf32>
    %46 = vector.broadcast %45 : vector<1x8x32xf32> to vector<2x8x32xf32>
    %47 = arith.addf %43, %46 : vector<2x8x32xf32>
    %48 = vector.shape_cast %47 : vector<2x8x32xf32> to vector<16x32xf32>
    %49 = vector.extract_strided_slice %41 {offsets = [16, 0], sizes = [16, 32], strides = [1, 1]} : vector<32x32xf32> to vector<16x32xf32>
    %50 = vector.shape_cast %49 : vector<16x32xf32> to vector<2x8x32xf32>
    %51 = vector.extract_strided_slice %30 {offsets = [0, 0], sizes = [8, 32], strides = [1, 1]} : vector<32x32xf32> to vector<8x32xf32>
    %52 = vector.shape_cast %51 : vector<8x32xf32> to vector<1x8x32xf32>
    %53 = vector.broadcast %52 : vector<1x8x32xf32> to vector<2x8x32xf32>
    %54 = arith.addf %50, %53 : vector<2x8x32xf32>
    %55 = vector.shape_cast %54 : vector<2x8x32xf32> to vector<16x32xf32>
    %c0_67 = arith.constant 0 : index
    %c0_68 = arith.constant 0 : index
    %56 = vector.load %arg1[%c0_67, %c0_68] : memref<2x8xi32, #tpu.memory_space<vmem>>, vector<2x8xi32>
    %57 = arith.sitofp %56 : vector<2x8xi32> to vector<2x8xf32>
    %cst_69 = arith.constant 1.000000e+00 : f32
    %58 = vector.broadcast %cst_69 : f32 to vector<2x8xf32>
    %59 = arith.subf %58, %57 : vector<2x8xf32>
    %60 = vector.shape_cast %59 : vector<2x8xf32> to vector<2x1x8xf32>
    %cst_70 = arith.constant -1.000000e+09 : f32
    %61 = vector.broadcast %cst_70 : f32 to vector<2x1x8xf32>
    %62 = arith.mulf %60, %61 : vector<2x1x8xf32>
    %63 = vector.extract_strided_slice %29 {offsets = [0, 0], sizes = [1, 32], strides = [1, 1]} : vector<2x32xf32> to vector<1x32xf32>
    %64 = vector.extract_strided_slice %29 {offsets = [1, 0], sizes = [1, 32], strides = [1, 1]} : vector<2x32xf32> to vector<1x32xf32>
    %cst_71 = arith.constant dense<0.000000e+00> : vector<16xf32>
    %65 = vector.multi_reduction <add>, %48, %cst_71 [1] : vector<16x32xf32> to vector<16xf32>
    %66 = vector.shape_cast %65 : vector<16xf32> to vector<16x1xf32>
    %cst_72 = arith.constant 3.200000e+01 : f32
    %67 = vector.broadcast %cst_72 : f32 to vector<16x1xf32>
    %68 = arith.divf %66, %67 : vector<16x1xf32>
    %69 = vector.broadcast %68 : vector<16x1xf32> to vector<16x32xf32>
    %70 = arith.subf %48, %69 : vector<16x32xf32>
    %71 = arith.mulf %70, %70 : vector<16x32xf32>
    %cst_73 = arith.constant dense<0.000000e+00> : vector<16xf32>
    %72 = vector.multi_reduction <add>, %71, %cst_73 [1] : vector<16x32xf32> to vector<16xf32>
    %73 = vector.shape_cast %72 : vector<16xf32> to vector<16x1xf32>
    %cst_74 = arith.constant 3.200000e+01 : f32
    %74 = vector.broadcast %cst_74 : f32 to vector<16x1xf32>
    %75 = arith.divf %73, %74 : vector<16x1xf32>
    %cst_75 = arith.constant 9.99999974E-6 : f32
    %76 = vector.broadcast %cst_75 : f32 to vector<16x1xf32>
    %77 = arith.addf %75, %76 : vector<16x1xf32>
    %78 = math.rsqrt %77 : vector<16x1xf32>
    %79 = vector.broadcast %78 : vector<16x1xf32> to vector<16x32xf32>
    %80 = arith.mulf %70, %79 : vector<16x32xf32>
    %81 = vector.broadcast %63 : vector<1x32xf32> to vector<16x32xf32>
    %82 = arith.mulf %80, %81 : vector<16x32xf32>
    %83 = vector.broadcast %64 : vector<1x32xf32> to vector<16x32xf32>
    %84 = arith.addf %82, %83 : vector<16x32xf32>
    %85 = arith.truncf %84 : vector<16x32xf32> to vector<16x32xbf16>
    %86 = arith.truncf %26 : vector<32x96xf32> to vector<32x96xbf16>
    %cst_76 = arith.constant dense<0.000000e+00> : vector<16x96xf32>
    %87 = tpu.matmul %85, %86, %cst_76 {dimension_numbers = #tpu.dot_dimension_numbers<[1], [0], [0], [1], [0, 0, 1, 1], [], []>} : vector<16x32xbf16>, vector<32x96xbf16>, vector<16x96xf32> -> vector<16x96xf32>
    %88 = vector.broadcast %25 : vector<1x96xf32> to vector<16x96xf32>
    %89 = arith.addf %87, %88 : vector<16x96xf32>
    %90 = vector.extract_strided_slice %89 {offsets = [0, 0], sizes = [16, 32], strides = [1, 1]} : vector<16x96xf32> to vector<16x32xf32>
    %91 = vector.extract_strided_slice %89 {offsets = [0, 32], sizes = [16, 32], strides = [1, 1]} : vector<16x96xf32> to vector<16x32xf32>
    %92 = vector.extract_strided_slice %89 {offsets = [0, 64], sizes = [16, 32], strides = [1, 1]} : vector<16x96xf32> to vector<16x32xf32>
    %93 = vector.extract_strided_slice %90 {offsets = [0, 0], sizes = [16, 8], strides = [1, 1]} : vector<16x32xf32> to vector<16x8xf32>
    %94 = vector.shape_cast %93 : vector<16x8xf32> to vector<2x8x8xf32>
    %95 = vector.extract_strided_slice %91 {offsets = [0, 0], sizes = [16, 8], strides = [1, 1]} : vector<16x32xf32> to vector<16x8xf32>
    %96 = vector.shape_cast %95 : vector<16x8xf32> to vector<2x8x8xf32>
    %97 = vector.extract_strided_slice %92 {offsets = [0, 0], sizes = [16, 8], strides = [1, 1]} : vector<16x32xf32> to vector<16x8xf32>
    %98 = vector.shape_cast %97 : vector<16x8xf32> to vector<2x8x8xf32>
    %99 = arith.truncf %94 : vector<2x8x8xf32> to vector<2x8x8xbf16>
    %100 = arith.truncf %96 : vector<2x8x8xf32> to vector<2x8x8xbf16>
    "tpu.trace_start"() <{level = 10 : i32, message = "bqd,bkd->bqk"}> : () -> ()
    %cst_77 = arith.constant dense<0.000000e+00> : vector<2x8x8xf32>
    %101 = tpu.matmul %99, %100, %cst_77 {dimension_numbers = #tpu.dot_dimension_numbers<[2], [2], [1], [1], [0, 0, 0, 1, 1, 1], [0], [0]>} : vector<2x8x8xbf16>, vector<2x8x8xbf16>, vector<2x8x8xf32> -> vector<2x8x8xf32>
    "tpu.trace_stop"() : () -> ()
    %cst_78 = arith.constant 0.353553385 : f32
    %102 = vector.broadcast %cst_78 : f32 to vector<2x8x8xf32>
    %103 = arith.mulf %101, %102 : vector<2x8x8xf32>
    %104 = vector.broadcast %62 : vector<2x1x8xf32> to vector<2x8x8xf32>
    %105 = arith.addf %103, %104 : vector<2x8x8xf32>
    %cst_79 = arith.constant dense<0xFF800000> : vector<2x8xf32>
    %106 = vector.multi_reduction <maximumf>, %105, %cst_79 [2] : vector<2x8x8xf32> to vector<2x8xf32>
    %107 = vector.shape_cast %106 : vector<2x8xf32> to vector<2x8x1xf32>
    %108 = vector.broadcast %107 : vector<2x8x1xf32> to vector<2x8x8xf32>
    %109 = arith.subf %105, %108 : vector<2x8x8xf32>
    %110 = math.exp %109 : vector<2x8x8xf32>
    %cst_80 = arith.constant dense<0.000000e+00> : vector<2x8xf32>
    %111 = vector.multi_reduction <add>, %110, %cst_80 [2] : vector<2x8x8xf32> to vector<2x8xf32>
    %112 = vector.shape_cast %111 : vector<2x8xf32> to vector<2x8x1xf32>
    %113 = tpu.reciprocal %112 {approx = true} : vector<2x8x1xf32> -> vector<2x8x1xf32>
    %114 = vector.broadcast %113 : vector<2x8x1xf32> to vector<2x8x8xf32>
    %115 = arith.mulf %110, %114 : vector<2x8x8xf32>
    %116 = arith.truncf %115 : vector<2x8x8xf32> to vector<2x8x8xbf16>
    %117 = arith.truncf %98 : vector<2x8x8xf32> to vector<2x8x8xbf16>
    "tpu.trace_start"() <{level = 10 : i32, message = "bqk,bkd->bqd"}> : () -> ()
    %cst_81 = arith.constant dense<0.000000e+00> : vector<2x8x8xf32>
    %118 = tpu.matmul %116, %117, %cst_81 {dimension_numbers = #tpu.dot_dimension_numbers<[2], [1], [1], [2], [0, 0, 0, 1, 1, 2], [0], [0]>} : vector<2x8x8xbf16>, vector<2x8x8xbf16>, vector<2x8x8xf32> -> vector<2x8x8xf32>
    "tpu.trace_stop"() : () -> ()
    %119 = vector.shape_cast %118 : vector<2x8x8xf32> to vector<16x8xf32>
    %120 = vector.extract_strided_slice %90 {offsets = [0, 8], sizes = [16, 8], strides = [1, 1]} : vector<16x32xf32> to vector<16x8xf32>
    %121 = vector.shape_cast %120 : vector<16x8xf32> to vector<2x8x8xf32>
    %122 = vector.extract_strided_slice %91 {offsets = [0, 8], sizes = [16, 8], strides = [1, 1]} : vector<16x32xf32> to vector<16x8xf32>
    %123 = vector.shape_cast %122 : vector<16x8xf32> to vector<2x8x8xf32>
    %124 = vector.extract_strided_slice %92 {offsets = [0, 8], sizes = [16, 8], strides = [1, 1]} : vector<16x32xf32> to vector<16x8xf32>
    %125 = vector.shape_cast %124 : vector<16x8xf32> to vector<2x8x8xf32>
    %126 = arith.truncf %121 : vector<2x8x8xf32> to vector<2x8x8xbf16>
    %127 = arith.truncf %123 : vector<2x8x8xf32> to vector<2x8x8xbf16>
    "tpu.trace_start"() <{level = 10 : i32, message = "bqd,bkd->bqk"}> : () -> ()
    %cst_82 = arith.constant dense<0.000000e+00> : vector<2x8x8xf32>
    %128 = tpu.matmul %126, %127, %cst_82 {dimension_numbers = #tpu.dot_dimension_numbers<[2], [2], [1], [1], [0, 0, 0, 1, 1, 1], [0], [0]>} : vector<2x8x8xbf16>, vector<2x8x8xbf16>, vector<2x8x8xf32> -> vector<2x8x8xf32>
    "tpu.trace_stop"() : () -> ()
    %cst_83 = arith.constant 0.353553385 : f32
    %129 = vector.broadcast %cst_83 : f32 to vector<2x8x8xf32>
    %130 = arith.mulf %128, %129 : vector<2x8x8xf32>
    %131 = vector.broadcast %62 : vector<2x1x8xf32> to vector<2x8x8xf32>
    %132 = arith.addf %130, %131 : vector<2x8x8xf32>
    %cst_84 = arith.constant dense<0xFF800000> : vector<2x8xf32>
    %133 = vector.multi_reduction <maximumf>, %132, %cst_84 [2] : vector<2x8x8xf32> to vector<2x8xf32>
    %134 = vector.shape_cast %133 : vector<2x8xf32> to vector<2x8x1xf32>
    %135 = vector.broadcast %134 : vector<2x8x1xf32> to vector<2x8x8xf32>
    %136 = arith.subf %132, %135 : vector<2x8x8xf32>
    %137 = math.exp %136 : vector<2x8x8xf32>
    %cst_85 = arith.constant dense<0.000000e+00> : vector<2x8xf32>
    %138 = vector.multi_reduction <add>, %137, %cst_85 [2] : vector<2x8x8xf32> to vector<2x8xf32>
    %139 = vector.shape_cast %138 : vector<2x8xf32> to vector<2x8x1xf32>
    %140 = tpu.reciprocal %139 {approx = true} : vector<2x8x1xf32> -> vector<2x8x1xf32>
    %141 = vector.broadcast %140 : vector<2x8x1xf32> to vector<2x8x8xf32>
    %142 = arith.mulf %137, %141 : vector<2x8x8xf32>
    %143 = arith.truncf %142 : vector<2x8x8xf32> to vector<2x8x8xbf16>
    %144 = arith.truncf %125 : vector<2x8x8xf32> to vector<2x8x8xbf16>
    "tpu.trace_start"() <{level = 10 : i32, message = "bqk,bkd->bqd"}> : () -> ()
    %cst_86 = arith.constant dense<0.000000e+00> : vector<2x8x8xf32>
    %145 = tpu.matmul %143, %144, %cst_86 {dimension_numbers = #tpu.dot_dimension_numbers<[2], [1], [1], [2], [0, 0, 0, 1, 1, 2], [0], [0]>} : vector<2x8x8xbf16>, vector<2x8x8xbf16>, vector<2x8x8xf32> -> vector<2x8x8xf32>
    "tpu.trace_stop"() : () -> ()
    %146 = vector.shape_cast %145 : vector<2x8x8xf32> to vector<16x8xf32>
    %147 = vector.extract_strided_slice %90 {offsets = [0, 16], sizes = [16, 8], strides = [1, 1]} : vector<16x32xf32> to vector<16x8xf32>
    %148 = vector.shape_cast %147 : vector<16x8xf32> to vector<2x8x8xf32>
    %149 = vector.extract_strided_slice %91 {offsets = [0, 16], sizes = [16, 8], strides = [1, 1]} : vector<16x32xf32> to vector<16x8xf32>
    %150 = vector.shape_cast %149 : vector<16x8xf32> to vector<2x8x8xf32>
    %151 = vector.extract_strided_slice %92 {offsets = [0, 16], sizes = [16, 8], strides = [1, 1]} : vector<16x32xf32> to vector<16x8xf32>
    %152 = vector.shape_cast %151 : vector<16x8xf32> to vector<2x8x8xf32>
    %153 = arith.truncf %148 : vector<2x8x8xf32> to vector<2x8x8xbf16>
    %154 = arith.truncf %150 : vector<2x8x8xf32> to vector<2x8x8xbf16>
    "tpu.trace_start"() <{level = 10 : i32, message = "bqd,bkd->bqk"}> : () -> ()
    %cst_87 = arith.constant dense<0.000000e+00> : vector<2x8x8xf32>
    %155 = tpu.matmul %153, %154, %cst_87 {dimension_numbers = #tpu.dot_dimension_numbers<[2], [2], [1], [1], [0, 0, 0, 1, 1, 1], [0], [0]>} : vector<2x8x8xbf16>, vector<2x8x8xbf16>, vector<2x8x8xf32> -> vector<2x8x8xf32>
    "tpu.trace_stop"() : () -> ()
    %cst_88 = arith.constant 0.353553385 : f32
    %156 = vector.broadcast %cst_88 : f32 to vector<2x8x8xf32>
    %157 = arith.mulf %155, %156 : vector<2x8x8xf32>
    %158 = vector.broadcast %62 : vector<2x1x8xf32> to vector<2x8x8xf32>
    %159 = arith.addf %157, %158 : vector<2x8x8xf32>
    %cst_89 = arith.constant dense<0xFF800000> : vector<2x8xf32>
    %160 = vector.multi_reduction <maximumf>, %159, %cst_89 [2] : vector<2x8x8xf32> to vector<2x8xf32>
    %161 = vector.shape_cast %160 : vector<2x8xf32> to vector<2x8x1xf32>
    %162 = vector.broadcast %161 : vector<2x8x1xf32> to vector<2x8x8xf32>
    %163 = arith.subf %159, %162 : vector<2x8x8xf32>
    %164 = math.exp %163 : vector<2x8x8xf32>
    %cst_90 = arith.constant dense<0.000000e+00> : vector<2x8xf32>
    %165 = vector.multi_reduction <add>, %164, %cst_90 [2] : vector<2x8x8xf32> to vector<2x8xf32>
    %166 = vector.shape_cast %165 : vector<2x8xf32> to vector<2x8x1xf32>
    %167 = tpu.reciprocal %166 {approx = true} : vector<2x8x1xf32> -> vector<2x8x1xf32>
    %168 = vector.broadcast %167 : vector<2x8x1xf32> to vector<2x8x8xf32>
    %169 = arith.mulf %164, %168 : vector<2x8x8xf32>
    %170 = arith.truncf %169 : vector<2x8x8xf32> to vector<2x8x8xbf16>
    %171 = arith.truncf %152 : vector<2x8x8xf32> to vector<2x8x8xbf16>
    "tpu.trace_start"() <{level = 10 : i32, message = "bqk,bkd->bqd"}> : () -> ()
    %cst_91 = arith.constant dense<0.000000e+00> : vector<2x8x8xf32>
    %172 = tpu.matmul %170, %171, %cst_91 {dimension_numbers = #tpu.dot_dimension_numbers<[2], [1], [1], [2], [0, 0, 0, 1, 1, 2], [0], [0]>} : vector<2x8x8xbf16>, vector<2x8x8xbf16>, vector<2x8x8xf32> -> vector<2x8x8xf32>
    "tpu.trace_stop"() : () -> ()
    %173 = vector.shape_cast %172 : vector<2x8x8xf32> to vector<16x8xf32>
    %174 = vector.extract_strided_slice %90 {offsets = [0, 24], sizes = [16, 8], strides = [1, 1]} : vector<16x32xf32> to vector<16x8xf32>
    %175 = vector.shape_cast %174 : vector<16x8xf32> to vector<2x8x8xf32>
    %176 = vector.extract_strided_slice %91 {offsets = [0, 24], sizes = [16, 8], strides = [1, 1]} : vector<16x32xf32> to vector<16x8xf32>
    %177 = vector.shape_cast %176 : vector<16x8xf32> to vector<2x8x8xf32>
    %178 = vector.extract_strided_slice %92 {offsets = [0, 24], sizes = [16, 8], strides = [1, 1]} : vector<16x32xf32> to vector<16x8xf32>
    %179 = vector.shape_cast %178 : vector<16x8xf32> to vector<2x8x8xf32>
    %180 = arith.truncf %175 : vector<2x8x8xf32> to vector<2x8x8xbf16>
    %181 = arith.truncf %177 : vector<2x8x8xf32> to vector<2x8x8xbf16>
    "tpu.trace_start"() <{level = 10 : i32, message = "bqd,bkd->bqk"}> : () -> ()
    %cst_92 = arith.constant dense<0.000000e+00> : vector<2x8x8xf32>
    %182 = tpu.matmul %180, %181, %cst_92 {dimension_numbers = #tpu.dot_dimension_numbers<[2], [2], [1], [1], [0, 0, 0, 1, 1, 1], [0], [0]>} : vector<2x8x8xbf16>, vector<2x8x8xbf16>, vector<2x8x8xf32> -> vector<2x8x8xf32>
    "tpu.trace_stop"() : () -> ()
    %cst_93 = arith.constant 0.353553385 : f32
    %183 = vector.broadcast %cst_93 : f32 to vector<2x8x8xf32>
    %184 = arith.mulf %182, %183 : vector<2x8x8xf32>
    %185 = vector.broadcast %62 : vector<2x1x8xf32> to vector<2x8x8xf32>
    %186 = arith.addf %184, %185 : vector<2x8x8xf32>
    %cst_94 = arith.constant dense<0xFF800000> : vector<2x8xf32>
    %187 = vector.multi_reduction <maximumf>, %186, %cst_94 [2] : vector<2x8x8xf32> to vector<2x8xf32>
    %188 = vector.shape_cast %187 : vector<2x8xf32> to vector<2x8x1xf32>
    %189 = vector.broadcast %188 : vector<2x8x1xf32> to vector<2x8x8xf32>
    %190 = arith.subf %186, %189 : vector<2x8x8xf32>
    %191 = math.exp %190 : vector<2x8x8xf32>
    %cst_95 = arith.constant dense<0.000000e+00> : vector<2x8xf32>
    %192 = vector.multi_reduction <add>, %191, %cst_95 [2] : vector<2x8x8xf32> to vector<2x8xf32>
    %193 = vector.shape_cast %192 : vector<2x8xf32> to vector<2x8x1xf32>
    %194 = tpu.reciprocal %193 {approx = true} : vector<2x8x1xf32> -> vector<2x8x1xf32>
    %195 = vector.broadcast %194 : vector<2x8x1xf32> to vector<2x8x8xf32>
    %196 = arith.mulf %191, %195 : vector<2x8x8xf32>
    %197 = arith.truncf %196 : vector<2x8x8xf32> to vector<2x8x8xbf16>
    %198 = arith.truncf %179 : vector<2x8x8xf32> to vector<2x8x8xbf16>
    "tpu.trace_start"() <{level = 10 : i32, message = "bqk,bkd->bqd"}> : () -> ()
    %cst_96 = arith.constant dense<0.000000e+00> : vector<2x8x8xf32>
    %199 = tpu.matmul %197, %198, %cst_96 {dimension_numbers = #tpu.dot_dimension_numbers<[2], [1], [1], [2], [0, 0, 0, 1, 1, 2], [0], [0]>} : vector<2x8x8xbf16>, vector<2x8x8xbf16>, vector<2x8x8xf32> -> vector<2x8x8xf32>
    "tpu.trace_stop"() : () -> ()
    %200 = vector.shape_cast %199 : vector<2x8x8xf32> to vector<16x8xf32>
    %201 = tpu.concatenate %119, %146, %173, %200 in 1 : vector<16x8xf32>, vector<16x8xf32>, vector<16x8xf32>, vector<16x8xf32> -> vector<16x32xf32>
    %202 = arith.truncf %201 : vector<16x32xf32> to vector<16x32xbf16>
    %203 = arith.truncf %24 : vector<32x32xf32> to vector<32x32xbf16>
    %cst_97 = arith.constant dense<0.000000e+00> : vector<16x32xf32>
    %204 = tpu.matmul %202, %203, %cst_97 {dimension_numbers = #tpu.dot_dimension_numbers<[1], [0], [0], [1], [0, 0, 1, 1], [], []>} : vector<16x32xbf16>, vector<32x32xbf16>, vector<16x32xf32> -> vector<16x32xf32>
    %205 = vector.broadcast %23 : vector<1x32xf32> to vector<16x32xf32>
    %206 = arith.addf %204, %205 : vector<16x32xf32>
    %207 = arith.addf %84, %206 : vector<16x32xf32>
    %208 = vector.extract_strided_slice %21 {offsets = [0, 0], sizes = [1, 32], strides = [1, 1]} : vector<2x32xf32> to vector<1x32xf32>
    %209 = vector.extract_strided_slice %21 {offsets = [1, 0], sizes = [1, 32], strides = [1, 1]} : vector<2x32xf32> to vector<1x32xf32>
    %cst_98 = arith.constant dense<0.000000e+00> : vector<16xf32>
    %210 = vector.multi_reduction <add>, %207, %cst_98 [1] : vector<16x32xf32> to vector<16xf32>
    %211 = vector.shape_cast %210 : vector<16xf32> to vector<16x1xf32>
    %cst_99 = arith.constant 3.200000e+01 : f32
    %212 = vector.broadcast %cst_99 : f32 to vector<16x1xf32>
    %213 = arith.divf %211, %212 : vector<16x1xf32>
    %214 = vector.broadcast %213 : vector<16x1xf32> to vector<16x32xf32>
    %215 = arith.subf %207, %214 : vector<16x32xf32>
    %216 = arith.mulf %215, %215 : vector<16x32xf32>
    %cst_100 = arith.constant dense<0.000000e+00> : vector<16xf32>
    %217 = vector.multi_reduction <add>, %216, %cst_100 [1] : vector<16x32xf32> to vector<16xf32>
    %218 = vector.shape_cast %217 : vector<16xf32> to vector<16x1xf32>
    %cst_101 = arith.constant 3.200000e+01 : f32
    %219 = vector.broadcast %cst_101 : f32 to vector<16x1xf32>
    %220 = arith.divf %218, %219 : vector<16x1xf32>
    %cst_102 = arith.constant 9.99999974E-6 : f32
    %221 = vector.broadcast %cst_102 : f32 to vector<16x1xf32>
    %222 = arith.addf %220, %221 : vector<16x1xf32>
    %223 = math.rsqrt %222 : vector<16x1xf32>
    %224 = vector.broadcast %223 : vector<16x1xf32> to vector<16x32xf32>
    %225 = arith.mulf %215, %224 : vector<16x32xf32>
    %226 = vector.broadcast %208 : vector<1x32xf32> to vector<16x32xf32>
    %227 = arith.mulf %225, %226 : vector<16x32xf32>
    %228 = vector.broadcast %209 : vector<1x32xf32> to vector<16x32xf32>
    %229 = arith.addf %227, %228 : vector<16x32xf32>
    %230 = arith.truncf %229 : vector<16x32xf32> to vector<16x32xbf16>
    %231 = arith.truncf %18 : vector<32x64xf32> to vector<32x64xbf16>
    %cst_103 = arith.constant dense<0.000000e+00> : vector<16x64xf32>
    %232 = tpu.matmul %230, %231, %cst_103 {dimension_numbers = #tpu.dot_dimension_numbers<[1], [0], [0], [1], [0, 0, 1, 1], [], []>} : vector<16x32xbf16>, vector<32x64xbf16>, vector<16x64xf32> -> vector<16x64xf32>
    %233 = vector.broadcast %17 : vector<1x64xf32> to vector<16x64xf32>
    %234 = arith.addf %232, %233 : vector<16x64xf32>
    %235 = arith.mulf %234, %234 : vector<16x64xf32>
    %236 = arith.mulf %234, %235 : vector<16x64xf32>
    %cst_104 = arith.constant 4.471500e-02 : f32
    %237 = vector.broadcast %cst_104 : f32 to vector<16x64xf32>
    %238 = arith.mulf %237, %236 : vector<16x64xf32>
    %239 = arith.addf %234, %238 : vector<16x64xf32>
    %cst_105 = arith.constant 0.797884583 : f32
    %240 = vector.broadcast %cst_105 : f32 to vector<16x64xf32>
    %241 = arith.mulf %240, %239 : vector<16x64xf32>
    %242 = math.tanh %241 : vector<16x64xf32>
    %cst_106 = arith.constant 1.000000e+00 : f32
    %243 = vector.broadcast %cst_106 : f32 to vector<16x64xf32>
    %244 = arith.addf %243, %242 : vector<16x64xf32>
    %cst_107 = arith.constant 5.000000e-01 : f32
    %245 = vector.broadcast %cst_107 : f32 to vector<16x64xf32>
    %246 = arith.mulf %245, %244 : vector<16x64xf32>
    %247 = arith.mulf %234, %246 : vector<16x64xf32>
    %248 = arith.truncf %247 : vector<16x64xf32> to vector<16x64xbf16>
    %249 = arith.truncf %20 : vector<64x32xf32> to vector<64x32xbf16>
    %cst_108 = arith.constant dense<0.000000e+00> : vector<16x32xf32>
    %250 = tpu.matmul %248, %249, %cst_108 {dimension_numbers = #tpu.dot_dimension_numbers<[1], [0], [0], [1], [0, 0, 1, 1], [], []>} : vector<16x64xbf16>, vector<64x32xbf16>, vector<16x32xf32> -> vector<16x32xf32>
    %251 = vector.broadcast %19 : vector<1x32xf32> to vector<16x32xf32>
    %252 = arith.addf %250, %251 : vector<16x32xf32>
    %253 = arith.addf %229, %252 : vector<16x32xf32>
    %254 = vector.extract_strided_slice %22 {offsets = [0, 0], sizes = [1, 32], strides = [1, 1]} : vector<2x32xf32> to vector<1x32xf32>
    %255 = vector.extract_strided_slice %22 {offsets = [1, 0], sizes = [1, 32], strides = [1, 1]} : vector<2x32xf32> to vector<1x32xf32>
    %cst_109 = arith.constant dense<0.000000e+00> : vector<16xf32>
    %256 = vector.multi_reduction <add>, %253, %cst_109 [1] : vector<16x32xf32> to vector<16xf32>
    %257 = vector.shape_cast %256 : vector<16xf32> to vector<16x1xf32>
    %cst_110 = arith.constant 3.200000e+01 : f32
    %258 = vector.broadcast %cst_110 : f32 to vector<16x1xf32>
    %259 = arith.divf %257, %258 : vector<16x1xf32>
    %260 = vector.broadcast %259 : vector<16x1xf32> to vector<16x32xf32>
    %261 = arith.subf %253, %260 : vector<16x32xf32>
    %262 = arith.mulf %261, %261 : vector<16x32xf32>
    %cst_111 = arith.constant dense<0.000000e+00> : vector<16xf32>
    %263 = vector.multi_reduction <add>, %262, %cst_111 [1] : vector<16x32xf32> to vector<16xf32>
    %264 = vector.shape_cast %263 : vector<16xf32> to vector<16x1xf32>
    %cst_112 = arith.constant 3.200000e+01 : f32
    %265 = vector.broadcast %cst_112 : f32 to vector<16x1xf32>
    %266 = arith.divf %264, %265 : vector<16x1xf32>
    %cst_113 = arith.constant 9.99999974E-6 : f32
    %267 = vector.broadcast %cst_113 : f32 to vector<16x1xf32>
    %268 = arith.addf %266, %267 : vector<16x1xf32>
    %269 = math.rsqrt %268 : vector<16x1xf32>
    %270 = vector.broadcast %269 : vector<16x1xf32> to vector<16x32xf32>
    %271 = arith.mulf %261, %270 : vector<16x32xf32>
    %272 = vector.broadcast %254 : vector<1x32xf32> to vector<16x32xf32>
    %273 = arith.mulf %271, %272 : vector<16x32xf32>
    %274 = vector.broadcast %255 : vector<1x32xf32> to vector<16x32xf32>
    %275 = arith.addf %273, %274 : vector<16x32xf32>
    %276 = tpu.iota {dimensions = array<i32: 0>} : vector<8x8xi32>
    %277 = tpu.iota {dimensions = array<i32: 1>} : vector<8x8xi32>
    %278 = arith.cmpi sge, %276, %277 : vector<8x8xi32>
    %cst_114 = arith.constant 0.000000e+00 : f32
    %cst_115 = arith.constant -1.000000e+09 : f32
    %279 = vector.broadcast %cst_114 : f32 to vector<8x8xf32>
    %280 = vector.broadcast %cst_115 : f32 to vector<8x8xf32>
    %281 = arith.select %278, %279, %280 : vector<8x8xi1>, vector<8x8xf32>
    %282 = vector.shape_cast %281 : vector<8x8xf32> to vector<1x8x8xf32>
    %283 = vector.extract_strided_slice %28 {offsets = [0, 0], sizes = [1, 32], strides = [1, 1]} : vector<2x32xf32> to vector<1x32xf32>
    %284 = vector.extract_strided_slice %28 {offsets = [1, 0], sizes = [1, 32], strides = [1, 1]} : vector<2x32xf32> to vector<1x32xf32>
    %cst_116 = arith.constant dense<0.000000e+00> : vector<16xf32>
    %285 = vector.multi_reduction <add>, %55, %cst_116 [1] : vector<16x32xf32> to vector<16xf32>
    %286 = vector.shape_cast %285 : vector<16xf32> to vector<16x1xf32>
    %cst_117 = arith.constant 3.200000e+01 : f32
    %287 = vector.broadcast %cst_117 : f32 to vector<16x1xf32>
    %288 = arith.divf %286, %287 : vector<16x1xf32>
    %289 = vector.broadcast %288 : vector<16x1xf32> to vector<16x32xf32>
    %290 = arith.subf %55, %289 : vector<16x32xf32>
    %291 = arith.mulf %290, %290 : vector<16x32xf32>
    %cst_118 = arith.constant dense<0.000000e+00> : vector<16xf32>
    %292 = vector.multi_reduction <add>, %291, %cst_118 [1] : vector<16x32xf32> to vector<16xf32>
    %293 = vector.shape_cast %292 : vector<16xf32> to vector<16x1xf32>
    %cst_119 = arith.constant 3.200000e+01 : f32
    %294 = vector.broadcast %cst_119 : f32 to vector<16x1xf32>
    %295 = arith.divf %293, %294 : vector<16x1xf32>
    %cst_120 = arith.constant 9.99999974E-6 : f32
    %296 = vector.broadcast %cst_120 : f32 to vector<16x1xf32>
    %297 = arith.addf %295, %296 : vector<16x1xf32>
    %298 = math.rsqrt %297 : vector<16x1xf32>
    %299 = vector.broadcast %298 : vector<16x1xf32> to vector<16x32xf32>
    %300 = arith.mulf %290, %299 : vector<16x32xf32>
    %301 = vector.broadcast %283 : vector<1x32xf32> to vector<16x32xf32>
    %302 = arith.mulf %300, %301 : vector<16x32xf32>
    %303 = vector.broadcast %284 : vector<1x32xf32> to vector<16x32xf32>
    %304 = arith.addf %302, %303 : vector<16x32xf32>
    %305 = arith.truncf %304 : vector<16x32xf32> to vector<16x32xbf16>
    %306 = arith.truncf %10 : vector<32x96xf32> to vector<32x96xbf16>
    %cst_121 = arith.constant dense<0.000000e+00> : vector<16x96xf32>
    %307 = tpu.matmul %305, %306, %cst_121 {dimension_numbers = #tpu.dot_dimension_numbers<[1], [0], [0], [1], [0, 0, 1, 1], [], []>} : vector<16x32xbf16>, vector<32x96xbf16>, vector<16x96xf32> -> vector<16x96xf32>
    %308 = vector.broadcast %9 : vector<1x96xf32> to vector<16x96xf32>
    %309 = arith.addf %307, %308 : vector<16x96xf32>
    %310 = vector.extract_strided_slice %309 {offsets = [0, 0], sizes = [16, 32], strides = [1, 1]} : vector<16x96xf32> to vector<16x32xf32>
    %311 = vector.extract_strided_slice %309 {offsets = [0, 32], sizes = [16, 32], strides = [1, 1]} : vector<16x96xf32> to vector<16x32xf32>
    %312 = vector.extract_strided_slice %309 {offsets = [0, 64], sizes = [16, 32], strides = [1, 1]} : vector<16x96xf32> to vector<16x32xf32>
    %313 = vector.extract_strided_slice %310 {offsets = [0, 0], sizes = [16, 8], strides = [1, 1]} : vector<16x32xf32> to vector<16x8xf32>
    %314 = vector.shape_cast %313 : vector<16x8xf32> to vector<2x8x8xf32>
    %315 = vector.extract_strided_slice %311 {offsets = [0, 0], sizes = [16, 8], strides = [1, 1]} : vector<16x32xf32> to vector<16x8xf32>
    %316 = vector.shape_cast %315 : vector<16x8xf32> to vector<2x8x8xf32>
    %317 = vector.extract_strided_slice %312 {offsets = [0, 0], sizes = [16, 8], strides = [1, 1]} : vector<16x32xf32> to vector<16x8xf32>
    %318 = vector.shape_cast %317 : vector<16x8xf32> to vector<2x8x8xf32>
    %319 = arith.truncf %314 : vector<2x8x8xf32> to vector<2x8x8xbf16>
    %320 = arith.truncf %316 : vector<2x8x8xf32> to vector<2x8x8xbf16>
    "tpu.trace_start"() <{level = 10 : i32, message = "bqd,bkd->bqk"}> : () -> ()
    %cst_122 = arith.constant dense<0.000000e+00> : vector<2x8x8xf32>
    %321 = tpu.matmul %319, %320, %cst_122 {dimension_numbers = #tpu.dot_dimension_numbers<[2], [2], [1], [1], [0, 0, 0, 1, 1, 1], [0], [0]>} : vector<2x8x8xbf16>, vector<2x8x8xbf16>, vector<2x8x8xf32> -> vector<2x8x8xf32>
    "tpu.trace_stop"() : () -> ()
    %cst_123 = arith.constant 0.353553385 : f32
    %322 = vector.broadcast %cst_123 : f32 to vector<2x8x8xf32>
    %323 = arith.mulf %321, %322 : vector<2x8x8xf32>
    %324 = vector.broadcast %282 : vector<1x8x8xf32> to vector<2x8x8xf32>
    %325 = arith.addf %323, %324 : vector<2x8x8xf32>
    %cst_124 = arith.constant dense<0xFF800000> : vector<2x8xf32>
    %326 = vector.multi_reduction <maximumf>, %325, %cst_124 [2] : vector<2x8x8xf32> to vector<2x8xf32>
    %327 = vector.shape_cast %326 : vector<2x8xf32> to vector<2x8x1xf32>
    %328 = vector.broadcast %327 : vector<2x8x1xf32> to vector<2x8x8xf32>
    %329 = arith.subf %325, %328 : vector<2x8x8xf32>
    %330 = math.exp %329 : vector<2x8x8xf32>
    %cst_125 = arith.constant dense<0.000000e+00> : vector<2x8xf32>
    %331 = vector.multi_reduction <add>, %330, %cst_125 [2] : vector<2x8x8xf32> to vector<2x8xf32>
    %332 = vector.shape_cast %331 : vector<2x8xf32> to vector<2x8x1xf32>
    %333 = tpu.reciprocal %332 {approx = true} : vector<2x8x1xf32> -> vector<2x8x1xf32>
    %334 = vector.broadcast %333 : vector<2x8x1xf32> to vector<2x8x8xf32>
    %335 = arith.mulf %330, %334 : vector<2x8x8xf32>
    %336 = arith.truncf %335 : vector<2x8x8xf32> to vector<2x8x8xbf16>
    %337 = arith.truncf %318 : vector<2x8x8xf32> to vector<2x8x8xbf16>
    "tpu.trace_start"() <{level = 10 : i32, message = "bqk,bkd->bqd"}> : () -> ()
    %cst_126 = arith.constant dense<0.000000e+00> : vector<2x8x8xf32>
    %338 = tpu.matmul %336, %337, %cst_126 {dimension_numbers = #tpu.dot_dimension_numbers<[2], [1], [1], [2], [0, 0, 0, 1, 1, 2], [0], [0]>} : vector<2x8x8xbf16>, vector<2x8x8xbf16>, vector<2x8x8xf32> -> vector<2x8x8xf32>
    "tpu.trace_stop"() : () -> ()
    %339 = vector.shape_cast %338 : vector<2x8x8xf32> to vector<16x8xf32>
    %340 = vector.extract_strided_slice %310 {offsets = [0, 8], sizes = [16, 8], strides = [1, 1]} : vector<16x32xf32> to vector<16x8xf32>
    %341 = vector.shape_cast %340 : vector<16x8xf32> to vector<2x8x8xf32>
    %342 = vector.extract_strided_slice %311 {offsets = [0, 8], sizes = [16, 8], strides = [1, 1]} : vector<16x32xf32> to vector<16x8xf32>
    %343 = vector.shape_cast %342 : vector<16x8xf32> to vector<2x8x8xf32>
    %344 = vector.extract_strided_slice %312 {offsets = [0, 8], sizes = [16, 8], strides = [1, 1]} : vector<16x32xf32> to vector<16x8xf32>
    %345 = vector.shape_cast %344 : vector<16x8xf32> to vector<2x8x8xf32>
    %346 = arith.truncf %341 : vector<2x8x8xf32> to vector<2x8x8xbf16>
    %347 = arith.truncf %343 : vector<2x8x8xf32> to vector<2x8x8xbf16>
    "tpu.trace_start"() <{level = 10 : i32, message = "bqd,bkd->bqk"}> : () -> ()
    %cst_127 = arith.constant dense<0.000000e+00> : vector<2x8x8xf32>
    %348 = tpu.matmul %346, %347, %cst_127 {dimension_numbers = #tpu.dot_dimension_numbers<[2], [2], [1], [1], [0, 0, 0, 1, 1, 1], [0], [0]>} : vector<2x8x8xbf16>, vector<2x8x8xbf16>, vector<2x8x8xf32> -> vector<2x8x8xf32>
    "tpu.trace_stop"() : () -> ()
    %cst_128 = arith.constant 0.353553385 : f32
    %349 = vector.broadcast %cst_128 : f32 to vector<2x8x8xf32>
    %350 = arith.mulf %348, %349 : vector<2x8x8xf32>
    %351 = vector.broadcast %282 : vector<1x8x8xf32> to vector<2x8x8xf32>
    %352 = arith.addf %350, %351 : vector<2x8x8xf32>
    %cst_129 = arith.constant dense<0xFF800000> : vector<2x8xf32>
    %353 = vector.multi_reduction <maximumf>, %352, %cst_129 [2] : vector<2x8x8xf32> to vector<2x8xf32>
    %354 = vector.shape_cast %353 : vector<2x8xf32> to vector<2x8x1xf32>
    %355 = vector.broadcast %354 : vector<2x8x1xf32> to vector<2x8x8xf32>
    %356 = arith.subf %352, %355 : vector<2x8x8xf32>
    %357 = math.exp %356 : vector<2x8x8xf32>
    %cst_130 = arith.constant dense<0.000000e+00> : vector<2x8xf32>
    %358 = vector.multi_reduction <add>, %357, %cst_130 [2] : vector<2x8x8xf32> to vector<2x8xf32>
    %359 = vector.shape_cast %358 : vector<2x8xf32> to vector<2x8x1xf32>
    %360 = tpu.reciprocal %359 {approx = true} : vector<2x8x1xf32> -> vector<2x8x1xf32>
    %361 = vector.broadcast %360 : vector<2x8x1xf32> to vector<2x8x8xf32>
    %362 = arith.mulf %357, %361 : vector<2x8x8xf32>
    %363 = arith.truncf %362 : vector<2x8x8xf32> to vector<2x8x8xbf16>
    %364 = arith.truncf %345 : vector<2x8x8xf32> to vector<2x8x8xbf16>
    "tpu.trace_start"() <{level = 10 : i32, message = "bqk,bkd->bqd"}> : () -> ()
    %cst_131 = arith.constant dense<0.000000e+00> : vector<2x8x8xf32>
    %365 = tpu.matmul %363, %364, %cst_131 {dimension_numbers = #tpu.dot_dimension_numbers<[2], [1], [1], [2], [0, 0, 0, 1, 1, 2], [0], [0]>} : vector<2x8x8xbf16>, vector<2x8x8xbf16>, vector<2x8x8xf32> -> vector<2x8x8xf32>
    "tpu.trace_stop"() : () -> ()
    %366 = vector.shape_cast %365 : vector<2x8x8xf32> to vector<16x8xf32>
    %367 = vector.extract_strided_slice %310 {offsets = [0, 16], sizes = [16, 8], strides = [1, 1]} : vector<16x32xf32> to vector<16x8xf32>
    %368 = vector.shape_cast %367 : vector<16x8xf32> to vector<2x8x8xf32>
    %369 = vector.extract_strided_slice %311 {offsets = [0, 16], sizes = [16, 8], strides = [1, 1]} : vector<16x32xf32> to vector<16x8xf32>
    %370 = vector.shape_cast %369 : vector<16x8xf32> to vector<2x8x8xf32>
    %371 = vector.extract_strided_slice %312 {offsets = [0, 16], sizes = [16, 8], strides = [1, 1]} : vector<16x32xf32> to vector<16x8xf32>
    %372 = vector.shape_cast %371 : vector<16x8xf32> to vector<2x8x8xf32>
    %373 = arith.truncf %368 : vector<2x8x8xf32> to vector<2x8x8xbf16>
    %374 = arith.truncf %370 : vector<2x8x8xf32> to vector<2x8x8xbf16>
    "tpu.trace_start"() <{level = 10 : i32, message = "bqd,bkd->bqk"}> : () -> ()
    %cst_132 = arith.constant dense<0.000000e+00> : vector<2x8x8xf32>
    %375 = tpu.matmul %373, %374, %cst_132 {dimension_numbers = #tpu.dot_dimension_numbers<[2], [2], [1], [1], [0, 0, 0, 1, 1, 1], [0], [0]>} : vector<2x8x8xbf16>, vector<2x8x8xbf16>, vector<2x8x8xf32> -> vector<2x8x8xf32>
    "tpu.trace_stop"() : () -> ()
    %cst_133 = arith.constant 0.353553385 : f32
    %376 = vector.broadcast %cst_133 : f32 to vector<2x8x8xf32>
    %377 = arith.mulf %375, %376 : vector<2x8x8xf32>
    %378 = vector.broadcast %282 : vector<1x8x8xf32> to vector<2x8x8xf32>
    %379 = arith.addf %377, %378 : vector<2x8x8xf32>
    %cst_134 = arith.constant dense<0xFF800000> : vector<2x8xf32>
    %380 = vector.multi_reduction <maximumf>, %379, %cst_134 [2] : vector<2x8x8xf32> to vector<2x8xf32>
    %381 = vector.shape_cast %380 : vector<2x8xf32> to vector<2x8x1xf32>
    %382 = vector.broadcast %381 : vector<2x8x1xf32> to vector<2x8x8xf32>
    %383 = arith.subf %379, %382 : vector<2x8x8xf32>
    %384 = math.exp %383 : vector<2x8x8xf32>
    %cst_135 = arith.constant dense<0.000000e+00> : vector<2x8xf32>
    %385 = vector.multi_reduction <add>, %384, %cst_135 [2] : vector<2x8x8xf32> to vector<2x8xf32>
    %386 = vector.shape_cast %385 : vector<2x8xf32> to vector<2x8x1xf32>
    %387 = tpu.reciprocal %386 {approx = true} : vector<2x8x1xf32> -> vector<2x8x1xf32>
    %388 = vector.broadcast %387 : vector<2x8x1xf32> to vector<2x8x8xf32>
    %389 = arith.mulf %384, %388 : vector<2x8x8xf32>
    %390 = arith.truncf %389 : vector<2x8x8xf32> to vector<2x8x8xbf16>
    %391 = arith.truncf %372 : vector<2x8x8xf32> to vector<2x8x8xbf16>
    "tpu.trace_start"() <{level = 10 : i32, message = "bqk,bkd->bqd"}> : () -> ()
    %cst_136 = arith.constant dense<0.000000e+00> : vector<2x8x8xf32>
    %392 = tpu.matmul %390, %391, %cst_136 {dimension_numbers = #tpu.dot_dimension_numbers<[2], [1], [1], [2], [0, 0, 0, 1, 1, 2], [0], [0]>} : vector<2x8x8xbf16>, vector<2x8x8xbf16>, vector<2x8x8xf32> -> vector<2x8x8xf32>
    "tpu.trace_stop"() : () -> ()
    %393 = vector.shape_cast %392 : vector<2x8x8xf32> to vector<16x8xf32>
    %394 = vector.extract_strided_slice %310 {offsets = [0, 24], sizes = [16, 8], strides = [1, 1]} : vector<16x32xf32> to vector<16x8xf32>
    %395 = vector.shape_cast %394 : vector<16x8xf32> to vector<2x8x8xf32>
    %396 = vector.extract_strided_slice %311 {offsets = [0, 24], sizes = [16, 8], strides = [1, 1]} : vector<16x32xf32> to vector<16x8xf32>
    %397 = vector.shape_cast %396 : vector<16x8xf32> to vector<2x8x8xf32>
    %398 = vector.extract_strided_slice %312 {offsets = [0, 24], sizes = [16, 8], strides = [1, 1]} : vector<16x32xf32> to vector<16x8xf32>
    %399 = vector.shape_cast %398 : vector<16x8xf32> to vector<2x8x8xf32>
    %400 = arith.truncf %395 : vector<2x8x8xf32> to vector<2x8x8xbf16>
    %401 = arith.truncf %397 : vector<2x8x8xf32> to vector<2x8x8xbf16>
    "tpu.trace_start"() <{level = 10 : i32, message = "bqd,bkd->bqk"}> : () -> ()
    %cst_137 = arith.constant dense<0.000000e+00> : vector<2x8x8xf32>
    %402 = tpu.matmul %400, %401, %cst_137 {dimension_numbers = #tpu.dot_dimension_numbers<[2], [2], [1], [1], [0, 0, 0, 1, 1, 1], [0], [0]>} : vector<2x8x8xbf16>, vector<2x8x8xbf16>, vector<2x8x8xf32> -> vector<2x8x8xf32>
    "tpu.trace_stop"() : () -> ()
    %cst_138 = arith.constant 0.353553385 : f32
    %403 = vector.broadcast %cst_138 : f32 to vector<2x8x8xf32>
    %404 = arith.mulf %402, %403 : vector<2x8x8xf32>
    %405 = vector.broadcast %282 : vector<1x8x8xf32> to vector<2x8x8xf32>
    %406 = arith.addf %404, %405 : vector<2x8x8xf32>
    %cst_139 = arith.constant dense<0xFF800000> : vector<2x8xf32>
    %407 = vector.multi_reduction <maximumf>, %406, %cst_139 [2] : vector<2x8x8xf32> to vector<2x8xf32>
    %408 = vector.shape_cast %407 : vector<2x8xf32> to vector<2x8x1xf32>
    %409 = vector.broadcast %408 : vector<2x8x1xf32> to vector<2x8x8xf32>
    %410 = arith.subf %406, %409 : vector<2x8x8xf32>
    %411 = math.exp %410 : vector<2x8x8xf32>
    %cst_140 = arith.constant dense<0.000000e+00> : vector<2x8xf32>
    %412 = vector.multi_reduction <add>, %411, %cst_140 [2] : vector<2x8x8xf32> to vector<2x8xf32>
    %413 = vector.shape_cast %412 : vector<2x8xf32> to vector<2x8x1xf32>
    %414 = tpu.reciprocal %413 {approx = true} : vector<2x8x1xf32> -> vector<2x8x1xf32>
    %415 = vector.broadcast %414 : vector<2x8x1xf32> to vector<2x8x8xf32>
    %416 = arith.mulf %411, %415 : vector<2x8x8xf32>
    %417 = arith.truncf %416 : vector<2x8x8xf32> to vector<2x8x8xbf16>
    %418 = arith.truncf %399 : vector<2x8x8xf32> to vector<2x8x8xbf16>
    "tpu.trace_start"() <{level = 10 : i32, message = "bqk,bkd->bqd"}> : () -> ()
    %cst_141 = arith.constant dense<0.000000e+00> : vector<2x8x8xf32>
    %419 = tpu.matmul %417, %418, %cst_141 {dimension_numbers = #tpu.dot_dimension_numbers<[2], [1], [1], [2], [0, 0, 0, 1, 1, 2], [0], [0]>} : vector<2x8x8xbf16>, vector<2x8x8xbf16>, vector<2x8x8xf32> -> vector<2x8x8xf32>
    "tpu.trace_stop"() : () -> ()
    %420 = vector.shape_cast %419 : vector<2x8x8xf32> to vector<16x8xf32>
    %421 = tpu.concatenate %339, %366, %393, %420 in 1 : vector<16x8xf32>, vector<16x8xf32>, vector<16x8xf32>, vector<16x8xf32> -> vector<16x32xf32>
    %422 = arith.truncf %421 : vector<16x32xf32> to vector<16x32xbf16>
    %423 = arith.truncf %8 : vector<32x32xf32> to vector<32x32xbf16>
    %cst_142 = arith.constant dense<0.000000e+00> : vector<16x32xf32>
    %424 = tpu.matmul %422, %423, %cst_142 {dimension_numbers = #tpu.dot_dimension_numbers<[1], [0], [0], [1], [0, 0, 1, 1], [], []>} : vector<16x32xbf16>, vector<32x32xbf16>, vector<16x32xf32> -> vector<16x32xf32>
    %425 = vector.broadcast %7 : vector<1x32xf32> to vector<16x32xf32>
    %426 = arith.addf %424, %425 : vector<16x32xf32>
    %427 = arith.addf %304, %426 : vector<16x32xf32>
    %428 = vector.extract_strided_slice %4 {offsets = [0, 0], sizes = [1, 32], strides = [1, 1]} : vector<2x32xf32> to vector<1x32xf32>
    %429 = vector.extract_strided_slice %4 {offsets = [1, 0], sizes = [1, 32], strides = [1, 1]} : vector<2x32xf32> to vector<1x32xf32>
    %cst_143 = arith.constant dense<0.000000e+00> : vector<16xf32>
    %430 = vector.multi_reduction <add>, %427, %cst_143 [1] : vector<16x32xf32> to vector<16xf32>
    %431 = vector.shape_cast %430 : vector<16xf32> to vector<16x1xf32>
    %cst_144 = arith.constant 3.200000e+01 : f32
    %432 = vector.broadcast %cst_144 : f32 to vector<16x1xf32>
    %433 = arith.divf %431, %432 : vector<16x1xf32>
    %434 = vector.broadcast %433 : vector<16x1xf32> to vector<16x32xf32>
    %435 = arith.subf %427, %434 : vector<16x32xf32>
    %436 = arith.mulf %435, %435 : vector<16x32xf32>
    %cst_145 = arith.constant dense<0.000000e+00> : vector<16xf32>
    %437 = vector.multi_reduction <add>, %436, %cst_145 [1] : vector<16x32xf32> to vector<16xf32>
    %438 = vector.shape_cast %437 : vector<16xf32> to vector<16x1xf32>
    %cst_146 = arith.constant 3.200000e+01 : f32
    %439 = vector.broadcast %cst_146 : f32 to vector<16x1xf32>
    %440 = arith.divf %438, %439 : vector<16x1xf32>
    %cst_147 = arith.constant 9.99999974E-6 : f32
    %441 = vector.broadcast %cst_147 : f32 to vector<16x1xf32>
    %442 = arith.addf %440, %441 : vector<16x1xf32>
    %443 = math.rsqrt %442 : vector<16x1xf32>
    %444 = vector.broadcast %443 : vector<16x1xf32> to vector<16x32xf32>
    %445 = arith.mulf %435, %444 : vector<16x32xf32>
    %446 = vector.broadcast %428 : vector<1x32xf32> to vector<16x32xf32>
    %447 = arith.mulf %445, %446 : vector<16x32xf32>
    %448 = vector.broadcast %429 : vector<1x32xf32> to vector<16x32xf32>
    %449 = arith.addf %447, %448 : vector<16x32xf32>
    %450 = arith.truncf %449 : vector<16x32xf32> to vector<16x32xbf16>
    %451 = arith.truncf %16 : vector<32x32xf32> to vector<32x32xbf16>
    %cst_148 = arith.constant dense<0.000000e+00> : vector<16x32xf32>
    %452 = tpu.matmul %450, %451, %cst_148 {dimension_numbers = #tpu.dot_dimension_numbers<[1], [0], [0], [1], [0, 0, 1, 1], [], []>} : vector<16x32xbf16>, vector<32x32xbf16>, vector<16x32xf32> -> vector<16x32xf32>
    %453 = vector.broadcast %15 : vector<1x32xf32> to vector<16x32xf32>
    %454 = arith.addf %452, %453 : vector<16x32xf32>
    %455 = arith.truncf %275 : vector<16x32xf32> to vector<16x32xbf16>
    %456 = arith.truncf %12 : vector<32x64xf32> to vector<32x64xbf16>
    %cst_149 = arith.constant dense<0.000000e+00> : vector<16x64xf32>
    %457 = tpu.matmul %455, %456, %cst_149 {dimension_numbers = #tpu.dot_dimension_numbers<[1], [0], [0], [1], [0, 0, 1, 1], [], []>} : vector<16x32xbf16>, vector<32x64xbf16>, vector<16x64xf32> -> vector<16x64xf32>
    %458 = vector.broadcast %11 : vector<1x64xf32> to vector<16x64xf32>
    %459 = arith.addf %457, %458 : vector<16x64xf32>
    %460 = vector.extract_strided_slice %459 {offsets = [0, 0], sizes = [16, 32], strides = [1, 1]} : vector<16x64xf32> to vector<16x32xf32>
    %461 = vector.extract_strided_slice %459 {offsets = [0, 32], sizes = [16, 32], strides = [1, 1]} : vector<16x64xf32> to vector<16x32xf32>
    %462 = vector.extract_strided_slice %454 {offsets = [0, 0], sizes = [16, 8], strides = [1, 1]} : vector<16x32xf32> to vector<16x8xf32>
    %463 = vector.shape_cast %462 : vector<16x8xf32> to vector<2x8x8xf32>
    %464 = vector.extract_strided_slice %460 {offsets = [0, 0], sizes = [16, 8], strides = [1, 1]} : vector<16x32xf32> to vector<16x8xf32>
    %465 = vector.shape_cast %464 : vector<16x8xf32> to vector<2x8x8xf32>
    %466 = vector.extract_strided_slice %461 {offsets = [0, 0], sizes = [16, 8], strides = [1, 1]} : vector<16x32xf32> to vector<16x8xf32>
    %467 = vector.shape_cast %466 : vector<16x8xf32> to vector<2x8x8xf32>
    %468 = arith.truncf %463 : vector<2x8x8xf32> to vector<2x8x8xbf16>
    %469 = arith.truncf %465 : vector<2x8x8xf32> to vector<2x8x8xbf16>
    "tpu.trace_start"() <{level = 10 : i32, message = "bqd,bkd->bqk"}> : () -> ()
    %cst_150 = arith.constant dense<0.000000e+00> : vector<2x8x8xf32>
    %470 = tpu.matmul %468, %469, %cst_150 {dimension_numbers = #tpu.dot_dimension_numbers<[2], [2], [1], [1], [0, 0, 0, 1, 1, 1], [0], [0]>} : vector<2x8x8xbf16>, vector<2x8x8xbf16>, vector<2x8x8xf32> -> vector<2x8x8xf32>
    "tpu.trace_stop"() : () -> ()
    %cst_151 = arith.constant 0.353553385 : f32
    %471 = vector.broadcast %cst_151 : f32 to vector<2x8x8xf32>
    %472 = arith.mulf %470, %471 : vector<2x8x8xf32>
    %473 = vector.broadcast %62 : vector<2x1x8xf32> to vector<2x8x8xf32>
    %474 = arith.addf %472, %473 : vector<2x8x8xf32>
    %cst_152 = arith.constant dense<0xFF800000> : vector<2x8xf32>
    %475 = vector.multi_reduction <maximumf>, %474, %cst_152 [2] : vector<2x8x8xf32> to vector<2x8xf32>
    %476 = vector.shape_cast %475 : vector<2x8xf32> to vector<2x8x1xf32>
    %477 = vector.broadcast %476 : vector<2x8x1xf32> to vector<2x8x8xf32>
    %478 = arith.subf %474, %477 : vector<2x8x8xf32>
    %479 = math.exp %478 : vector<2x8x8xf32>
    %cst_153 = arith.constant dense<0.000000e+00> : vector<2x8xf32>
    %480 = vector.multi_reduction <add>, %479, %cst_153 [2] : vector<2x8x8xf32> to vector<2x8xf32>
    %481 = vector.shape_cast %480 : vector<2x8xf32> to vector<2x8x1xf32>
    %482 = tpu.reciprocal %481 {approx = true} : vector<2x8x1xf32> -> vector<2x8x1xf32>
    %483 = vector.broadcast %482 : vector<2x8x1xf32> to vector<2x8x8xf32>
    %484 = arith.mulf %479, %483 : vector<2x8x8xf32>
    %485 = arith.truncf %484 : vector<2x8x8xf32> to vector<2x8x8xbf16>
    %486 = arith.truncf %467 : vector<2x8x8xf32> to vector<2x8x8xbf16>
    "tpu.trace_start"() <{level = 10 : i32, message = "bqk,bkd->bqd"}> : () -> ()
    %cst_154 = arith.constant dense<0.000000e+00> : vector<2x8x8xf32>
    %487 = tpu.matmul %485, %486, %cst_154 {dimension_numbers = #tpu.dot_dimension_numbers<[2], [1], [1], [2], [0, 0, 0, 1, 1, 2], [0], [0]>} : vector<2x8x8xbf16>, vector<2x8x8xbf16>, vector<2x8x8xf32> -> vector<2x8x8xf32>
    "tpu.trace_stop"() : () -> ()
    %488 = vector.shape_cast %487 : vector<2x8x8xf32> to vector<16x8xf32>
    %489 = vector.extract_strided_slice %454 {offsets = [0, 8], sizes = [16, 8], strides = [1, 1]} : vector<16x32xf32> to vector<16x8xf32>
    %490 = vector.shape_cast %489 : vector<16x8xf32> to vector<2x8x8xf32>
    %491 = vector.extract_strided_slice %460 {offsets = [0, 8], sizes = [16, 8], strides = [1, 1]} : vector<16x32xf32> to vector<16x8xf32>
    %492 = vector.shape_cast %491 : vector<16x8xf32> to vector<2x8x8xf32>
    %493 = vector.extract_strided_slice %461 {offsets = [0, 8], sizes = [16, 8], strides = [1, 1]} : vector<16x32xf32> to vector<16x8xf32>
    %494 = vector.shape_cast %493 : vector<16x8xf32> to vector<2x8x8xf32>
    %495 = arith.truncf %490 : vector<2x8x8xf32> to vector<2x8x8xbf16>
    %496 = arith.truncf %492 : vector<2x8x8xf32> to vector<2x8x8xbf16>
    "tpu.trace_start"() <{level = 10 : i32, message = "bqd,bkd->bqk"}> : () -> ()
    %cst_155 = arith.constant dense<0.000000e+00> : vector<2x8x8xf32>
    %497 = tpu.matmul %495, %496, %cst_155 {dimension_numbers = #tpu.dot_dimension_numbers<[2], [2], [1], [1], [0, 0, 0, 1, 1, 1], [0], [0]>} : vector<2x8x8xbf16>, vector<2x8x8xbf16>, vector<2x8x8xf32> -> vector<2x8x8xf32>
    "tpu.trace_stop"() : () -> ()
    %cst_156 = arith.constant 0.353553385 : f32
    %498 = vector.broadcast %cst_156 : f32 to vector<2x8x8xf32>
    %499 = arith.mulf %497, %498 : vector<2x8x8xf32>
    %500 = vector.broadcast %62 : vector<2x1x8xf32> to vector<2x8x8xf32>
    %501 = arith.addf %499, %500 : vector<2x8x8xf32>
    %cst_157 = arith.constant dense<0xFF800000> : vector<2x8xf32>
    %502 = vector.multi_reduction <maximumf>, %501, %cst_157 [2] : vector<2x8x8xf32> to vector<2x8xf32>
    %503 = vector.shape_cast %502 : vector<2x8xf32> to vector<2x8x1xf32>
    %504 = vector.broadcast %503 : vector<2x8x1xf32> to vector<2x8x8xf32>
    %505 = arith.subf %501, %504 : vector<2x8x8xf32>
    %506 = math.exp %505 : vector<2x8x8xf32>
    %cst_158 = arith.constant dense<0.000000e+00> : vector<2x8xf32>
    %507 = vector.multi_reduction <add>, %506, %cst_158 [2] : vector<2x8x8xf32> to vector<2x8xf32>
    %508 = vector.shape_cast %507 : vector<2x8xf32> to vector<2x8x1xf32>
    %509 = tpu.reciprocal %508 {approx = true} : vector<2x8x1xf32> -> vector<2x8x1xf32>
    %510 = vector.broadcast %509 : vector<2x8x1xf32> to vector<2x8x8xf32>
    %511 = arith.mulf %506, %510 : vector<2x8x8xf32>
    %512 = arith.truncf %511 : vector<2x8x8xf32> to vector<2x8x8xbf16>
    %513 = arith.truncf %494 : vector<2x8x8xf32> to vector<2x8x8xbf16>
    "tpu.trace_start"() <{level = 10 : i32, message = "bqk,bkd->bqd"}> : () -> ()
    %cst_159 = arith.constant dense<0.000000e+00> : vector<2x8x8xf32>
    %514 = tpu.matmul %512, %513, %cst_159 {dimension_numbers = #tpu.dot_dimension_numbers<[2], [1], [1], [2], [0, 0, 0, 1, 1, 2], [0], [0]>} : vector<2x8x8xbf16>, vector<2x8x8xbf16>, vector<2x8x8xf32> -> vector<2x8x8xf32>
    "tpu.trace_stop"() : () -> ()
    %515 = vector.shape_cast %514 : vector<2x8x8xf32> to vector<16x8xf32>
    %516 = vector.extract_strided_slice %454 {offsets = [0, 16], sizes = [16, 8], strides = [1, 1]} : vector<16x32xf32> to vector<16x8xf32>
    %517 = vector.shape_cast %516 : vector<16x8xf32> to vector<2x8x8xf32>
    %518 = vector.extract_strided_slice %460 {offsets = [0, 16], sizes = [16, 8], strides = [1, 1]} : vector<16x32xf32> to vector<16x8xf32>
    %519 = vector.shape_cast %518 : vector<16x8xf32> to vector<2x8x8xf32>
    %520 = vector.extract_strided_slice %461 {offsets = [0, 16], sizes = [16, 8], strides = [1, 1]} : vector<16x32xf32> to vector<16x8xf32>
    %521 = vector.shape_cast %520 : vector<16x8xf32> to vector<2x8x8xf32>
    %522 = arith.truncf %517 : vector<2x8x8xf32> to vector<2x8x8xbf16>
    %523 = arith.truncf %519 : vector<2x8x8xf32> to vector<2x8x8xbf16>
    "tpu.trace_start"() <{level = 10 : i32, message = "bqd,bkd->bqk"}> : () -> ()
    %cst_160 = arith.constant dense<0.000000e+00> : vector<2x8x8xf32>
    %524 = tpu.matmul %522, %523, %cst_160 {dimension_numbers = #tpu.dot_dimension_numbers<[2], [2], [1], [1], [0, 0, 0, 1, 1, 1], [0], [0]>} : vector<2x8x8xbf16>, vector<2x8x8xbf16>, vector<2x8x8xf32> -> vector<2x8x8xf32>
    "tpu.trace_stop"() : () -> ()
    %cst_161 = arith.constant 0.353553385 : f32
    %525 = vector.broadcast %cst_161 : f32 to vector<2x8x8xf32>
    %526 = arith.mulf %524, %525 : vector<2x8x8xf32>
    %527 = vector.broadcast %62 : vector<2x1x8xf32> to vector<2x8x8xf32>
    %528 = arith.addf %526, %527 : vector<2x8x8xf32>
    %cst_162 = arith.constant dense<0xFF800000> : vector<2x8xf32>
    %529 = vector.multi_reduction <maximumf>, %528, %cst_162 [2] : vector<2x8x8xf32> to vector<2x8xf32>
    %530 = vector.shape_cast %529 : vector<2x8xf32> to vector<2x8x1xf32>
    %531 = vector.broadcast %530 : vector<2x8x1xf32> to vector<2x8x8xf32>
    %532 = arith.subf %528, %531 : vector<2x8x8xf32>
    %533 = math.exp %532 : vector<2x8x8xf32>
    %cst_163 = arith.constant dense<0.000000e+00> : vector<2x8xf32>
    %534 = vector.multi_reduction <add>, %533, %cst_163 [2] : vector<2x8x8xf32> to vector<2x8xf32>
    %535 = vector.shape_cast %534 : vector<2x8xf32> to vector<2x8x1xf32>
    %536 = tpu.reciprocal %535 {approx = true} : vector<2x8x1xf32> -> vector<2x8x1xf32>
    %537 = vector.broadcast %536 : vector<2x8x1xf32> to vector<2x8x8xf32>
    %538 = arith.mulf %533, %537 : vector<2x8x8xf32>
    %539 = arith.truncf %538 : vector<2x8x8xf32> to vector<2x8x8xbf16>
    %540 = arith.truncf %521 : vector<2x8x8xf32> to vector<2x8x8xbf16>
    "tpu.trace_start"() <{level = 10 : i32, message = "bqk,bkd->bqd"}> : () -> ()
    %cst_164 = arith.constant dense<0.000000e+00> : vector<2x8x8xf32>
    %541 = tpu.matmul %539, %540, %cst_164 {dimension_numbers = #tpu.dot_dimension_numbers<[2], [1], [1], [2], [0, 0, 0, 1, 1, 2], [0], [0]>} : vector<2x8x8xbf16>, vector<2x8x8xbf16>, vector<2x8x8xf32> -> vector<2x8x8xf32>
    "tpu.trace_stop"() : () -> ()
    %542 = vector.shape_cast %541 : vector<2x8x8xf32> to vector<16x8xf32>
    %543 = vector.extract_strided_slice %454 {offsets = [0, 24], sizes = [16, 8], strides = [1, 1]} : vector<16x32xf32> to vector<16x8xf32>
    %544 = vector.shape_cast %543 : vector<16x8xf32> to vector<2x8x8xf32>
    %545 = vector.extract_strided_slice %460 {offsets = [0, 24], sizes = [16, 8], strides = [1, 1]} : vector<16x32xf32> to vector<16x8xf32>
    %546 = vector.shape_cast %545 : vector<16x8xf32> to vector<2x8x8xf32>
    %547 = vector.extract_strided_slice %461 {offsets = [0, 24], sizes = [16, 8], strides = [1, 1]} : vector<16x32xf32> to vector<16x8xf32>
    %548 = vector.shape_cast %547 : vector<16x8xf32> to vector<2x8x8xf32>
    %549 = arith.truncf %544 : vector<2x8x8xf32> to vector<2x8x8xbf16>
    %550 = arith.truncf %546 : vector<2x8x8xf32> to vector<2x8x8xbf16>
    "tpu.trace_start"() <{level = 10 : i32, message = "bqd,bkd->bqk"}> : () -> ()
    %cst_165 = arith.constant dense<0.000000e+00> : vector<2x8x8xf32>
    %551 = tpu.matmul %549, %550, %cst_165 {dimension_numbers = #tpu.dot_dimension_numbers<[2], [2], [1], [1], [0, 0, 0, 1, 1, 1], [0], [0]>} : vector<2x8x8xbf16>, vector<2x8x8xbf16>, vector<2x8x8xf32> -> vector<2x8x8xf32>
    "tpu.trace_stop"() : () -> ()
    %cst_166 = arith.constant 0.353553385 : f32
    %552 = vector.broadcast %cst_166 : f32 to vector<2x8x8xf32>
    %553 = arith.mulf %551, %552 : vector<2x8x8xf32>
    %554 = vector.broadcast %62 : vector<2x1x8xf32> to vector<2x8x8xf32>
    %555 = arith.addf %553, %554 : vector<2x8x8xf32>
    %cst_167 = arith.constant dense<0xFF800000> : vector<2x8xf32>
    %556 = vector.multi_reduction <maximumf>, %555, %cst_167 [2] : vector<2x8x8xf32> to vector<2x8xf32>
    %557 = vector.shape_cast %556 : vector<2x8xf32> to vector<2x8x1xf32>
    %558 = vector.broadcast %557 : vector<2x8x1xf32> to vector<2x8x8xf32>
    %559 = arith.subf %555, %558 : vector<2x8x8xf32>
    %560 = math.exp %559 : vector<2x8x8xf32>
    %cst_168 = arith.constant dense<0.000000e+00> : vector<2x8xf32>
    %561 = vector.multi_reduction <add>, %560, %cst_168 [2] : vector<2x8x8xf32> to vector<2x8xf32>
    %562 = vector.shape_cast %561 : vector<2x8xf32> to vector<2x8x1xf32>
    %563 = tpu.reciprocal %562 {approx = true} : vector<2x8x1xf32> -> vector<2x8x1xf32>
    %564 = vector.broadcast %563 : vector<2x8x1xf32> to vector<2x8x8xf32>
    %565 = arith.mulf %560, %564 : vector<2x8x8xf32>
    %566 = arith.truncf %565 : vector<2x8x8xf32> to vector<2x8x8xbf16>
    %567 = arith.truncf %548 : vector<2x8x8xf32> to vector<2x8x8xbf16>
    "tpu.trace_start"() <{level = 10 : i32, message = "bqk,bkd->bqd"}> : () -> ()
    %cst_169 = arith.constant dense<0.000000e+00> : vector<2x8x8xf32>
    %568 = tpu.matmul %566, %567, %cst_169 {dimension_numbers = #tpu.dot_dimension_numbers<[2], [1], [1], [2], [0, 0, 0, 1, 1, 2], [0], [0]>} : vector<2x8x8xbf16>, vector<2x8x8xbf16>, vector<2x8x8xf32> -> vector<2x8x8xf32>
    "tpu.trace_stop"() : () -> ()
    %569 = vector.shape_cast %568 : vector<2x8x8xf32> to vector<16x8xf32>
    %570 = tpu.concatenate %488, %515, %542, %569 in 1 : vector<16x8xf32>, vector<16x8xf32>, vector<16x8xf32>, vector<16x8xf32> -> vector<16x32xf32>
    %571 = arith.truncf %570 : vector<16x32xf32> to vector<16x32xbf16>
    %572 = arith.truncf %14 : vector<32x32xf32> to vector<32x32xbf16>
    %cst_170 = arith.constant dense<0.000000e+00> : vector<16x32xf32>
    %573 = tpu.matmul %571, %572, %cst_170 {dimension_numbers = #tpu.dot_dimension_numbers<[1], [0], [0], [1], [0, 0, 1, 1], [], []>} : vector<16x32xbf16>, vector<32x32xbf16>, vector<16x32xf32> -> vector<16x32xf32>
    %574 = vector.broadcast %13 : vector<1x32xf32> to vector<16x32xf32>
    %575 = arith.addf %573, %574 : vector<16x32xf32>
    %576 = arith.addf %449, %575 : vector<16x32xf32>
    %577 = vector.extract_strided_slice %5 {offsets = [0, 0], sizes = [1, 32], strides = [1, 1]} : vector<2x32xf32> to vector<1x32xf32>
    %578 = vector.extract_strided_slice %5 {offsets = [1, 0], sizes = [1, 32], strides = [1, 1]} : vector<2x32xf32> to vector<1x32xf32>
    %cst_171 = arith.constant dense<0.000000e+00> : vector<16xf32>
    %579 = vector.multi_reduction <add>, %576, %cst_171 [1] : vector<16x32xf32> to vector<16xf32>
    %580 = vector.shape_cast %579 : vector<16xf32> to vector<16x1xf32>
    %cst_172 = arith.constant 3.200000e+01 : f32
    %581 = vector.broadcast %cst_172 : f32 to vector<16x1xf32>
    %582 = arith.divf %580, %581 : vector<16x1xf32>
    %583 = vector.broadcast %582 : vector<16x1xf32> to vector<16x32xf32>
    %584 = arith.subf %576, %583 : vector<16x32xf32>
    %585 = arith.mulf %584, %584 : vector<16x32xf32>
    %cst_173 = arith.constant dense<0.000000e+00> : vector<16xf32>
    %586 = vector.multi_reduction <add>, %585, %cst_173 [1] : vector<16x32xf32> to vector<16xf32>
    %587 = vector.shape_cast %586 : vector<16xf32> to vector<16x1xf32>
    %cst_174 = arith.constant 3.200000e+01 : f32
    %588 = vector.broadcast %cst_174 : f32 to vector<16x1xf32>
    %589 = arith.divf %587, %588 : vector<16x1xf32>
    %cst_175 = arith.constant 9.99999974E-6 : f32
    %590 = vector.broadcast %cst_175 : f32 to vector<16x1xf32>
    %591 = arith.addf %589, %590 : vector<16x1xf32>
    %592 = math.rsqrt %591 : vector<16x1xf32>
    %593 = vector.broadcast %592 : vector<16x1xf32> to vector<16x32xf32>
    %594 = arith.mulf %584, %593 : vector<16x32xf32>
    %595 = vector.broadcast %577 : vector<1x32xf32> to vector<16x32xf32>
    %596 = arith.mulf %594, %595 : vector<16x32xf32>
    %597 = vector.broadcast %578 : vector<1x32xf32> to vector<16x32xf32>
    %598 = arith.addf %596, %597 : vector<16x32xf32>
    %599 = arith.truncf %598 : vector<16x32xf32> to vector<16x32xbf16>
    %600 = arith.truncf %1 : vector<32x64xf32> to vector<32x64xbf16>
    %cst_176 = arith.constant dense<0.000000e+00> : vector<16x64xf32>
    %601 = tpu.matmul %599, %600, %cst_176 {dimension_numbers = #tpu.dot_dimension_numbers<[1], [0], [0], [1], [0, 0, 1, 1], [], []>} : vector<16x32xbf16>, vector<32x64xbf16>, vector<16x64xf32> -> vector<16x64xf32>
    %602 = vector.broadcast %0 : vector<1x64xf32> to vector<16x64xf32>
    %603 = arith.addf %601, %602 : vector<16x64xf32>
    %604 = arith.mulf %603, %603 : vector<16x64xf32>
    %605 = arith.mulf %603, %604 : vector<16x64xf32>
    %cst_177 = arith.constant 4.471500e-02 : f32
    %606 = vector.broadcast %cst_177 : f32 to vector<16x64xf32>
    %607 = arith.mulf %606, %605 : vector<16x64xf32>
    %608 = arith.addf %603, %607 : vector<16x64xf32>
    %cst_178 = arith.constant 0.797884583 : f32
    %609 = vector.broadcast %cst_178 : f32 to vector<16x64xf32>
    %610 = arith.mulf %609, %608 : vector<16x64xf32>
    %611 = math.tanh %610 : vector<16x64xf32>
    %cst_179 = arith.constant 1.000000e+00 : f32
    %612 = vector.broadcast %cst_179 : f32 to vector<16x64xf32>
    %613 = arith.addf %612, %611 : vector<16x64xf32>
    %cst_180 = arith.constant 5.000000e-01 : f32
    %614 = vector.broadcast %cst_180 : f32 to vector<16x64xf32>
    %615 = arith.mulf %614, %613 : vector<16x64xf32>
    %616 = arith.mulf %603, %615 : vector<16x64xf32>
    %617 = arith.truncf %616 : vector<16x64xf32> to vector<16x64xbf16>
    %618 = arith.truncf %3 : vector<64x32xf32> to vector<64x32xbf16>
    %cst_181 = arith.constant dense<0.000000e+00> : vector<16x32xf32>
    %619 = tpu.matmul %617, %618, %cst_181 {dimension_numbers = #tpu.dot_dimension_numbers<[1], [0], [0], [1], [0, 0, 1, 1], [], []>} : vector<16x64xbf16>, vector<64x32xbf16>, vector<16x32xf32> -> vector<16x32xf32>
    %620 = vector.broadcast %2 : vector<1x32xf32> to vector<16x32xf32>
    %621 = arith.addf %619, %620 : vector<16x32xf32>
    %622 = arith.addf %598, %621 : vector<16x32xf32>
    %623 = vector.extract_strided_slice %6 {offsets = [0, 0], sizes = [1, 32], strides = [1, 1]} : vector<2x32xf32> to vector<1x32xf32>
    %624 = vector.extract_strided_slice %6 {offsets = [1, 0], sizes = [1, 32], strides = [1, 1]} : vector<2x32xf32> to vector<1x32xf32>
    %cst_182 = arith.constant dense<0.000000e+00> : vector<16xf32>
    %625 = vector.multi_reduction <add>, %622, %cst_182 [1] : vector<16x32xf32> to vector<16xf32>
    %626 = vector.shape_cast %625 : vector<16xf32> to vector<16x1xf32>
    %cst_183 = arith.constant 3.200000e+01 : f32
    %627 = vector.broadcast %cst_183 : f32 to vector<16x1xf32>
    %628 = arith.divf %626, %627 : vector<16x1xf32>
    %629 = vector.broadcast %628 : vector<16x1xf32> to vector<16x32xf32>
    %630 = arith.subf %622, %629 : vector<16x32xf32>
    %631 = arith.mulf %630, %630 : vector<16x32xf32>
    %cst_184 = arith.constant dense<0.000000e+00> : vector<16xf32>
    %632 = vector.multi_reduction <add>, %631, %cst_184 [1] : vector<16x32xf32> to vector<16xf32>
    %633 = vector.shape_cast %632 : vector<16xf32> to vector<16x1xf32>
    %cst_185 = arith.constant 3.200000e+01 : f32
    %634 = vector.broadcast %cst_185 : f32 to vector<16x1xf32>
    %635 = arith.divf %633, %634 : vector<16x1xf32>
    %cst_186 = arith.constant 9.99999974E-6 : f32
    %636 = vector.broadcast %cst_186 : f32 to vector<16x1xf32>
    %637 = arith.addf %635, %636 : vector<16x1xf32>
    %638 = math.rsqrt %637 : vector<16x1xf32>
    %639 = vector.broadcast %638 : vector<16x1xf32> to vector<16x32xf32>
    %640 = arith.mulf %630, %639 : vector<16x32xf32>
    %641 = vector.broadcast %623 : vector<1x32xf32> to vector<16x32xf32>
    %642 = arith.mulf %640, %641 : vector<16x32xf32>
    %643 = vector.broadcast %624 : vector<1x32xf32> to vector<16x32xf32>
    %644 = arith.addf %642, %643 : vector<16x32xf32>
    %645 = arith.truncf %644 : vector<16x32xf32> to vector<16x32xbf16>
    %646 = arith.truncf %32 : vector<64x32xf32> to vector<64x32xbf16>
    %cst_187 = arith.constant dense<0.000000e+00> : vector<16x64xf32>
    %647 = tpu.matmul %645, %646, %cst_187 {dimension_numbers = #tpu.dot_dimension_numbers<[1], [1], [0], [0], [0, 0, 1, 0], [], []>} : vector<16x32xbf16>, vector<64x32xbf16>, vector<16x64xf32> -> vector<16x64xf32>
    %648 = vector.broadcast %27 : vector<1x64xf32> to vector<16x64xf32>
    %649 = arith.addf %647, %648 : vector<16x64xf32>
    %c0_188 = arith.constant 0 : index
    %c0_189 = arith.constant 0 : index
    %650 = vector.load %arg36[%c0_188, %c0_189] : memref<16x64xf32, #tpu.memory_space<vmem>>, vector<16x64xf32>
    tpu.vector_store %arg36[%c0_188, %c0_189], %649 {strides = array<i32>} : memref<16x64xf32, #tpu.memory_space<vmem>>, vector<16x64xf32>,
    %c0_190 = arith.constant 0 : index
    %c0_191 = arith.constant 0 : index
    %651 = vector.load %arg2[%c0_190, %c0_191] : memref<16x1xi32, #tpu.memory_space<vmem>>, vector<16x1xi32>
    %cst_192 = arith.constant dense<0xFF800000> : vector<16xf32>
    %652 = vector.multi_reduction <maximumf>, %649, %cst_192 [1] : vector<16x64xf32> to vector<16xf32>
    %653 = vector.shape_cast %652 : vector<16xf32> to vector<16x1xf32>
    %654 = vector.broadcast %653 : vector<16x1xf32> to vector<16x64xf32>
    %655 = arith.subf %649, %654 : vector<16x64xf32>
    %656 = math.exp %655 : vector<16x64xf32>
    %cst_193 = arith.constant dense<0.000000e+00> : vector<16xf32>
    %657 = vector.multi_reduction <add>, %656, %cst_193 [1] : vector<16x64xf32> to vector<16xf32>
    %658 = vector.shape_cast %657 : vector<16xf32> to vector<16x1xf32>
    %659 = math.log %658 : vector<16x1xf32>
    %660 = arith.addf %653, %659 : vector<16x1xf32>
    %661 = tpu.iota {dimensions = array<i32: 1>} : vector<16x64xi32>
    %662 = vector.broadcast %651 : vector<16x1xi32> to vector<16x64xi32>
    %663 = arith.cmpi eq, %661, %662 : vector<16x64xi32>
    %664 = arith.extui %663 : vector<16x64xi1> to vector<16x64xi32>
    %665 = arith.sitofp %664 : vector<16x64xi32> to vector<16x64xf32>
    %666 = arith.mulf %665, %649 : vector<16x64xf32>
    %cst_194 = arith.constant dense<0.000000e+00> : vector<16xf32>
    %667 = vector.multi_reduction <add>, %666, %cst_194 [1] : vector<16x64xf32> to vector<16xf32>
    %668 = vector.shape_cast %667 : vector<16xf32> to vector<16x1xf32>
    %c-100_i32 = arith.constant -100 : i32
    %669 = vector.broadcast %c-100_i32 : i32 to vector<16x1xi32>
    %670 = arith.cmpi ne, %651, %669 : vector<16x1xi32>
    %671 = arith.extui %670 : vector<16x1xi1> to vector<16x1xi32>
    %672 = arith.sitofp %671 : vector<16x1xi32> to vector<16x1xf32>
    %673 = arith.subf %660, %668 : vector<16x1xf32>
    %674 = arith.mulf %673, %672 : vector<16x1xf32>
    %675 = vector.shape_cast %674 : vector<16x1xf32> to vector<1x16x1xf32>
    %cst_195 = arith.constant dense<0.000000e+00> : vector<1xf32>
    %676 = vector.multi_reduction <add>, %675, %cst_195 [1, 2] : vector<1x16x1xf32> to vector<1xf32>
    %677 = vector.shape_cast %676 : vector<1xf32> to vector<1x1x1xf32>
    %678 = vector.extract %677[0, 0, 0] : f32 from vector<1x1x1xf32>
    %679 = vector.shape_cast %672 : vector<16x1xf32> to vector<1x16x1xf32>
    %cst_196 = arith.constant dense<0.000000e+00> : vector<1xf32>
    %680 = vector.multi_reduction <add>, %679, %cst_196 [1, 2] : vector<1x16x1xf32> to vector<1xf32>
    %681 = vector.shape_cast %680 : vector<1xf32> to vector<1x1x1xf32>
    %682 = vector.extract %681[0, 0, 0] : f32 from vector<1x1x1xf32>
    %cst_197 = arith.constant 1.000000e+00 : f32
    %683 = arith.maximumf %682, %cst_197 : f32
    %684 = arith.divf %678, %683 : f32
    %685 = vector.broadcast %684 : f32 to vector<1x1xf32>
    %c0_198 = arith.constant 0 : index
    %c0_199 = arith.constant 0 : index
    %686 = vector.load %arg37[%c0_198, %c0_199] : memref<1x1xf32, #tpu.memory_space<vmem>>, vector<1x1xf32>
    tpu.vector_store %arg37[%c0_198, %c0_199], %685 {strides = array<i32>} : memref<1x1xf32, #tpu.memory_space<vmem>>, vector<1x1xf32>,
    return
  }
}

</mosaic_0001>

<bundles_post_ra>
// kernel: bart_forward.1
= control target key start
LH: loop header
LB: loop body
LE: loop exit
PB: predicated region body
PF: predicated region fallthrough
CT: control target
= control target key end

     0   :  { %s5220_s6 = smov 1   ;;  %s5221_s10 = smov 2   ;;  %s6342_s0 = inlined_call_operand.smem [shape: u32[38], index: -1, kind: input, shape index: {}] }
   0x1   :  { %s5288_s5 = sld [smem:[%s6342_s0]]   ;;  %s5222_s14 = smov 3  }
   0x2   :  { %s5293_s9 = sld [smem:[%s6342_s0 + %s5220_s6]]   ;;  %s5223_s18 = smov 4  }
   0x3   :  { %s5298_s13 = sld [smem:[%s6342_s0 + %s5221_s10]]   ;;  %s5224_s22 = smov 5  }
   0x4   :  { %s5303_s17 = sld [smem:[%s6342_s0 + %s5222_s14]]   ;;  %s5225_s26 = smov 6  }
   0x5   :  { %s5308_s21 = sld [smem:[%s6342_s0 + %s5223_s18]]   ;;  %s5226_s30 = smov 7  }
   0x6   :  { %s5313_s25 = sld [smem:[%s6342_s0 + %s5224_s22]]   ;;  %s5227_s4 = smov 8  }
   0x7   :  { %s5318_s29 = sld [smem:[%s6342_s0 + %s5225_s26]]   ;;  %s5228_s10 = smov 9  }
   0x8   :  { %s5323_s3 = sld [smem:[%s6342_s0 + %s5226_s30]]   ;;  %s5229_s15 = smov 10  }
   0x9   :  { %6350 = sst [smem:[#allocation8_spill]] %s5298_s13  ;;  %s5230_s20 = smov 11  }
   0xa   :  { %6351 = sst [smem:[#allocation9_spill]] %s5303_s17  ;;  %s5231_s26 = smov 12  }
   0xb   :  { %6352 = sst [smem:[#allocation10_spill]] %s5308_s21  ;;  %s5232_s1 = smov 13  }
   0xc   :  { %6353 = sst [smem:[#allocation11_spill]] %s5313_s25  ;;  %s5233_s7 = smov 14  }
   0xd   :  { %6354 = sst [smem:[#allocation12_spill]] %s5318_s29  ;;  %s5235_s22 = smov 16  }
   0xe   :  { %6355 = sst [smem:[#allocation13_spill]] %s5323_s3  ;;  %s5236_s28 = smov 17  }
   0xf   :  { %s5328_s8 = sld [smem:[%s6342_s0 + %s5227_s4]]  }
  0x10   :  { %s5333_s14 = sld [smem:[%s6342_s0 + %s5228_s10]]  }
  0x11   :  { %s5338_s19 = sld [smem:[%s6342_s0 + %s5229_s15]]   ;;  %s5234_s15 = smov 15  }
  0x12   :  { %s5343_s24 = sld [smem:[%s6342_s0 + %s5230_s20]]  }
  0x13   :  { %s5348_s30 = sld [smem:[%s6342_s0 + %s5231_s26]]  }
  0x14   :  { %s5353_s6 = sld [smem:[%s6342_s0 + %s5232_s1]]  }
  0x15   :  { %6356 = sst [smem:[#allocation14_spill]] %s5328_s8 }
  0x16   :  { %6357 = sst [smem:[#allocation15_spill]] %s5333_s14 }
  0x17   :  { %6358 = sst [smem:[#allocation16_spill]] %s5338_s19 }
  0x18   :  { %6359 = sst [smem:[#allocation17_spill]] %s5343_s24 }
  0x19   :  { %6360 = sst [smem:[#allocation18_spill]] %s5348_s30 }
  0x1a   :  { %s5358_s12 = sld [smem:[%s6342_s0 + %s5233_s7]]   ;;  %s5237_s7 = smov 18  }
  0x1b   :  { %s5363_s20 = sld [smem:[%s6342_s0 + %s5234_s15]]   ;;  %s5238_s15 = smov 19  }
  0x1c   :  { %s5368_s27 = sld [smem:[%s6342_s0 + %s5235_s22]]   ;;  %s5239_s22 = smov 20  }
  0x1d   :  { %s5373_s4 = sld [smem:[%s6342_s0 + %s5236_s28]]   ;;  %s5240_s28 = smov 21  }
  0x1e   :  { %s5378_s13 = sld [smem:[%s6342_s0 + %s5237_s7]]   ;;  %s5241_s7 = smov 22  }
  0x1f   :  { %s5383_s14 = sld [smem:[%s6342_s0 + %s5238_s15]]   ;;  %s5242_s15 = smov 23  }
  0x20   :  { %6361 = sst [smem:[#allocation19_spill]] %s5358_s12 }
  0x21   :  { %6362 = sst [smem:[#allocation20_spill]] %s5363_s20 }
  0x22   :  { %6363 = sst [smem:[#allocation21_spill]] %s5368_s27 }
  0x23   :  { %6364 = sst [smem:[#allocation22_spill]] %s5373_s4 }
  0x24   :  { %6365 = sst [smem:[#allocation23_spill]] %s5378_s13 }
  0x25   :  { %6366 = sst [smem:[#allocation24_spill]] %s5383_s14 }
  0x26   :  { %s5388_s25 = sld [smem:[%s6342_s0 + %s5239_s22]]   ;;  %s5243_s22 = smov 24  }
  0x27   :  { %s5393_s17 = sld [smem:[%s6342_s0 + %s5240_s28]]   ;;  %s5244_s28 = smov 25  }
  0x28   :  { %s5398_s29 = sld [smem:[%s6342_s0 + %s5241_s7]]   ;;  %s5245_s7 = smov 26  }
  0x29   :  { %s5403_s8 = sld [smem:[%s6342_s0 + %s5242_s15]]   ;;  %s5246_s15 = smov 27  }
  0x2a   :  { %s5408_s21 = sld [smem:[%s6342_s0 + %s5243_s22]]   ;;  %s5247_s22 = smov 28  }
  0x2b   :  { %s5413_s27 = sld [smem:[%s6342_s0 + %s5244_s28]]   ;;  %s5248_s28 = smov 29  }
  0x2c   :  { %s5418_s4 = sld [smem:[%s6342_s0 + %s5245_s7]]   ;;  %s5249_s7 = smov 30  }
  0x2d   :  { %s5423_s13 = sld [smem:[%s6342_s0 + %s5246_s15]]   ;;  %s5250_s15 = smov 31  }
  0x2e   :  { %6367 = sst [smem:[#allocation25_spill]] %s5398_s29 }
  0x2f   :  { %s5428_s12 = sld [smem:[%s6342_s0 + %s5247_s22]]   ;;  %s5251_s22 = smov 32  }
  0x30   :  { %s5433_s3 = sld [smem:[%s6342_s0 + %s5248_s28]]   ;;  %s5252_s28 = smov 33  }
  0x31   :  { %6368 = sst [smem:[#allocation26_spill]] %s5413_s27 }
  0x32   :  { %s5438_s14 = sld [smem:[%s6342_s0 + %s5249_s7]]   ;;  %s5253_s7 = smov 34  }
  0x33   :  { %s5443_s27 = sld [smem:[%s6342_s0 + %s5250_s15]]   ;;  %s5254_s15 = smov 35  }
  0x34   :  { %s5448_s20 = sld [smem:[%s6342_s0 + %s5251_s22]]   ;;  %s5255_s22 = smov 36  }
  0x35   :  { %s5453_s19 = sld [smem:[%s6342_s0 + %s5252_s28]]   ;;  %s5256_s28 = smov 37  }
  0x36   :  { %s5463_s24 = sld [smem:[%s6342_s0 + %s5254_s15]]  }
  0x37   :  { %s5468_s29 = sld [smem:[%s6342_s0 + %s5255_s22]]  }
  0x38   :  { %6369 = sst [smem:[#allocation27_spill]] %s5438_s14 }
  0x39   :  { %s5458_s14 = sld [smem:[%s6342_s0 + %s5253_s7]]  }
  0x3a   :  { %s5473_s30 = sld [smem:[%s6342_s0 + %s5256_s28]]  }
  0x3b   :  { %81 = vsyncpa [#allocation3], 0  ;;  %v239_v0 = vld [vmem:[%s5288_s5 + $0x10] sm:$0xff]  ;;  %v237_v1 = vld [vmem:[%s5288_s5] sm:$0xff]  ;;  %v5257_v2 = vmov 0   ;;  %v5258_v13 = vmov 0.0  }
  0x3c   :  { %4984 = vset.pattern.permute.xlu1 %v5257_v2  ;;  %4983 = vset.pattern.permute.xlu0 %v5257_v2  ;;  %v240_v3 = vld [vmem:[%s5288_s5 + $0x18] sm:$0xff]  ;;  %v229_v4 = vld [vmem:[%s5463_s24] sm:$0xff]  ;;  %v230_v5 = vld [vmem:[%s5463_s24 + $0x8] sm:$0xff] }
  0x3d   :  { %250 = vperm.xlu1 %4984, %v239_v0   ;;  %244 = vperm.xlu0 %4983, %v237_v1   ;;  %v238_v6 = vld [vmem:[%s5288_s5 + $0x8] sm:$0xff]  ;;  %v5481_v7 = vpack.c.bf16 %v230_v5, %v229_v4  ;;  %v231_v8 = vld [vmem:[%s5463_s24 + $0x10] sm:$0xff]  ;;  %v232_v9 = vld [vmem:[%s5463_s24 + $0x18] sm:$0xff] }
  0x3e   :  { %v5485_v10 = vpack.c.bf16 %v232_v9, %v231_v8  ;;  %v233_v11 = vld [vmem:[%s5463_s24 + $0x20] sm:$0xff]  ;;  %v234_v12 = vld [vmem:[%s5463_s24 + $0x28] sm:$0xff]  ;;  %4535 = vmatprep.subr.bf16.mxu0 %v5258_v13 }
  0x3f   :  { %82 = vsyncpa [#allocation5], 0  ;;  %4509 = vmatprep.subr.bf16.mxu1 %v5481_v7  ;;  %v5492_v14 = vpack.c.bf16 %v234_v12, %v233_v11  ;;  %v235_v15 = vld [vmem:[%s5463_s24 + $0x30] sm:$0xff]  ;;  %v236_v16 = vld [vmem:[%s5463_s24 + $0x38] sm:$0xff]  ;;  %v241_v18 = vlaneseq  ;;  %vm273_vm4 = vcmask 523264   ;;  %vm363_vm5 = vcmask 261120  }
  0x40   :  { %4510 = vmatpush3.bf16.msra.mxu1 %v5481_v7  ;;  %v5499_v17 = vpack.c.bf16 %v236_v16, %v235_v15  ;;  %v228_v30 = vld [vmem:[%s5458_s14] sm:$0xff]  ;;  %v221_v50 = vld [vmem:[%s5433_s3 + $0x8] sm:$0xff]  ;;  %v222_v52 = vld [vmem:[%s5433_s3 + $0x10] sm:$0xff]  ;;  %vm5259_vm6 = vmmov 0   ;;  %s5260_s0 = smov 96   ;;  %vm461_vm7 = vcmask 64512  }
  0x41   :  { %253 = vperm.xlu1 %4984, %v240_v3   ;;  %247 = vperm.xlu0 %4983, %v238_v6   ;;  %v5505_v19 = vand.u32 127, %v241_v18  ;;  %v220_v49 = vld [vmem:[%s5433_s3] sm:$0xff]  ;;  %v223_v53 = vld [vmem:[%s5433_s3 + $0x18] sm:$0xff]  ;;  %v5536_v61 = vshrl.u32 %v241_v18, 7  ;;  %s5262_s5 = smov 64   ;;  %vm602_vm8 = vcmask 1043456  }
  0x42   :  { %4511 = vmatprep.subr.bf16.mxu1 %v5485_v10  ;;  %v404_v51 = vpack.c.bf16 %v221_v50, %v220_v49  ;;  %v405_v54 = vpack.c.bf16 %v223_v53, %v222_v52  ;;  %4537 = vmatprep.mubr.msk.bf16.mxu0 %vm5259_vm6, %v5258_v13  ;;  %v226_v63 = vld [vmem:[%s5448_s20] sm:$0x3]  ;;  %s5264_s3 = smov 120   ;;  %s5265_s14 = smov 56   ;;  %vm1392_vm9 = vcmask 130048   ;;  %vm1395_vm10 = vcmask 195584  }
  0x43   :  { %v5539_v62 = vsub.s32 0, %v5536_v61  ;;  %v5543_v1 = vsub.s32 1, %v5536_v61  ;;  %v4289_v16 = vld [vmem:[%s5428_s12] ss:$0 sm:$0xff]  ;;  %s5266_s24 = smov 80   ;;  %s5267_s12 = smov 112   ;;  %vm1659_vm11 = vcmp.ge.s32.totalorder %v5536_v61, %v5505_v19 }
  0x44   :  { %4512 = vmatpush3.bf16.msra.mxu1 %v5485_v10  ;;  %s5268_s20 = smov 48   ;;  %s5269_s7 = smov 72  }
  0x45   :  { %4513 = vmatprep.subr.bf16.mxu1 %v5492_v14  ;;  %v394_v3 = vrot.slane %v226_v63, %v5539_v62  ;;  %v400_v8 = vrot.slane %v226_v63, %v5543_v1  ;;  %s5270_s10 = smov 104   ;;  %s5271_s11 = smov 40  }
  0x46   :  { %s5272_s15 = smov 8   ;;  %s5273_s16 = smov 16  }
  0x47   :  { %s5274_s18 = smov 24   ;;  %s6379_s22 = sld [smem:[#allocation23_spill]] }
  0x48   :  { %4514 = vmatpush3.bf16.msra.mxu1 %v5492_v14  ;;  %s6380_s23 = sld [smem:[#allocation22_spill]]  ;;  %s6381_s26 = sld [smem:[#allocation21_spill]] }
  0x49   :  { %4515 = vmatprep.subr.bf16.mxu1 %v5499_v17  ;;  %s6382_s28 = sld [smem:[#allocation10_spill]]  ;;  %s6383_s1 = sld [smem:[#allocation14_spill]] }
  0x4a   :  { %s6384_s2 = sld [smem:[#allocation12_spill]] }
  0x4c   :  { %4516 = vmatpush3.bf16.msra.mxu1 %v5499_v17 }
  0x4d   :  { %4521 = vmatprep.subr.bf16.mxu1 %v5258_v13 }
  0xbc   :  { %v251_v20 = vpop.permute.xlu1 %250  ;;  %v245_v21 = vpop.permute.xlu0 %244 }
  0xbd   :  { %vm257_vm0 = vcmp.eq.s32.totalorder %v5505_v19, %v251_v20  ;;  %vm255_vm1 = vcmp.eq.s32.totalorder %v5505_v19, %v245_v21 }
  0xbe   :  { %v4285_v24 = vsel %vm257_vm0, 1.0, %v5258_v13  ;;  %v4283_v26 = vsel %vm255_vm1, 1.0, %v5258_v13  ;;  %vm4183_vm0 = vcmask 7168  }
  0xc0   :  { %v254_v22 = vpop.permute.xlu1 %253  ;;  %v248_v23 = vpop.permute.xlu0 %247 }
  0xc1   :  { %vm258_vm2 = vcmp.eq.s32.totalorder %v5505_v19, %v254_v22  ;;  %vm256_vm3 = vcmp.eq.s32.totalorder %v5505_v19, %v248_v23 }
  0xc2   :  { %v4286_v25 = vsel %vm258_vm2, 1.0, %v5258_v13  ;;  %v4284_v27 = vsel %vm256_vm3, 1.0, %v5258_v13 }
  0xc3   :  { %v268_v28 = vpack.c.bf16 %v4286_v25, %v4285_v24  ;;  %v267_v29 = vpack.c.bf16 %v4284_v27, %v4283_v26 }
  0xc5   :  { %4517 = vmatprep.mubr.msk.bf16.mxu1 %vm273_vm4, %v267_v29 }
  0xc6   :  { %4518 = vmatmul.mubr.msk.bf16.vlgmr.msra.gmra.mrb[0].mxu1 %vm273_vm4, %v268_v28 }
  0xc7   :  { %4522 = vmatpush3.bf16.msra.mxu1 %v404_v51  ;;  %4525 = vmatprep.mubr.msk.bf16.mxu1 %vm5259_vm6, %v5258_v13 }
  0xc8   :  { %4523 = vmatprep.subr.bf16.mxu1 %v5258_v13 }
  0xcb   :  { %4524 = vmatpush3.bf16.msra.mxu1 %v405_v54 }
  0xcc   :  { %4529 = vmatprep.subr.bf16.mxu1 %v5258_v13 }
 0x199   :  { %v5518_v31 = vpop.f32.mrb[0].mxu1 }
 0x19a   :  { %v314_v32 = vpop.f32.mrb[1].mxu1 }
 0x19b   :  { %v329_v33 = vadd.f32 %v314_v32, %v228_v30  ;;  %v5520_v34 = vpop.f32.mrb[2].mxu1  ;;  %v5261_v32 = vmov 1966171168  }
 0x19c   :  { %v317_v35 = vpop.f32.mrb[3].mxu1 }
 0x19d   :  { %v330_v36 = vadd.f32 %v317_v35, %v228_v30  ;;  %v364_v37 = vsel %vm363_vm5, %v329_v33, 0.0  ;;  %v333_v35 = vld [vmem:[%s5293_s9] sm:$0x3]  ;;  %s5263_s9 = smov 88  }
 0x19e   :  { %365 = vadd.xlane.f32.xlu0 %v364_v37  ;;  %v334_v37 = vcvt.s32.f32 %v333_v35 }
 0x19f   :  { %v367_v38 = vsel %vm363_vm5, %v330_v36, 0.0 }
 0x1a0   :  { %368 = vadd.xlane.f32.xlu1 %v367_v38 }
 0x22b   :  { %v366_v39 = vpop.xlane.xlu0 %365 }
 0x22c   :  { %v371_v40 = vmul.f32 0.03125, %v366_v39  ;;  %v335_v39 = vsub.f32 1.0, %v334_v37 }
 0x22d   :  { %v369_v41 = vpop.xlane.xlu1 %368 }
 0x22e   :  { %v373_v42 = vsub.f32 %v329_v33, %v371_v40  ;;  %v372_v43 = vmul.f32 0.03125, %v369_v41  ;;  %v338_v33 = vunpack.c.l.s4 %v5261_v32 }
 0x230   :  { %v374_v44 = vsub.f32 %v330_v36, %v372_v43  ;;  %v375_v45 = vmul.f32 %v373_v42, %v373_v42  ;;  %v339_v36 = vunpack.c.0.s8 %v338_v33 }
 0x232   :  { %v377_v46 = vsel %vm363_vm5, %v375_v45, 0.0  ;;  %v376_v47 = vmul.f32 %v374_v44, %v374_v44  ;;  %v342_v38 = vsub.s32 %v339_v36, %v5536_v61 }
 0x233   :  { %378 = vadd.xlane.f32.xlu0 %v377_v46 }
 0x234   :  { %v380_v48 = vsel %vm363_vm5, %v376_v47, 0.0  ;;  %v343_v40 = vrot.slane %v335_v39, %v342_v38 }
 0x236   :  { %v344_v41 = vcombine.high %v343_v40, %v343_v40 }
 0x237   :  { %381 = vadd.xlane.f32.xlu0 %v380_v48 }
 0x238   :  { %v358_v43 = vrot.slane %v344_v41, %v342_v38 }
 0x23a   :  { %v362_v45 = vmul.f32 -1e+09, %v358_v43 }
 0x23c   :  { %v5583_v50 = vrot.slane %v362_v45, %v5539_v62 }
 0x2c0   :  { %v379_v55 = vpop.xlane.xlu0 %378 }
 0x2c1   :  { %v383_v56 = vmul.f32 0.03125, %v379_v55 }
 0x2c3   :  { %v385_v57 = vadd.f32 1e-05, %v383_v56 }
 0x2c4   :  { %v382_v58 = vpop.xlane.xlu0 %381 }
 0x2c5   :  { %5030 = vrsqrt.f32 %v385_v57  ;;  %v384_v59 = vmul.f32 0.03125, %v382_v58 }
 0x2c7   :  { %v386_v60 = vadd.f32 1e-05, %v384_v59 }
 0x2c9   :  { %5032 = vrsqrt.f32 %v386_v60 }
 0x2cf   :  { %v5031_v0 = vpop.eup %5030 }
 0x2d0   :  { %v389_v2 = vmul.f32 %v5031_v0, %v373_v42  ;;  %v351_v42 = vrot.slane %v343_v40, %v342_v38 }
 0x2d2   :  { %v395_v5 = vmul.f32 %v394_v3, %v389_v2 }
 0x2d3   :  { %v5033_v4 = vpop.eup %5032 }
 0x2d4   :  { %v390_v6 = vmul.f32 %v5033_v4, %v374_v44  ;;  %v5547_v11 = vadd.f32 %v400_v8, %v395_v5  ;;  %v361_v44 = vmul.f32 -1e+09, %v351_v42 }
 0x2d6   :  { %v396_v9 = vmul.f32 %v394_v3, %v390_v6  ;;  %v5580_v46 = vrot.slane %v361_v44, %v5539_v62 }
 0x2d8   :  { %v5549_v12 = vadd.f32 %v400_v8, %v396_v9 }
 0x2da   :  { %v403_v15 = vpack.c.bf16 %v5549_v12, %v5547_v11 }
 0x2dc   :  { %4526 = vmatmul.mubr.msk.bf16.vlgmr.msra.gmra.mrb[4].mxu1 %vm363_vm5, %v403_v15 }
 0x2dd   :  { %4531 = vmatprep.mubr.msk.bf16.mxu1 %vm5259_vm6, %v5258_v13 }
 0x3af   :  { %v449_v18 = vpop.f32.mrb[4].mxu1 }
 0x3b0   :  { %v450_v20 = vadd.f32 %v4289_v16, %v449_v18  ;;  %v4527_v21 = vpop.f32.mrb[5].mxu1 }
 0x3b1   :  { %v452_v22 = vpop.f32.mrb[6].mxu1 }
 0x3b2   :  { %v5557_v23 = vpack.c.bf16 %v450_v20, %v450_v20  ;;  %v453_v24 = vadd.f32 %v4289_v16, %v452_v22  ;;  %v4528_v25 = vpop.f32.mrb[7].mxu1 }
 0x3b4   :  { %v5559_v26 = vpack.c.bf16 %v453_v24, %v453_v24  ;;  %459 = vrot.lane.b32.xlu1 %v5557_v23, %s5260_s0 }
 0x3b6   :  { %509 = vrot.lane.b32.xlu0 %v5559_v26, %s5260_s0 }
 0x426   :  { %v460_v27 = vpop.permute.xlu1 %459 }
 0x427   :  { %v466_v28 = vsel %vm461_vm7, %v460_v27, 0 }
 0x428   :  { %v510_v29 = vpop.permute.xlu0 %509  ;;  %4530 = vmatpush3.bf16.xpose.msra.mxu1 %v466_v28 }
 0x429   :  { %v515_v30 = vsel %vm461_vm7, %v510_v29, 0  ;;  %4541 = vmatprep.subr.bf16.mxu1 %v5258_v13 }
 0x42a   :  { %4536 = vmatpush3.bf16.xpose.msra.mxu0 %v515_v30 }
 0x42b   :  { %4547 = vmatprep.subr.bf16.mxu0 %v5258_v13 }
 0x42f   :  { %4532 = vmatmul.mubr.msk.bf16.vlgmr.msra.gmra.mrb[8].mxu1 %vm461_vm7, %v5557_v23 }
 0x430   :  { %4543 = vmatprep.mubr.msk.bf16.mxu1 %vm5259_vm6, %v5258_v13 }
 0x431   :  { %4538 = vmatmul.mubr.msk.bf16.vlgmr.msra.gmra.mrb[0].mxu0 %vm461_vm7, %v5559_v26 }
 0x432   :  { %4549 = vmatprep.mubr.msk.bf16.mxu0 %vm5259_vm6, %v5258_v13 }
 0x502   :  { %v502_v47 = vpop.f32.mrb[8].mxu1 }
 0x503   :  { %v557_v48 = vmul.f32 0.35355338, %v502_v47  ;;  %v4533_v49 = vpop.f32.mrb[9].mxu1 }
 0x504   :  { %v505_v51 = vpop.f32.mrb[10].mxu1  ;;  %v551_v52 = vpop.f32.mrb[0].mxu0 }
 0x505   :  { %v558_v53 = vmul.f32 0.35355338, %v551_v52  ;;  %v4534_v54 = vpop.f32.mrb[11].mxu1  ;;  %v4539_v55 = vpop.f32.mrb[1].mxu0  ;;  %v571_v56 = vadd.f32 %v5580_v46, %v557_v48 }
 0x506   :  { %v554_v57 = vpop.f32.mrb[2].mxu0 }
 0x507   :  { %v4540_v58 = vpop.f32.mrb[3].mxu0  ;;  %v573_v59 = vsel %vm461_vm7, %v571_v56, -inf  ;;  %v572_v60 = vadd.f32 %v5583_v50, %v558_v53 }
 0x508   :  { %574 = vmax.xlane.f32.xlu1 %v573_v59 }
 0x509   :  { %v576_v63 = vsel %vm461_vm7, %v572_v60, -inf }
 0x50a   :  { %577 = vmax.xlane.f32.xlu0 %v576_v63 }
 0x519   :  { %597 = vrot.lane.b32.xlu1 %v5557_v23, %s5262_s5 }
 0x595   :  { %v575_v0 = vpop.xlane.xlu1 %574 }
 0x596   :  { %v579_v2 = vsub.f32 %v571_v56, %v575_v0 }
 0x597   :  { %v578_v3 = vpop.xlane.xlu0 %577 }
 0x598   :  { %v581_v4 = vmul.f32 1.442695, %v579_v2  ;;  %v580_v5 = vsub.f32 %v572_v60, %v578_v3 }
 0x599   :  { %v598_v6 = vpop.permute.xlu1 %597 }
 0x59a   :  { %5034 = vpow2.f32 %v581_v4  ;;  %v583_v8 = vmul.f32 1.442695, %v580_v5  ;;  %v604_v9 = vsel %vm602_vm8, %v598_v6, 0 }
 0x59b   :  { %4542 = vmatpush3.bf16.msra.mxu1 %v604_v9 }
 0x59c   :  { %5036 = vpow2.f32 %v583_v8  ;;  %4553 = vmatprep.subr.bf16.mxu1 %v5258_v13 }
 0x5a4   :  { %v5035_v15 = vpop.eup %5034 }
 0x5a5   :  { %v585_v16 = vsel %vm461_vm7, %v5035_v15, 0.0 }
 0x5a6   :  { %v5037_v18 = vpop.eup %5036  ;;  %586 = vadd.xlane.f32.xlu1 %v585_v16 }
 0x5a7   :  { %v588_v20 = vsel %vm461_vm7, %v5037_v18, 0.0 }
 0x5a8   :  { %589 = vadd.xlane.f32.xlu0 %v588_v20 }
 0x5b7   :  { %696 = vrot.lane.b32.xlu1 %v5557_v23, %s5263_s9 }
 0x5bb   :  { %746 = vrot.lane.b32.xlu1 %v5559_v26, %s5263_s9 }
 0x5be   :  { %646 = vrot.lane.b32.xlu0 %v5559_v26, %s5262_s5 }
 0x5bf   :  { %744 = vrot.lane.b32.xlu1 %v5559_v26, %s5264_s3 }
 0x5c2   :  { %694 = vrot.lane.b32.xlu0 %v5557_v23, %s5264_s3 }
 0x633   :  { %v587_v21 = vpop.xlane.xlu1 %586 }
 0x634   :  { %5038 = vrcp.f32 %v587_v21 }
 0x635   :  { %v590_v22 = vpop.xlane.xlu0 %589 }
 0x636   :  { %5040 = vrcp.f32 %v590_v22 }
 0x637   :  { %v697_v27 = vpop.permute.xlu1 %696 }
 0x638   :  { %v702_v36 = vsel %vm461_vm7, %v697_v27, 0 }
 0x639   :  { %v647_v24 = vpop.permute.xlu0 %646 }
 0x63a   :  { %v652_v25 = vsel %vm602_vm8, %v647_v24, 0 }
 0x63b   :  { %4548 = vmatpush3.bf16.msra.mxu0 %v652_v25  ;;  %v747_v35 = vpop.permute.xlu1 %746 }
 0x63c   :  { %4559 = vmatprep.subr.bf16.mxu0 %v5258_v13  ;;  %v752_v38 = vsel %vm461_vm7, %v747_v35, 0 }
 0x63d   :  { %v695_v39 = vpop.permute.xlu0 %694 }
 0x63e   :  { %v5039_v28 = vpop.eup %5038 }
 0x63f   :  { %v593_v29 = vmul.f32 %v5039_v28, %v5035_v15  ;;  %v745_v40 = vpop.permute.xlu1 %744 }
 0x640   :  { %v5041_v30 = vpop.eup %5040 }
 0x641   :  { %v595_v32 = vpack.c.bf16 %v593_v29, %v593_v29  ;;  %v594_v33 = vmul.f32 %v5041_v30, %v5037_v18 }
 0x643   :  { %4544 = vmatmul.mubr.msk.bf16.vlgmr.msra.gmra.mrb[12].mxu1 %vm461_vm7, %v595_v32  ;;  %v596_v37 = vpack.c.bf16 %v594_v33, %v594_v33 }
 0x644   :  { %4554 = vmatpush3.bf16.xpose.msra.mxu1 %v702_v36  ;;  %4555 = vmatprep.mubr.msk.bf16.mxu1 %vm5259_vm6, %v5258_v13 }
 0x645   :  { %4550 = vmatmul.mubr.msk.bf16.vlgmr.msra.gmra.mrb[4].mxu0 %vm461_vm7, %v596_v37  ;;  %4565 = vmatprep.subr.bf16.mxu1 %v5258_v13 }
 0x646   :  { %4560 = vmatpush3.bf16.xpose.msra.mxu0 %v752_v38  ;;  %4561 = vmatprep.mubr.msk.bf16.mxu0 %vm5259_vm6, %v5258_v13 }
 0x647   :  { %4571 = vmatprep.subr.bf16.mxu0 %v5258_v13 }
 0x64b   :  { %4556 = vmatmul.mubr.msk.bf16.vlgmr.msra.gmra.mrb[16].mxu1 %vm461_vm7, %v695_v39 }
 0x64c   :  { %4567 = vmatprep.mubr.msk.bf16.mxu1 %vm5259_vm6, %v5258_v13 }
 0x64d   :  { %4562 = vmatmul.mubr.msk.bf16.vlgmr.msra.gmra.mrb[8].mxu0 %vm461_vm7, %v745_v40 }
 0x64e   :  { %4573 = vmatprep.mubr.msk.bf16.mxu0 %vm5259_vm6, %v5258_v13 }
 0x716   :  { %v5623_v41 = vpop.f32.mrb[12].mxu1 }
 0x717   :  { %v4545_v42 = vpop.f32.mrb[13].mxu1 }
 0x718   :  { %v643_v43 = vpop.f32.mrb[14].mxu1  ;;  %v5625_v44 = vpop.f32.mrb[4].mxu0 }
 0x719   :  { %v4546_v45 = vpop.f32.mrb[15].mxu1  ;;  %v4551_v47 = vpop.f32.mrb[5].mxu0 }
 0x71a   :  { %v691_v48 = vpop.f32.mrb[6].mxu0 }
 0x71b   :  { %v4552_v49 = vpop.f32.mrb[7].mxu0 }
 0x71e   :  { %v738_v51 = vpop.f32.mrb[16].mxu1 }
 0x71f   :  { %v794_v52 = vmul.f32 0.35355338, %v738_v51  ;;  %v4557_v53 = vpop.f32.mrb[17].mxu1 }
 0x720   :  { %v741_v54 = vpop.f32.mrb[18].mxu1  ;;  %v788_v55 = vpop.f32.mrb[8].mxu0 }
 0x721   :  { %v795_v56 = vmul.f32 0.35355338, %v788_v55  ;;  %v4558_v57 = vpop.f32.mrb[19].mxu1  ;;  %v4563_v58 = vpop.f32.mrb[9].mxu0  ;;  %v796_v59 = vadd.f32 %v794_v52, %v5580_v46 }
 0x722   :  { %v791_v60 = vpop.f32.mrb[10].mxu0 }
 0x723   :  { %v4564_v63 = vpop.f32.mrb[11].mxu0  ;;  %v798_v0 = vsel %vm461_vm7, %v796_v59, -inf  ;;  %v797_v2 = vadd.f32 %v795_v56, %v5583_v50 }
 0x724   :  { %799 = vmax.xlane.f32.xlu0 %v798_v0 }
 0x725   :  { %v801_v3 = vsel %vm461_vm7, %v797_v2, -inf }
 0x726   :  { %802 = vmax.xlane.f32.xlu1 %v801_v3 }
 0x737   :  { %822 = vrot.lane.b32.xlu1 %v5557_v23, %s5265_s14 }
 0x73b   :  { %920 = vrot.lane.b32.xlu1 %v5557_v23, %s5266_s24 }
 0x73f   :  { %970 = vrot.lane.b32.xlu1 %v5559_v26, %s5266_s24 }
 0x743   :  { %968 = vrot.lane.b32.xlu1 %v5559_v26, %s5267_s12 }
 0x7b1   :  { %v800_v4 = vpop.xlane.xlu0 %799 }
 0x7b2   :  { %v804_v5 = vsub.f32 %v796_v59, %v800_v4 }
 0x7b3   :  { %v803_v6 = vpop.xlane.xlu1 %802 }
 0x7b4   :  { %v806_v8 = vmul.f32 1.442695, %v804_v5  ;;  %v805_v9 = vsub.f32 %v797_v2, %v803_v6 }
 0x7b6   :  { %5042 = vpow2.f32 %v806_v8  ;;  %v808_v15 = vmul.f32 1.442695, %v805_v9 }
 0x7b7   :  { %v823_v16 = vpop.permute.xlu1 %822 }
 0x7b8   :  { %5044 = vpow2.f32 %v808_v15  ;;  %v828_v18 = vsel %vm602_vm8, %v823_v16, 0 }
 0x7b9   :  { %4566 = vmatpush3.bf16.msra.mxu1 %v828_v18 }
 0x7ba   :  { %4577 = vmatprep.subr.bf16.mxu1 %v5258_v13 }
 0x7bb   :  { %v921_v32 = vpop.permute.xlu1 %920 }
 0x7bc   :  { %v926_v37 = vsel %vm461_vm7, %v921_v32, 0 }
 0x7bf   :  { %v971_v39 = vpop.permute.xlu1 %970 }
 0x7c0   :  { %v5043_v20 = vpop.eup %5042  ;;  %v976_v42 = vsel %vm461_vm7, %v971_v39, 0 }
 0x7c1   :  { %v810_v21 = vsel %vm461_vm7, %v5043_v20, 0.0 }
 0x7c2   :  { %v5045_v22 = vpop.eup %5044  ;;  %811 = vadd.xlane.f32.xlu0 %v810_v21 }
 0x7c3   :  { %v813_v24 = vsel %vm461_vm7, %v5045_v22, 0.0  ;;  %v969_v45 = vpop.permute.xlu1 %968 }
 0x7c6   :  { %814 = vadd.xlane.f32.xlu0 %v813_v24 }
 0x7dc   :  { %870 = vrot.lane.b32.xlu0 %v5559_v26, %s5265_s14 }
 0x7e0   :  { %918 = vrot.lane.b32.xlu0 %v5557_v23, %s5267_s12 }
 0x84f   :  { %v812_v25 = vpop.xlane.xlu0 %811 }
 0x850   :  { %5046 = vrcp.f32 %v812_v25 }
 0x853   :  { %v815_v27 = vpop.xlane.xlu0 %814 }
 0x854   :  { %5048 = vrcp.f32 %v815_v27 }
 0x857   :  { %v871_v28 = vpop.permute.xlu0 %870 }
 0x858   :  { %v876_v29 = vsel %vm602_vm8, %v871_v28, 0 }
 0x859   :  { %4572 = vmatpush3.bf16.msra.mxu0 %v876_v29 }
 0x85a   :  { %v5047_v30 = vpop.eup %5046  ;;  %4583 = vmatprep.subr.bf16.mxu0 %v5258_v13 }
 0x85b   :  { %v818_v33 = vmul.f32 %v5047_v30, %v5043_v20  ;;  %v919_v43 = vpop.permute.xlu0 %918 }
 0x85d   :  { %v820_v35 = vpack.c.bf16 %v818_v33, %v818_v33 }
 0x85e   :  { %v5049_v36 = vpop.eup %5048 }
 0x85f   :  { %4568 = vmatmul.mubr.msk.bf16.vlgmr.msra.gmra.mrb[20].mxu1 %vm461_vm7, %v820_v35  ;;  %v819_v38 = vmul.f32 %v5049_v36, %v5045_v22 }
 0x860   :  { %4578 = vmatpush3.bf16.xpose.msra.mxu1 %v926_v37  ;;  %4579 = vmatprep.mubr.msk.bf16.mxu1 %vm5259_vm6, %v5258_v13 }
 0x861   :  { %v821_v40 = vpack.c.bf16 %v819_v38, %v819_v38  ;;  %4589 = vmatprep.subr.bf16.mxu1 %v5258_v13 }
 0x863   :  { %4574 = vmatmul.mubr.msk.bf16.vlgmr.msra.gmra.mrb[12].mxu0 %vm461_vm7, %v821_v40 }
 0x864   :  { %4584 = vmatpush3.bf16.xpose.msra.mxu0 %v976_v42  ;;  %4585 = vmatprep.mubr.msk.bf16.mxu0 %vm5259_vm6, %v5258_v13 }
 0x865   :  { %4595 = vmatprep.subr.bf16.mxu0 %v5258_v13 }
 0x867   :  { %4580 = vmatmul.mubr.msk.bf16.vlgmr.msra.gmra.mrb[24].mxu1 %vm461_vm7, %v919_v43 }
 0x868   :  { %4591 = vmatprep.mubr.msk.bf16.mxu1 %vm5259_vm6, %v5258_v13 }
 0x86b   :  { %4586 = vmatmul.mubr.msk.bf16.vlgmr.msra.gmra.mrb[16].mxu0 %vm461_vm7, %v969_v45 }
 0x86c   :  { %4597 = vmatprep.mubr.msk.bf16.mxu0 %vm5259_vm6, %v5258_v13 }
 0x932   :  { %v5665_v47 = vpop.f32.mrb[20].mxu1 }
 0x933   :  { %v4569_v48 = vpop.f32.mrb[21].mxu1 }
 0x934   :  { %v867_v49 = vpop.f32.mrb[22].mxu1 }
 0x935   :  { %v4570_v51 = vpop.f32.mrb[23].mxu1 }
 0x936   :  { %v5667_v52 = vpop.f32.mrb[12].mxu0 }
 0x937   :  { %v4985_v53 = vpack.i.bf16 %v5667_v52, %v5665_v47  ;;  %v4575_v54 = vpop.f32.mrb[13].mxu0 }
 0x938   :  { %v915_v55 = vpop.f32.mrb[14].mxu0 }
 0x939   :  { %v4576_v56 = vpop.f32.mrb[15].mxu0 }
 0x93a   :  { %v962_v57 = vpop.f32.mrb[24].mxu1 }
 0x93b   :  { %v1018_v58 = vmul.f32 0.35355338, %v962_v57  ;;  %v4581_v59 = vpop.f32.mrb[25].mxu1 }
 0x93c   :  { %v965_v60 = vpop.f32.mrb[26].mxu1 }
 0x93d   :  { %v4582_v63 = vpop.f32.mrb[27].mxu1  ;;  %v1020_v0 = vadd.f32 %v1018_v58, %v5580_v46 }
 0x93e   :  { %v1012_v2 = vpop.f32.mrb[16].mxu0 }
 0x93f   :  { %v1019_v3 = vmul.f32 0.35355338, %v1012_v2  ;;  %v4587_v4 = vpop.f32.mrb[17].mxu0  ;;  %v1022_v5 = vsel %vm461_vm7, %v1020_v0, -inf }
 0x940   :  { %v1015_v6 = vpop.f32.mrb[18].mxu0  ;;  %1023 = vmax.xlane.f32.xlu0 %v1022_v5 }
 0x941   :  { %v4588_v8 = vpop.f32.mrb[19].mxu0  ;;  %v1021_v9 = vadd.f32 %v1019_v3, %v5583_v50 }
 0x943   :  { %v1025_v15 = vsel %vm461_vm7, %v1021_v9, -inf }
 0x944   :  { %1026 = vmax.xlane.f32.xlu1 %v1025_v15 }
 0x955   :  { %1046 = vrot.lane.b32.xlu1 %v5557_v23, %s5268_s20 }
 0x959   :  { %1144 = vrot.lane.b32.xlu1 %v5557_v23, %s5269_s7 }
 0x95d   :  { %1194 = vrot.lane.b32.xlu1 %v5559_v26, %s5269_s7 }
 0x961   :  { %1192 = vrot.lane.b32.xlu1 %v5559_v26, %s5270_s10 }
 0x9cd   :  { %v1024_v16 = vpop.xlane.xlu0 %1023 }
 0x9ce   :  { %v1028_v18 = vsub.f32 %v1020_v0, %v1024_v16 }
 0x9d0   :  { %v1030_v20 = vmul.f32 1.442695, %v1028_v18 }
 0x9d1   :  { %v1027_v21 = vpop.xlane.xlu1 %1026 }
 0x9d2   :  { %5050 = vpow2.f32 %v1030_v20  ;;  %v1029_v22 = vsub.f32 %v1021_v9, %v1027_v21 }
 0x9d4   :  { %v1032_v24 = vmul.f32 1.442695, %v1029_v22 }
 0x9d5   :  { %v1047_v25 = vpop.permute.xlu1 %1046 }
 0x9d6   :  { %5052 = vpow2.f32 %v1032_v24  ;;  %v1052_v27 = vsel %vm602_vm8, %v1047_v25, 0 }
 0x9d7   :  { %4590 = vmatpush3.bf16.msra.mxu1 %v1052_v27 }
 0x9d8   :  { %4601 = vmatprep.subr.bf16.mxu1 %v5258_v13 }
 0x9d9   :  { %v1145_v39 = vpop.permute.xlu1 %1144 }
 0x9da   :  { %v1150_v45 = vsel %vm461_vm7, %v1145_v39, 0 }
 0x9dc   :  { %v5051_v28 = vpop.eup %5050 }
 0x9dd   :  { %v1034_v29 = vsel %vm461_vm7, %v5051_v28, 0.0  ;;  %v1195_v49 = vpop.permute.xlu1 %1194 }
 0x9de   :  { %1035 = vadd.xlane.f32.xlu0 %v1034_v29  ;;  %v1200_v54 = vsel %vm461_vm7, %v1195_v49, 0 }
 0x9e0   :  { %v5053_v30 = vpop.eup %5052 }
 0x9e1   :  { %v1037_v32 = vsel %vm461_vm7, %v5053_v30, 0.0  ;;  %v1193_v56 = vpop.permute.xlu1 %1192 }
 0x9e2   :  { %1038 = vadd.xlane.f32.xlu0 %v1037_v32 }
 0x9f8   :  { %1094 = vrot.lane.b32.xlu0 %v5559_v26, %s5268_s20 }
 0x9fc   :  { %1142 = vrot.lane.b32.xlu0 %v5557_v23, %s5270_s10 }
 0xa6b   :  { %v1036_v33 = vpop.xlane.xlu0 %1035 }
 0xa6c   :  { %5054 = vrcp.f32 %v1036_v33 }
 0xa6f   :  { %v1039_v35 = vpop.xlane.xlu0 %1038 }
 0xa70   :  { %5056 = vrcp.f32 %v1039_v35 }
 0xa73   :  { %v1095_v36 = vpop.permute.xlu0 %1094 }
 0xa74   :  { %v1100_v37 = vsel %vm602_vm8, %v1095_v36, 0 }
 0xa75   :  { %4596 = vmatpush3.bf16.msra.mxu0 %v1100_v37 }
 0xa76   :  { %v5055_v38 = vpop.eup %5054  ;;  %4607 = vmatprep.subr.bf16.mxu0 %v5258_v13 }
 0xa77   :  { %v1042_v40 = vmul.f32 %v5055_v38, %v5051_v28  ;;  %v1143_v55 = vpop.permute.xlu0 %1142 }
 0xa79   :  { %v1044_v42 = vpack.c.bf16 %v1042_v40, %v1042_v40 }
 0xa7a   :  { %v5057_v43 = vpop.eup %5056 }
 0xa7b   :  { %4592 = vmatmul.mubr.msk.bf16.vlgmr.msra.gmra.mrb[28].mxu1 %vm461_vm7, %v1044_v42  ;;  %v1043_v48 = vmul.f32 %v5057_v43, %v5053_v30 }
 0xa7c   :  { %4602 = vmatpush3.bf16.xpose.msra.mxu1 %v1150_v45  ;;  %4603 = vmatprep.mubr.msk.bf16.mxu1 %vm5259_vm6, %v5258_v13 }
 0xa7d   :  { %v1045_v51 = vpack.c.bf16 %v1043_v48, %v1043_v48  ;;  %4613 = vmatprep.subr.bf16.mxu1 %v5258_v13 }
 0xa7f   :  { %4598 = vmatmul.mubr.msk.bf16.vlgmr.msra.gmra.mrb[20].mxu0 %vm461_vm7, %v1045_v51 }
 0xa80   :  { %4608 = vmatpush3.bf16.xpose.msra.mxu0 %v1200_v54  ;;  %4609 = vmatprep.mubr.msk.bf16.mxu0 %vm5259_vm6, %v5258_v13 }
 0xa81   :  { %4619 = vmatprep.subr.bf16.mxu0 %v5258_v13 }
 0xa83   :  { %4604 = vmatmul.mubr.msk.bf16.vlgmr.msra.gmra.mrb[32].mxu1 %vm461_vm7, %v1143_v55  ;;  %v215_v55 = vld [vmem:[%s5423_s13] sm:$0xff] }
 0xa84   :  { %4615 = vmatprep.mubr.msk.bf16.mxu1 %vm5259_vm6, %v5258_v13 }
 0xa87   :  { %4610 = vmatmul.mubr.msk.bf16.vlgmr.msra.gmra.mrb[24].mxu0 %vm461_vm7, %v1193_v56  ;;  %v216_v56 = vld [vmem:[%s5423_s13 + $0x8] sm:$0xff] }
 0xa88   :  { %4621 = vmatprep.mubr.msk.bf16.mxu0 %vm5259_vm6, %v5258_v13 }
 0xb4e   :  { %v1088_v57 = vpop.f32.mrb[28].mxu1 }
 0xb4f   :  { %v4593_v58 = vpop.f32.mrb[29].mxu1 }
 0xb50   :  { %v1091_v59 = vpop.f32.mrb[30].mxu1  ;;  %v217_v58 = vld [vmem:[%s5423_s13 + $0x10] sm:$0xff] }
 0xb51   :  { %v4594_v60 = vpop.f32.mrb[31].mxu1  ;;  %v218_v59 = vld [vmem:[%s5423_s13 + $0x18] sm:$0xff]  ;;  %s6370_s13 = sld [smem:[#allocation18_spill]] }
 0xb52   :  { %v1136_v63 = vpop.f32.mrb[20].mxu0  ;;  %v1400_v60 = vpack.c.bf16 %v218_v59, %v217_v58 }
 0xb53   :  { %v4990_v0 = vpack.i.bf16 %v1136_v63, %v1088_v57  ;;  %v4599_v2 = vpop.f32.mrb[21].mxu0  ;;  %v1399_v57 = vpack.c.bf16 %v216_v56, %v215_v55 }
 0xb54   :  { %v1139_v3 = vpop.f32.mrb[22].mxu0 }
 0xb55   :  { %v4600_v4 = vpop.f32.mrb[23].mxu0 }
 0xb56   :  { %v1186_v5 = vpop.f32.mrb[32].mxu1 }
 0xb57   :  { %v1242_v6 = vmul.f32 0.35355338, %v1186_v5  ;;  %v4605_v8 = vpop.f32.mrb[33].mxu1 }
 0xb58   :  { %v1189_v9 = vpop.f32.mrb[34].mxu1 }
 0xb59   :  { %v4606_v15 = vpop.f32.mrb[35].mxu1  ;;  %v1244_v16 = vadd.f32 %v1242_v6, %v5580_v46 }
 0xb5a   :  { %v1236_v18 = vpop.f32.mrb[24].mxu0 }
 0xb5b   :  { %v1243_v20 = vmul.f32 0.35355338, %v1236_v18  ;;  %v4611_v21 = vpop.f32.mrb[25].mxu0  ;;  %v1246_v22 = vsel %vm461_vm7, %v1244_v16, -inf }
 0xb5c   :  { %v1239_v24 = vpop.f32.mrb[26].mxu0  ;;  %1247 = vmax.xlane.f32.xlu0 %v1246_v22 }
 0xb5d   :  { %v4612_v25 = vpop.f32.mrb[27].mxu0  ;;  %v1245_v27 = vadd.f32 %v1243_v20, %v5583_v50 }
 0xb5f   :  { %v1249_v28 = vsel %vm461_vm7, %v1245_v27, -inf }
 0xb60   :  { %1250 = vmax.xlane.f32.xlu1 %v1249_v28 }
 0xb71   :  { %1270 = vrot.lane.b32.xlu1 %v5557_v23, %s5271_s11 }
 0xb75   :  { %4986 = vrot.lane.b32.xlu1 %v4985_v53, %s5272_s15 }
 0xb79   :  { %4991 = vrot.lane.b32.xlu1 %v4990_v0, %s5273_s16 }
 0xbe9   :  { %v1248_v29 = vpop.xlane.xlu0 %1247 }
 0xbea   :  { %v1252_v30 = vsub.f32 %v1244_v16, %v1248_v29 }
 0xbec   :  { %v1254_v32 = vmul.f32 1.442695, %v1252_v30 }
 0xbed   :  { %v1251_v33 = vpop.xlane.xlu1 %1250 }
 0xbee   :  { %5058 = vpow2.f32 %v1254_v32  ;;  %v1253_v35 = vsub.f32 %v1245_v27, %v1251_v33 }
 0xbf0   :  { %v1256_v36 = vmul.f32 1.442695, %v1253_v35 }
 0xbf1   :  { %v1271_v37 = vpop.permute.xlu1 %1270 }
 0xbf2   :  { %5060 = vpow2.f32 %v1256_v36  ;;  %v1276_v23 = vsel %vm602_vm8, %v1271_v37, 0 }
 0xbf3   :  { %4614 = vmatpush3.bf16.msra.mxu1 %v1276_v23 }
 0xbf4   :  { %4625 = vmatprep.subr.bf16.mxu1 %v5258_v13 }
 0xbf5   :  { %v4987_v15 = vpop.permute.xlu1 %4986 }
 0xbf6   :  { %v4989_v18 = vunpack.i.h.bf16 %v4987_v15  ;;  %v4988_v20 = vunpack.i.l.bf16 %v4987_v15  ;;  %v200_v15 = vld [vmem:[%s5393_s17 + $0x8] sm:$0xff] }
 0xbf8   :  { %v5059_v38 = vpop.eup %5058  ;;  %v1391_v25 = vsel %vm461_vm7, %v5625_v44, %v4989_v18  ;;  %v1390_v27 = vsel %vm461_vm7, %v5623_v41, %v4988_v20  ;;  %v4307_v44 = vld [vmem:[%s5418_s4] ss:$0 sm:$0xff]  ;;  %v201_v18 = vld [vmem:[%s5393_s17 + $0x10] sm:$0xff]  ;;  %v202_v20 = vld [vmem:[%s5393_s17 + $0x18] sm:$0xff]  ;;  %s6378_s4 = sld [smem:[#allocation19_spill]] }
 0xbf9   :  { %v1258_v47 = vsel %vm461_vm7, %v5059_v38, 0.0  ;;  %v4992_v16 = vpop.permute.xlu1 %4991 }
 0xbfa   :  { %1259 = vadd.xlane.f32.xlu0 %v1258_v47  ;;  %v4994_v21 = vunpack.i.h.bf16 %v4992_v16  ;;  %v4993_v22 = vunpack.i.l.bf16 %v4992_v16 }
 0xbfc   :  { %v5061_v52 = vpop.eup %5060  ;;  %v1394_v30 = vsel %vm1392_vm9, %v1391_v25, %v4994_v21  ;;  %v1393_v32 = vsel %vm1392_vm9, %v1390_v27, %v4993_v22  ;;  %v1493_v21 = vpack.c.bf16 %v202_v20, %v201_v18  ;;  %v210_v20 = vld [vmem:[%s5403_s8 + $0x30] sm:$0xff] }
 0xbfd   :  { %v1261_v53 = vsel %vm461_vm7, %v5061_v52, 0.0 }
 0xbfe   :  { %1262 = vadd.xlane.f32.xlu0 %v1261_v53 }
 0xc14   :  { %1318 = vrot.lane.b32.xlu0 %v5559_v26, %s5271_s11 }
 0xc87   :  { %v1260_v39 = vpop.xlane.xlu0 %1259 }
 0xc88   :  { %5062 = vrcp.f32 %v1260_v39  ;;  %v227_v39 = vld [vmem:[%s5453_s19] sm:$0xff]  ;;  %s6375_s19 = sld [smem:[#allocation26_spill]] }
 0xc8b   :  { %v1263_v40 = vpop.xlane.xlu0 %1262 }
 0xc8c   :  { %5064 = vrcp.f32 %v1263_v40  ;;  %v332_v40 = vadd.f32 %v5520_v34, %v227_v39 }
 0xc8f   :  { %v1319_v42 = vpop.permute.xlu0 %1318 }
 0xc90   :  { %v1324_v43 = vsel %vm602_vm8, %v1319_v42, 0 }
 0xc91   :  { %4620 = vmatpush3.bf16.msra.mxu0 %v1324_v43 }
 0xc92   :  { %v5063_v45 = vpop.eup %5062  ;;  %4633 = vmatprep.subr.bf16.mxu0 %v5258_v13 }
 0xc93   :  { %v1266_v48 = vmul.f32 %v5063_v45, %v5059_v38  ;;  %v331_v45 = vadd.f32 %v5518_v31, %v227_v39 }
 0xc95   :  { %v1268_v49 = vpack.c.bf16 %v1266_v48, %v1266_v48 }
 0xc96   :  { %v5065_v51 = vpop.eup %5064 }
 0xc97   :  { %4616 = vmatmul.mubr.msk.bf16.vlgmr.msra.gmra.mrb[36].mxu1 %vm461_vm7, %v1268_v49  ;;  %v1267_v26 = vmul.f32 %v5065_v51, %v5061_v52  ;;  %v1664_v49 = vsel %vm363_vm5, %v332_v40, 0.0  ;;  %v1661_v51 = vsel %vm363_vm5, %v331_v45, 0.0 }
 0xc98   :  { %4629 = vmatprep.mubr.msk.bf16.mxu1 %vm5259_vm6, %v5258_v13  ;;  %4626 = vmatpush3.bf16.msra.mxu1 %v1399_v57 }
 0xc99   :  { %v1269_v54 = vpack.c.bf16 %v1267_v26, %v1267_v26  ;;  %4627 = vmatprep.subr.bf16.mxu1 %v5258_v13 }
 0xc9b   :  { %4622 = vmatmul.mubr.msk.bf16.vlgmr.msra.gmra.mrb[28].mxu0 %vm461_vm7, %v1269_v54 }
 0xc9c   :  { %4637 = vmatprep.mubr.msk.bf16.mxu0 %vm5259_vm6, %v5258_v13  ;;  %4628 = vmatpush3.bf16.msra.mxu1 %v1400_v60 }
 0xc9d   :  { %4641 = vmatprep.subr.bf16.mxu1 %v5258_v13 }
 0xd6a   :  { %v1312_v63 = vpop.f32.mrb[36].mxu1 }
 0xd6b   :  { %v4617_v0 = vpop.f32.mrb[37].mxu1 }
 0xd6c   :  { %v1315_v2 = vpop.f32.mrb[38].mxu1 }
 0xd6d   :  { %v4618_v3 = vpop.f32.mrb[39].mxu1 }
 0xd6e   :  { %v1360_v4 = vpop.f32.mrb[28].mxu0 }
 0xd6f   :  { %v4995_v5 = vpack.i.bf16 %v1360_v4, %v1312_v63  ;;  %v4623_v6 = vpop.f32.mrb[29].mxu0 }
 0xd70   :  { %v1363_v8 = vpop.f32.mrb[30].mxu0 }
 0xd71   :  { %v4624_v9 = vpop.f32.mrb[31].mxu0  ;;  %4996 = vrot.lane.b32.xlu0 %v4995_v5, %s5274_s18 }
 0xd72   :  { %v199_v9 = vld [vmem:[%s5393_s17] sm:$0xff]  ;;  %s6371_s17 = sld [smem:[#allocation25_spill]] }
 0xd73   :  { %v1492_v16 = vpack.c.bf16 %v200_v15, %v199_v9  ;;  %v208_v15 = vld [vmem:[%s5403_s8 + $0x20] sm:$0xff] }
 0xd75   :  { %4634 = vmatpush3.bf16.msra.mxu0 %v1492_v16  ;;  %v209_v16 = vld [vmem:[%s5403_s8 + $0x28] sm:$0xff] }
 0xd76   :  { %4635 = vmatprep.subr.bf16.mxu0 %v5258_v13  ;;  %v1565_v18 = vpack.c.bf16 %v209_v16, %v208_v15 }
 0xd79   :  { %4636 = vmatpush3.bf16.msra.mxu0 %v1493_v21  ;;  %v211_v21 = vld [vmem:[%s5403_s8 + $0x38] sm:$0xff] }
 0xd7a   :  { %4653 = vmatprep.subr.bf16.mxu0 %v5258_v13 }
 0xde3   :  { %v4997_v24 = vpop.permute.xlu0 %4996 }
 0xde4   :  { %v4999_v28 = vunpack.i.h.bf16 %v4997_v24  ;;  %v4998_v29 = vunpack.i.l.bf16 %v4997_v24 }
 0xde6   :  { %v1397_v33 = vsel %vm1395_vm10, %v1394_v30, %v4999_v28  ;;  %v1396_v35 = vsel %vm1395_vm10, %v1393_v32, %v4998_v29 }
 0xde7   :  { %v1398_v36 = vpack.c.bf16 %v1397_v33, %v1396_v35 }
 0xde9   :  { %4630 = vmatmul.mubr.msk.bf16.vlgmr.msra.gmra.mrb[40].mxu1 %vm363_vm5, %v1398_v36 }
 0xdea   :  { %4649 = vmatprep.mubr.msk.bf16.mxu1 %vm5259_vm6, %v5258_v13 }
 0xebc   :  { %v1444_v37 = vpop.f32.mrb[40].mxu1 }
 0xebd   :  { %v1445_v41 = vadd.f32 %v4307_v44, %v1444_v37  ;;  %v4631_v23 = vpop.f32.mrb[41].mxu1  ;;  %v212_v37 = vld [vmem:[%s5408_s21] sm:$0x3]  ;;  %s6372_s21 = sld [smem:[#allocation17_spill]] }
 0xebe   :  { %v1447_v38 = vpop.f32.mrb[42].mxu1 }
 0xebf   :  { %v1448_v47 = vadd.f32 %v4307_v44, %v1447_v38  ;;  %v4632_v52 = vpop.f32.mrb[43].mxu1  ;;  %v1451_v53 = vadd.f32 %v1445_v41, %v5547_v11  ;;  %v1482_v41 = vrot.slane %v212_v37, %v5539_v62 }
 0xec0   :  { %v225_v52 = vld [vmem:[%s5443_s27] sm:$0x3]  ;;  %s6377_s27 = sld [smem:[#allocation13_spill]] }
 0xec1   :  { %v1453_v42 = vsel %vm363_vm5, %v1451_v53, 0.0  ;;  %v1452_v43 = vadd.f32 %v1448_v47, %v5549_v12 }
 0xec2   :  { %1454 = vadd.xlane.f32.xlu1 %v1453_v42 }
 0xec3   :  { %v1456_v48 = vsel %vm363_vm5, %v1452_v43, 0.0 }
 0xec4   :  { %1457 = vadd.xlane.f32.xlu0 %v1456_v48  ;;  %v180_v48 = vld [vmem:[%s5353_s6 + $0x8] sm:$0xff] }
 0xec6   :  { %1665 = vadd.xlane.f32.xlu1 %v1664_v49 }
 0xec8   :  { %1662 = vadd.xlane.f32.xlu0 %v1661_v51 }
 0xf4f   :  { %v1455_v11 = vpop.xlane.xlu1 %1454 }
 0xf50   :  { %v1459_v26 = vmul.f32 0.03125, %v1455_v11 }
 0xf51   :  { %v1458_v54 = vpop.xlane.xlu0 %1457 }
 0xf52   :  { %v1461_v34 = vsub.f32 %v1451_v53, %v1459_v26  ;;  %v1460_v55 = vmul.f32 0.03125, %v1458_v54 }
 0xf53   :  { %v1666_v56 = vpop.xlane.xlu1 %1665 }
 0xf54   :  { %v1462_v57 = vsub.f32 %v1452_v43, %v1460_v55  ;;  %v1668_v12 = vmul.f32 0.03125, %v1666_v56  ;;  %v1463_v58 = vmul.f32 %v1461_v34, %v1461_v34  ;;  %v1690_v43 = vrot.slane %v225_v52, %v5539_v62 }
 0xf55   :  { %v1663_v31 = vpop.xlane.xlu0 %1662 }
 0xf56   :  { %v1670_v59 = vsub.f32 %v332_v40, %v1668_v12  ;;  %v1667_v60 = vmul.f32 0.03125, %v1663_v31  ;;  %v1465_v63 = vsel %vm363_vm5, %v1463_v58, 0.0  ;;  %v1464_v0 = vmul.f32 %v1462_v57, %v1462_v57  ;;  %v181_v12 = vld [vmem:[%s5353_s6 + $0x10] sm:$0xff]  ;;  %v182_v58 = vld [vmem:[%s5353_s6 + $0x18] sm:$0xff] }
 0xf57   :  { %1466 = vadd.xlane.f32.xlu0 %v1465_v63  ;;  %v1488_v40 = vrot.slane %v212_v37, %v5543_v1  ;;  %v1696_v31 = vrot.slane %v225_v52, %v5543_v1  ;;  %v1701_v63 = vpack.c.bf16 %v182_v58, %v181_v12 }
 0xf58   :  { %v1669_v2 = vsub.f32 %v331_v45, %v1667_v60  ;;  %v1468_v3 = vsel %vm363_vm5, %v1464_v0, 0.0  ;;  %v1672_v4 = vmul.f32 %v1670_v59, %v1670_v59  ;;  %v179_v45 = vld [vmem:[%s5353_s6] sm:$0xff]  ;;  %s6376_s6 = sld [smem:[#allocation24_spill]] }
 0xf59   :  { %1469 = vadd.xlane.f32.xlu1 %v1468_v3  ;;  %v1700_v55 = vpack.c.bf16 %v180_v48, %v179_v45  ;;  %v204_v3 = vld [vmem:[%s5403_s8] sm:$0xff] }
 0xf5a   :  { %v1671_v5 = vmul.f32 %v1669_v2, %v1669_v2  ;;  %v1676_v8 = vsel %vm363_vm5, %v1672_v4, 0.0  ;;  %v205_v4 = vld [vmem:[%s5403_s8 + $0x8] sm:$0xff] }
 0xf5c   :  { %v1673_v6 = vsel %vm363_vm5, %v1671_v5, 0.0  ;;  %v1563_v5 = vpack.c.bf16 %v205_v4, %v204_v3 }
 0xf5d   :  { %1674 = vadd.xlane.f32.xlu0 %v1673_v6  ;;  %1677 = vadd.xlane.f32.xlu1 %v1676_v8  ;;  %v206_v6 = vld [vmem:[%s5403_s8 + $0x10] sm:$0xff]  ;;  %v207_v8 = vld [vmem:[%s5403_s8 + $0x18] sm:$0xff]  ;;  %s6374_s8 = sld [smem:[#allocation20_spill]] }
 0xf5e   :  { %4642 = vmatpush3.bf16.msra.mxu1 %v1563_v5  ;;  %v1564_v9 = vpack.c.bf16 %v207_v8, %v206_v6  ;;  %v5842_v8 = vld [vmem:[%s6371_s17] ss:$0 sm:$0xff] }
 0xf5f   :  { %4643 = vmatprep.subr.bf16.mxu1 %v5258_v13 }
 0xf62   :  { %4644 = vmatpush3.bf16.msra.mxu1 %v1564_v9 }
 0xf63   :  { %4645 = vmatprep.subr.bf16.mxu1 %v5258_v13 }
 0xf66   :  { %4646 = vmatpush3.bf16.msra.mxu1 %v1565_v18 }
 0xf67   :  { %4647 = vmatprep.subr.bf16.mxu1 %v5258_v13 }
 0xfe4   :  { %v1467_v22 = vpop.xlane.xlu0 %1466 }
 0xfe5   :  { %v1471_v24 = vmul.f32 0.03125, %v1467_v22  ;;  %v1566_v22 = vpack.c.bf16 %v211_v21, %v210_v20  ;;  %v5275_v20 = vmov -1e+09  }
 0xfe6   :  { %v1470_v25 = vpop.xlane.xlu1 %1469  ;;  %v5849_v21 = vsel %vm1659_vm11, 0.0, %v5275_v20 }
 0xfe7   :  { %v1473_v27 = vadd.f32 1e-05, %v1471_v24  ;;  %v1472_v28 = vmul.f32 0.03125, %v1470_v25  ;;  %4648 = vmatpush3.bf16.msra.mxu1 %v1566_v22  ;;  %v4309_v24 = vld [vmem:[%s5388_s25] ss:$0 sm:$0xff]  ;;  %s6373_s25 = sld [smem:[#allocation16_spill]] }
 0xfe8   :  { %4667 = vmatprep.subr.bf16.mxu1 %v5258_v13 }
 0xfe9   :  { %5066 = vrsqrt.f32 %v1473_v27  ;;  %v1474_v29 = vadd.f32 1e-05, %v1472_v28 }
 0xfea   :  { %v1675_v30 = vpop.xlane.xlu0 %1674  ;;  %v1678_v32 = vpop.xlane.xlu1 %1677 }
 0xfeb   :  { %5068 = vrsqrt.f32 %v1474_v29  ;;  %v1679_v33 = vmul.f32 0.03125, %v1675_v30  ;;  %v1680_v35 = vmul.f32 0.03125, %v1678_v32 }
 0xfed   :  { %v1681_v36 = vadd.f32 1e-05, %v1679_v33  ;;  %v1682_v44 = vadd.f32 1e-05, %v1680_v35 }
 0xfef   :  { %5070 = vrsqrt.f32 %v1681_v36 }
 0xff0   :  { %5072 = vrsqrt.f32 %v1682_v44  ;;  %v4313_v44 = vld [vmem:[%s6370_s13] ss:$0 sm:$0xff] }
 0xff3   :  { %v5067_v23 = vpop.eup %5066 }
 0xff4   :  { %v1477_v38 = vmul.f32 %v5067_v23, %v1461_v34 }
 0xff5   :  { %v5069_v47 = vpop.eup %5068 }
 0xff6   :  { %v1483_v53 = vmul.f32 %v1482_v41, %v1477_v38  ;;  %v1478_v39 = vmul.f32 %v5069_v47, %v1462_v57 }
 0xff8   :  { %v1484_v42 = vmul.f32 %v1482_v41, %v1478_v39  ;;  %v5779_v26 = vadd.f32 %v1488_v40, %v1483_v53 }
 0xff9   :  { %v5071_v49 = vpop.eup %5070 }
 0xffa   :  { %v5073_v51 = vpop.eup %5072  ;;  %v1685_v11 = vmul.f32 %v5071_v49, %v1669_v2  ;;  %v5781_v54 = vadd.f32 %v1488_v40, %v1484_v42 }
 0xffb   :  { %v1686_v34 = vmul.f32 %v5073_v51, %v1670_v59 }
 0xffc   :  { %v1691_v56 = vmul.f32 %v1690_v43, %v1685_v11  ;;  %v1491_v57 = vpack.c.bf16 %v5781_v54, %v5779_v26 }
 0xffd   :  { %v1692_v60 = vmul.f32 %v1690_v43, %v1686_v34 }
 0xffe   :  { %4638 = vmatmul.mubr.msk.bf16.vlgmr.msra.gmra.mrb[32].mxu0 %vm363_vm5, %v1491_v57  ;;  %v5792_v59 = vadd.f32 %v1696_v31, %v1691_v56 }
 0xfff   :  { %4654 = vmatpush3.bf16.msra.mxu0 %v1700_v55  ;;  %4657 = vmatprep.mubr.msk.bf16.mxu0 %vm5259_vm6, %v5258_v13  ;;  %v5794_v0 = vadd.f32 %v1696_v31, %v1692_v60 }
0x1000   :  { %4655 = vmatprep.subr.bf16.mxu0 %v5258_v13 }
0x1001   :  { %v1699_v2 = vpack.c.bf16 %v5794_v0, %v5792_v59 }
0x1003   :  { %4656 = vmatpush3.bf16.msra.mxu0 %v1701_v63 }
0x1004   :  { %4661 = vmatprep.subr.bf16.mxu0 %v5258_v13 }
0x1006   :  { %4658 = vmatmul.mubr.msk.bf16.vlgmr.msra.gmra.mrb[36].mxu0 %vm363_vm5, %v1699_v2 }
0x1007   :  { %4663 = vmatprep.mubr.msk.bf16.mxu0 %vm5259_vm6, %v5258_v13 }
0x10d1   :  { %v1537_v25 = vpop.f32.mrb[32].mxu0 }
0x10d2   :  { %v1538_v27 = vadd.f32 %v4309_v24, %v1537_v25  ;;  %v4639_v28 = vpop.f32.mrb[33].mxu0 }
0x10d3   :  { %v1540_v29 = vpop.f32.mrb[34].mxu0 }
0x10d4   :  { %v1544_v30 = vmul.f32 %v1538_v27, %v1538_v27  ;;  %v1541_v32 = vadd.f32 %v4309_v24, %v1540_v29  ;;  %v4640_v33 = vpop.f32.mrb[35].mxu0 }
0x10d6   :  { %v1546_v35 = vmul.f32 %v1544_v30, %v1538_v27  ;;  %v1545_v36 = vmul.f32 %v1541_v32, %v1541_v32 }
0x10d8   :  { %v1548_v37 = vmul.f32 0.044715, %v1546_v35  ;;  %v1547_v41 = vmul.f32 %v1545_v36, %v1541_v32 }
0x10d9   :  { %v1745_v23 = vpop.f32.mrb[36].mxu0 }
0x10da   :  { %v1550_v38 = vadd.f32 %v1548_v37, %v1538_v27  ;;  %v1549_v47 = vmul.f32 0.044715, %v1547_v41  ;;  %v1746_v52 = vadd.f32 %v4313_v44, %v1745_v23  ;;  %v4659_v53 = vpop.f32.mrb[37].mxu0 }
0x10db   :  { %v1748_v39 = vpop.f32.mrb[38].mxu0 }
0x10dc   :  { %v1552_v40 = vmul.f32 0.7978846, %v1550_v38  ;;  %v1551_v42 = vadd.f32 %v1549_v47, %v1541_v32  ;;  %v5816_v43 = vpack.c.bf16 %v1746_v52, %v1746_v52  ;;  %v1749_v45 = vadd.f32 %v4313_v44, %v1748_v39  ;;  %v4660_v48 = vpop.f32.mrb[39].mxu0 }
0x10de   :  { %5074 = vtanh.f32 %v1552_v40  ;;  %v1553_v49 = vmul.f32 0.7978846, %v1551_v42  ;;  %v5818_v51 = vpack.c.bf16 %v1749_v45, %v1749_v45  ;;  %1755 = vrot.lane.b32.xlu0 %v5816_v43, %s5260_s0 }
0x10e0   :  { %5076 = vtanh.f32 %v1553_v49  ;;  %1804 = vrot.lane.b32.xlu1 %v5818_v51, %s5260_s0 }
0x10e8   :  { %v5075_v11 = vpop.eup %5074 }
0x10e9   :  { %v1556_v34 = vadd.f32 1.0, %v5075_v11 }
0x10ea   :  { %v5077_v55 = vpop.eup %5076 }
0x10eb   :  { %v1558_v56 = vmul.f32 0.5, %v1556_v34  ;;  %v1557_v57 = vadd.f32 1.0, %v5077_v55 }
0x10ed   :  { %v1559_v12 = vmul.f32 0.5, %v1557_v57  ;;  %v1560_v58 = vmul.f32 %v1558_v56, %v1538_v27 }
0x10ef   :  { %v1561_v31 = vmul.f32 %v1559_v12, %v1541_v32 }
0x10f1   :  { %v1562_v60 = vpack.c.bf16 %v1561_v31, %v1560_v58 }
0x10f3   :  { %4650 = vmatmul.mubr.msk.bf16.vlgmr.msra.gmra.mrb[44].mxu1 %vm273_vm4, %v1562_v60 }
0x10f4   :  { %4669 = vmatprep.mubr.msk.bf16.mxu1 %vm5259_vm6, %v5258_v13 }
0x1150   :  { %v1756_v63 = vpop.permute.xlu0 %1755 }
0x1151   :  { %v1761_v2 = vsel %vm461_vm7, %v1756_v63, 0 }
0x1152   :  { %v1805_v3 = vpop.permute.xlu1 %1804  ;;  %4662 = vmatpush3.bf16.xpose.msra.mxu0 %v1761_v2 }
0x1153   :  { %v1810_v4 = vsel %vm461_vm7, %v1805_v3, 0  ;;  %4673 = vmatprep.subr.bf16.mxu0 %v5258_v13 }
0x1154   :  { %4668 = vmatpush3.bf16.xpose.msra.mxu1 %v1810_v4 }
0x1155   :  { %4679 = vmatprep.subr.bf16.mxu1 %v5258_v13 }
0x1159   :  { %4664 = vmatmul.mubr.msk.bf16.vlgmr.msra.gmra.mrb[40].mxu0 %vm461_vm7, %v5816_v43 }
0x115a   :  { %4675 = vmatprep.mubr.msk.bf16.mxu0 %vm5259_vm6, %v5258_v13 }
0x115b   :  { %4670 = vmatmul.mubr.msk.bf16.vlgmr.msra.gmra.mrb[48].mxu1 %vm461_vm7, %v5818_v51 }
0x115c   :  { %4681 = vmatprep.mubr.msk.bf16.mxu1 %vm5259_vm6, %v5258_v13 }
0x11c6   :  { %v5839_v5 = vpop.f32.mrb[44].mxu1 }
0x11c7   :  { %v4651_v6 = vpop.f32.mrb[45].mxu1 }
0x11c8   :  { %v1613_v9 = vpop.f32.mrb[46].mxu1 }
0x11c9   :  { %v5845_v15 = vadd.f32 %v5842_v8, %v1613_v9  ;;  %v4652_v16 = vpop.f32.mrb[47].mxu1 }
0x122c   :  { %v1797_v18 = vpop.f32.mrb[40].mxu0 }
0x122d   :  { %v1852_v22 = vmul.f32 0.35355338, %v1797_v18  ;;  %v4665_v24 = vpop.f32.mrb[41].mxu0 }
0x122e   :  { %v1800_v25 = vpop.f32.mrb[42].mxu0  ;;  %v1846_v27 = vpop.f32.mrb[48].mxu1 }
0x122f   :  { %v1853_v28 = vmul.f32 0.35355338, %v1846_v27  ;;  %v4666_v29 = vpop.f32.mrb[43].mxu0  ;;  %v4671_v30 = vpop.f32.mrb[49].mxu1  ;;  %v1854_v32 = vadd.f32 %v1852_v22, %v5849_v21 }
0x1230   :  { %v1849_v33 = vpop.f32.mrb[50].mxu1 }
0x1231   :  { %v4672_v35 = vpop.f32.mrb[51].mxu1  ;;  %v1856_v36 = vsel %vm461_vm7, %v1854_v32, -inf  ;;  %v1855_v44 = vadd.f32 %v1853_v28, %v5849_v21 }
0x1232   :  { %1857 = vmax.xlane.f32.xlu1 %v1856_v36 }
0x1233   :  { %v1859_v61 = vsel %vm461_vm7, %v1855_v44, -inf }
0x1234   :  { %1860 = vmax.xlane.f32.xlu0 %v1859_v61 }
0x1243   :  { %1928 = vrot.lane.b32.xlu1 %v5818_v51, %s5262_s5 }
0x124a   :  { %1880 = vrot.lane.b32.xlu0 %v5816_v43, %s5262_s5  ;;  %s6386_s5 = sld [smem:[#allocation11_spill]] }
0x12bf   :  { %v1858_v37 = vpop.xlane.xlu1 %1857 }
0x12c0   :  { %v1862_v41 = vsub.f32 %v1854_v32, %v1858_v37 }
0x12c1   :  { %v1861_v23 = vpop.xlane.xlu0 %1860 }
0x12c2   :  { %v1864_v38 = vmul.f32 1.442695, %v1862_v41  ;;  %v1863_v47 = vsub.f32 %v1855_v44, %v1861_v23 }
0x12c3   :  { %v1929_v52 = vpop.permute.xlu1 %1928 }
0x12c4   :  { %5078 = vpow2.f32 %v1864_v38  ;;  %v1866_v53 = vmul.f32 1.442695, %v1863_v47  ;;  %v1934_v39 = vsel %vm602_vm8, %v1929_v52, 0 }
0x12c5   :  { %4680 = vmatpush3.bf16.msra.mxu1 %v1934_v39  ;;  %v1881_v40 = vpop.permute.xlu0 %1880 }
0x12c6   :  { %5080 = vpow2.f32 %v1866_v53  ;;  %v1886_v42 = vsel %vm602_vm8, %v1881_v40, 0  ;;  %4691 = vmatprep.subr.bf16.mxu1 %v5258_v13 }
0x12c7   :  { %4674 = vmatpush3.bf16.msra.mxu0 %v1886_v42 }
0x12c8   :  { %4685 = vmatprep.subr.bf16.mxu0 %v5258_v13 }
0x12ce   :  { %v5079_v45 = vpop.eup %5078 }
0x12cf   :  { %v1868_v48 = vsel %vm461_vm7, %v5079_v45, 0.0 }
0x12d0   :  { %v5081_v49 = vpop.eup %5080  ;;  %1869 = vadd.xlane.f32.xlu0 %v1868_v48 }
0x12d1   :  { %v1871_v11 = vsel %vm461_vm7, %v5081_v49, 0.0 }
0x12d2   :  { %1872 = vadd.xlane.f32.xlu1 %v1871_v11 }
0x12e3   :  { %1978 = vrot.lane.b32.xlu1 %v5816_v43, %s5263_s9 }
0x12e6   :  { %2028 = vrot.lane.b32.xlu0 %v5818_v51, %s5263_s9 }
0x12e7   :  { %1976 = vrot.lane.b32.xlu1 %v5816_v43, %s5264_s3 }
0x12ea   :  { %2026 = vrot.lane.b32.xlu0 %v5818_v51, %s5264_s3 }
0x135d   :  { %v1870_v34 = vpop.xlane.xlu0 %1869 }
0x135e   :  { %5082 = vrcp.f32 %v1870_v34 }
0x135f   :  { %v1873_v55 = vpop.xlane.xlu1 %1872 }
0x1360   :  { %5084 = vrcp.f32 %v1873_v55 }
0x1361   :  { %v2029_v63 = vpop.permute.xlu0 %2028 }
0x1362   :  { %v2034_v4 = vsel %vm461_vm7, %v2029_v63, 0 }
0x1363   :  { %v1979_v58 = vpop.permute.xlu1 %1978 }
0x1364   :  { %v1984_v2 = vsel %vm461_vm7, %v1979_v58, 0 }
0x1365   :  { %v2027_v9 = vpop.permute.xlu0 %2026 }
0x1367   :  { %v1977_v6 = vpop.permute.xlu1 %1976 }
0x1368   :  { %v5083_v56 = vpop.eup %5082 }
0x1369   :  { %v1876_v57 = vmul.f32 %v5083_v56, %v5079_v45 }
0x136a   :  { %v5085_v12 = vpop.eup %5084 }
0x136b   :  { %v1878_v31 = vpack.c.bf16 %v1876_v57, %v1876_v57  ;;  %v1877_v60 = vmul.f32 %v5085_v12, %v5081_v49 }
0x136d   :  { %4676 = vmatmul.mubr.msk.bf16.vlgmr.msra.gmra.mrb[44].mxu0 %vm461_vm7, %v1878_v31  ;;  %v1879_v3 = vpack.c.bf16 %v1877_v60, %v1877_v60 }
0x136e   :  { %4686 = vmatpush3.bf16.xpose.msra.mxu0 %v1984_v2  ;;  %4687 = vmatprep.mubr.msk.bf16.mxu0 %vm5259_vm6, %v5258_v13 }
0x136f   :  { %4682 = vmatmul.mubr.msk.bf16.vlgmr.msra.gmra.mrb[52].mxu1 %vm461_vm7, %v1879_v3  ;;  %4697 = vmatprep.subr.bf16.mxu0 %v5258_v13 }
0x1370   :  { %4692 = vmatpush3.bf16.xpose.msra.mxu1 %v2034_v4  ;;  %4693 = vmatprep.mubr.msk.bf16.mxu1 %vm5259_vm6, %v5258_v13 }
0x1371   :  { %4703 = vmatprep.subr.bf16.mxu1 %v5258_v13 }
0x1375   :  { %4688 = vmatmul.mubr.msk.bf16.vlgmr.msra.gmra.mrb[48].mxu0 %vm461_vm7, %v1977_v6 }
0x1376   :  { %4699 = vmatprep.mubr.msk.bf16.mxu0 %vm5259_vm6, %v5258_v13 }
0x1377   :  { %4694 = vmatmul.mubr.msk.bf16.vlgmr.msra.gmra.mrb[56].mxu1 %vm461_vm7, %v2027_v9 }
0x1378   :  { %4705 = vmatprep.mubr.msk.bf16.mxu1 %vm5259_vm6, %v5258_v13 }
0x1440   :  { %v5889_v16 = vpop.f32.mrb[44].mxu0 }
0x1441   :  { %v4677_v18 = vpop.f32.mrb[45].mxu0 }
0x1442   :  { %v1925_v20 = vpop.f32.mrb[46].mxu0  ;;  %v5891_v22 = vpop.f32.mrb[52].mxu1 }
0x1443   :  { %v4678_v24 = vpop.f32.mrb[47].mxu0  ;;  %v4683_v25 = vpop.f32.mrb[53].mxu1 }
0x1444   :  { %v1973_v27 = vpop.f32.mrb[54].mxu1 }
0x1445   :  { %v4684_v28 = vpop.f32.mrb[55].mxu1 }
0x1448   :  { %v2020_v29 = vpop.f32.mrb[48].mxu0 }
0x1449   :  { %v2076_v30 = vmul.f32 0.35355338, %v2020_v29  ;;  %v4689_v32 = vpop.f32.mrb[49].mxu0 }
0x144a   :  { %v2023_v33 = vpop.f32.mrb[50].mxu0  ;;  %v2070_v35 = vpop.f32.mrb[56].mxu1 }
0x144b   :  { %v2077_v36 = vmul.f32 0.35355338, %v2070_v35  ;;  %v4690_v44 = vpop.f32.mrb[51].mxu0  ;;  %v4695_v61 = vpop.f32.mrb[57].mxu1  ;;  %v2078_v37 = vadd.f32 %v2076_v30, %v5849_v21 }
0x144c   :  { %v2073_v41 = vpop.f32.mrb[58].mxu1 }
0x144d   :  { %v4696_v23 = vpop.f32.mrb[59].mxu1  ;;  %v2080_v38 = vsel %vm461_vm7, %v2078_v37, -inf  ;;  %v2079_v47 = vadd.f32 %v2077_v36, %v5849_v21 }
0x144e   :  { %2081 = vmax.xlane.f32.xlu1 %v2080_v38 }
0x144f   :  { %v2083_v52 = vsel %vm461_vm7, %v2079_v47, -inf }
0x1450   :  { %2084 = vmax.xlane.f32.xlu0 %v2083_v52 }
0x145f   :  { %2152 = vrot.lane.b32.xlu1 %v5818_v51, %s5265_s14 }
0x1466   :  { %2104 = vrot.lane.b32.xlu0 %v5816_v43, %s5265_s14  ;;  %s6389_s14 = sld [smem:[#allocation8_spill]] }
0x14db   :  { %v2082_v53 = vpop.xlane.xlu1 %2081 }
0x14dc   :  { %v2086_v39 = vsub.f32 %v2078_v37, %v2082_v53 }
0x14dd   :  { %v2085_v40 = vpop.xlane.xlu0 %2084 }
0x14de   :  { %v2088_v42 = vmul.f32 1.442695, %v2086_v39  ;;  %v2087_v45 = vsub.f32 %v2079_v47, %v2085_v40 }
0x14df   :  { %v2153_v48 = vpop.permute.xlu1 %2152 }
0x14e0   :  { %5086 = vpow2.f32 %v2088_v42  ;;  %v2090_v49 = vmul.f32 1.442695, %v2087_v45  ;;  %v2158_v11 = vsel %vm602_vm8, %v2153_v48, 0 }
0x14e1   :  { %4704 = vmatpush3.bf16.msra.mxu1 %v2158_v11  ;;  %v2105_v34 = vpop.permute.xlu0 %2104 }
0x14e2   :  { %5088 = vpow2.f32 %v2090_v49  ;;  %v2110_v55 = vsel %vm602_vm8, %v2105_v34, 0  ;;  %4715 = vmatprep.subr.bf16.mxu1 %v5258_v13 }
0x14e3   :  { %4698 = vmatpush3.bf16.msra.mxu0 %v2110_v55 }
0x14e4   :  { %4709 = vmatprep.subr.bf16.mxu0 %v5258_v13 }
0x14ea   :  { %v5087_v56 = vpop.eup %5086 }
0x14eb   :  { %v2092_v57 = vsel %vm461_vm7, %v5087_v56, 0.0 }
0x14ec   :  { %v5089_v12 = vpop.eup %5088  ;;  %2093 = vadd.xlane.f32.xlu0 %v2092_v57 }
0x14ed   :  { %v2095_v58 = vsel %vm461_vm7, %v5089_v12, 0.0 }
0x14ee   :  { %2096 = vadd.xlane.f32.xlu1 %v2095_v58 }
0x14ff   :  { %2202 = vrot.lane.b32.xlu1 %v5816_v43, %s5266_s24 }
0x1502   :  { %2252 = vrot.lane.b32.xlu0 %v5818_v51, %s5266_s24 }
0x1503   :  { %2200 = vrot.lane.b32.xlu1 %v5816_v43, %s5267_s12 }
0x1506   :  { %2250 = vrot.lane.b32.xlu0 %v5818_v51, %s5267_s12 }
0x1579   :  { %v2094_v31 = vpop.xlane.xlu0 %2093 }
0x157a   :  { %5090 = vrcp.f32 %v2094_v31 }
0x157b   :  { %v2097_v60 = vpop.xlane.xlu1 %2096 }
0x157c   :  { %5092 = vrcp.f32 %v2097_v60 }
0x157d   :  { %v2253_v18 = vpop.permute.xlu0 %2252 }
0x157e   :  { %v2258_v25 = vsel %vm461_vm7, %v2253_v18, 0 }
0x157f   :  { %v2203_v4 = vpop.permute.xlu1 %2202 }
0x1580   :  { %v2208_v20 = vsel %vm461_vm7, %v2203_v4, 0 }
0x1581   :  { %v2251_v28 = vpop.permute.xlu0 %2250 }
0x1583   :  { %v2201_v27 = vpop.permute.xlu1 %2200 }
0x1584   :  { %v5091_v63 = vpop.eup %5090 }
0x1585   :  { %v2100_v2 = vmul.f32 %v5091_v63, %v5087_v56 }
0x1586   :  { %v5093_v3 = vpop.eup %5092 }
0x1587   :  { %v2101_v6 = vmul.f32 %v5093_v3, %v5089_v12  ;;  %v2102_v9 = vpack.c.bf16 %v2100_v2, %v2100_v2 }
0x1589   :  { %4700 = vmatmul.mubr.msk.bf16.vlgmr.msra.gmra.mrb[52].mxu0 %vm461_vm7, %v2102_v9  ;;  %v2103_v24 = vpack.c.bf16 %v2101_v6, %v2101_v6 }
0x158a   :  { %4710 = vmatpush3.bf16.xpose.msra.mxu0 %v2208_v20  ;;  %4711 = vmatprep.mubr.msk.bf16.mxu0 %vm5259_vm6, %v5258_v13 }
0x158b   :  { %4706 = vmatmul.mubr.msk.bf16.vlgmr.msra.gmra.mrb[60].mxu1 %vm461_vm7, %v2103_v24  ;;  %4721 = vmatprep.subr.bf16.mxu0 %v5258_v13 }
0x158c   :  { %4716 = vmatpush3.bf16.xpose.msra.mxu1 %v2258_v25  ;;  %4717 = vmatprep.mubr.msk.bf16.mxu1 %vm5259_vm6, %v5258_v13 }
0x158d   :  { %4727 = vmatprep.subr.bf16.mxu1 %v5258_v13 }
0x1591   :  { %4712 = vmatmul.mubr.msk.bf16.vlgmr.msra.gmra.mrb[56].mxu0 %vm461_vm7, %v2201_v27 }
0x1592   :  { %4723 = vmatprep.mubr.msk.bf16.mxu0 %vm5259_vm6, %v5258_v13 }
0x1593   :  { %4718 = vmatmul.mubr.msk.bf16.vlgmr.msra.gmra.mrb[64].mxu1 %vm461_vm7, %v2251_v28 }
0x1594   :  { %4729 = vmatprep.mubr.msk.bf16.mxu1 %vm5259_vm6, %v5258_v13 }
0x165c   :  { %v5931_v29 = vpop.f32.mrb[52].mxu0 }
0x165d   :  { %v4701_v30 = vpop.f32.mrb[53].mxu0 }
0x165e   :  { %v2149_v32 = vpop.f32.mrb[54].mxu0  ;;  %v5933_v33 = vpop.f32.mrb[60].mxu1 }
0x165f   :  { %v5000_v35 = vpack.i.bf16 %v5933_v33, %v5931_v29  ;;  %v4702_v36 = vpop.f32.mrb[55].mxu0  ;;  %v4707_v44 = vpop.f32.mrb[61].mxu1 }
0x1660   :  { %v2197_v61 = vpop.f32.mrb[62].mxu1 }
0x1661   :  { %v4708_v37 = vpop.f32.mrb[63].mxu1 }
0x1664   :  { %v2244_v41 = vpop.f32.mrb[56].mxu0 }
0x1665   :  { %v2300_v23 = vmul.f32 0.35355338, %v2244_v41  ;;  %v4713_v38 = vpop.f32.mrb[57].mxu0 }
0x1666   :  { %v2247_v47 = vpop.f32.mrb[58].mxu0  ;;  %v2294_v52 = vpop.f32.mrb[64].mxu1 }
0x1667   :  { %v2301_v53 = vmul.f32 0.35355338, %v2294_v52  ;;  %v4714_v39 = vpop.f32.mrb[59].mxu0  ;;  %v4719_v40 = vpop.f32.mrb[65].mxu1  ;;  %v2302_v42 = vadd.f32 %v2300_v23, %v5849_v21 }
0x1668   :  { %v2297_v45 = vpop.f32.mrb[66].mxu1 }
0x1669   :  { %v4720_v48 = vpop.f32.mrb[67].mxu1  ;;  %v2304_v49 = vsel %vm461_vm7, %v2302_v42, -inf  ;;  %v2303_v11 = vadd.f32 %v2301_v53, %v5849_v21 }
0x166a   :  { %2305 = vmax.xlane.f32.xlu1 %v2304_v49 }
0x166b   :  { %v2307_v34 = vsel %vm461_vm7, %v2303_v11, -inf }
0x166c   :  { %2308 = vmax.xlane.f32.xlu0 %v2307_v34 }
0x167b   :  { %2376 = vrot.lane.b32.xlu1 %v5818_v51, %s5268_s20 }
0x1682   :  { %2328 = vrot.lane.b32.xlu0 %v5816_v43, %s5268_s20 }
0x16f7   :  { %v2306_v55 = vpop.xlane.xlu1 %2305 }
0x16f8   :  { %v2310_v56 = vsub.f32 %v2302_v42, %v2306_v55 }
0x16f9   :  { %v2309_v57 = vpop.xlane.xlu0 %2308 }
0x16fa   :  { %v2312_v12 = vmul.f32 1.442695, %v2310_v56  ;;  %v2311_v58 = vsub.f32 %v2303_v11, %v2309_v57 }
0x16fb   :  { %v2377_v31 = vpop.permute.xlu1 %2376 }
0x16fc   :  { %5094 = vpow2.f32 %v2312_v12  ;;  %v2314_v60 = vmul.f32 1.442695, %v2311_v58  ;;  %v2382_v63 = vsel %vm602_vm8, %v2377_v31, 0 }
0x16fd   :  { %4728 = vmatpush3.bf16.msra.mxu1 %v2382_v63  ;;  %v2329_v2 = vpop.permute.xlu0 %2328 }
0x16fe   :  { %5096 = vpow2.f32 %v2314_v60  ;;  %v2334_v3 = vsel %vm602_vm8, %v2329_v2, 0  ;;  %4739 = vmatprep.subr.bf16.mxu1 %v5258_v13 }
0x16ff   :  { %4722 = vmatpush3.bf16.msra.mxu0 %v2334_v3 }
0x1700   :  { %4733 = vmatprep.subr.bf16.mxu0 %v5258_v13 }
0x1706   :  { %v5095_v4 = vpop.eup %5094 }
0x1707   :  { %v2316_v6 = vsel %vm461_vm7, %v5095_v4, 0.0 }
0x1708   :  { %v5097_v9 = vpop.eup %5096  ;;  %2317 = vadd.xlane.f32.xlu0 %v2316_v6 }
0x1709   :  { %v2319_v18 = vsel %vm461_vm7, %v5097_v9, 0.0 }
0x170a   :  { %2320 = vadd.xlane.f32.xlu1 %v2319_v18 }
0x171b   :  { %2426 = vrot.lane.b32.xlu1 %v5816_v43, %s5269_s7 }
0x171e   :  { %2476 = vrot.lane.b32.xlu0 %v5818_v51, %s5269_s7 }
0x171f   :  { %2424 = vrot.lane.b32.xlu1 %v5816_v43, %s5270_s10 }
0x1722   :  { %2474 = vrot.lane.b32.xlu0 %v5818_v51, %s5270_s10 }
0x1795   :  { %v2318_v20 = vpop.xlane.xlu0 %2317 }
0x1796   :  { %5098 = vrcp.f32 %v2318_v20 }
0x1797   :  { %v2321_v24 = vpop.xlane.xlu1 %2320 }
0x1798   :  { %5100 = vrcp.f32 %v2321_v24 }
0x1799   :  { %v2477_v44 = vpop.permute.xlu0 %2476 }
0x179a   :  { %v2482_v41 = vsel %vm461_vm7, %v2477_v44, 0 }
0x179b   :  { %v2427_v30 = vpop.permute.xlu1 %2426 }
0x179c   :  { %v2432_v61 = vsel %vm461_vm7, %v2427_v30, 0 }
0x179d   :  { %v2475_v38 = vpop.permute.xlu0 %2474 }
0x179f   :  { %v2425_v23 = vpop.permute.xlu1 %2424 }
0x17a0   :  { %v5099_v25 = vpop.eup %5098 }
0x17a1   :  { %v2324_v27 = vmul.f32 %v5099_v25, %v5095_v4 }
0x17a2   :  { %v5101_v28 = vpop.eup %5100 }
0x17a3   :  { %v2325_v32 = vmul.f32 %v5101_v28, %v5097_v9  ;;  %v2326_v36 = vpack.c.bf16 %v2324_v27, %v2324_v27 }
0x17a5   :  { %4724 = vmatmul.mubr.msk.bf16.vlgmr.msra.gmra.mrb[60].mxu0 %vm461_vm7, %v2326_v36  ;;  %v2327_v37 = vpack.c.bf16 %v2325_v32, %v2325_v32 }
0x17a6   :  { %4734 = vmatpush3.bf16.xpose.msra.mxu0 %v2432_v61  ;;  %4735 = vmatprep.mubr.msk.bf16.mxu0 %vm5259_vm6, %v5258_v13 }
0x17a7   :  { %4730 = vmatmul.mubr.msk.bf16.vlgmr.msra.gmra.mrb[68].mxu1 %vm461_vm7, %v2327_v37  ;;  %4745 = vmatprep.subr.bf16.mxu0 %v5258_v13 }
0x17a8   :  { %4740 = vmatpush3.bf16.xpose.msra.mxu1 %v2482_v41  ;;  %4741 = vmatprep.mubr.msk.bf16.mxu1 %vm5259_vm6, %v5258_v13 }
0x17a9   :  { %4751 = vmatprep.subr.bf16.mxu1 %v5258_v13 }
0x17ad   :  { %4736 = vmatmul.mubr.msk.bf16.vlgmr.msra.gmra.mrb[64].mxu0 %vm461_vm7, %v2425_v23 }
0x17ae   :  { %4747 = vmatprep.mubr.msk.bf16.mxu0 %vm5259_vm6, %v5258_v13 }
0x17af   :  { %4742 = vmatmul.mubr.msk.bf16.vlgmr.msra.gmra.mrb[72].mxu1 %vm461_vm7, %v2475_v38 }
0x17b0   :  { %4753 = vmatprep.mubr.msk.bf16.mxu1 %vm5259_vm6, %v5258_v13 }
0x1878   :  { %v2370_v47 = vpop.f32.mrb[60].mxu0 }
0x1879   :  { %v4725_v52 = vpop.f32.mrb[61].mxu0 }
0x187a   :  { %v2373_v53 = vpop.f32.mrb[62].mxu0  ;;  %v2418_v39 = vpop.f32.mrb[68].mxu1 }
0x187b   :  { %v5005_v40 = vpack.i.bf16 %v2418_v39, %v2370_v47  ;;  %v4726_v42 = vpop.f32.mrb[63].mxu0  ;;  %v4731_v45 = vpop.f32.mrb[69].mxu1 }
0x187c   :  { %v2421_v48 = vpop.f32.mrb[70].mxu1 }
0x187d   :  { %v4732_v49 = vpop.f32.mrb[71].mxu1 }
0x1880   :  { %v2468_v11 = vpop.f32.mrb[64].mxu0 }
0x1881   :  { %v2524_v34 = vmul.f32 0.35355338, %v2468_v11  ;;  %v4737_v55 = vpop.f32.mrb[65].mxu0 }
0x1882   :  { %v2471_v56 = vpop.f32.mrb[66].mxu0  ;;  %v2518_v57 = vpop.f32.mrb[72].mxu1  ;;  %v176_v55 = vld [vmem:[%s6372_s21 + $0x10] sm:$0xff] }
0x1883   :  { %v2525_v12 = vmul.f32 0.35355338, %v2518_v57  ;;  %v4738_v58 = vpop.f32.mrb[67].mxu0  ;;  %v4743_v31 = vpop.f32.mrb[73].mxu1  ;;  %v2526_v60 = vadd.f32 %v2524_v34, %v5849_v21  ;;  %v177_v56 = vld [vmem:[%s6372_s21 + $0x18] sm:$0xff] }
0x1884   :  { %v2521_v63 = vpop.f32.mrb[74].mxu1  ;;  %v2680_v57 = vpack.c.bf16 %v177_v56, %v176_v55 }
0x1885   :  { %v4744_v2 = vpop.f32.mrb[75].mxu1  ;;  %v2528_v3 = vsel %vm461_vm7, %v2526_v60, -inf  ;;  %v2527_v4 = vadd.f32 %v2525_v12, %v5849_v21  ;;  %v1611_v21 = vadd.f32 %v5842_v8, %v5839_v5 }
0x1886   :  { %2529 = vmax.xlane.f32.xlu1 %v2528_v3 }
0x1887   :  { %v2531_v6 = vsel %vm461_vm7, %v2527_v4, -inf  ;;  %v1617_v44 = vadd.f32 %v1611_v21, %v5779_v26 }
0x1888   :  { %2532 = vmax.xlane.f32.xlu0 %v2531_v6 }
0x1889   :  { %v1619_v61 = vsel %vm363_vm5, %v1617_v44, 0.0 }
0x1913   :  { %v2530_v9 = vpop.xlane.xlu1 %2529 }
0x1914   :  { %v2534_v18 = vsub.f32 %v2526_v60, %v2530_v9 }
0x1915   :  { %v2533_v20 = vpop.xlane.xlu0 %2532 }
0x1916   :  { %v2536_v24 = vmul.f32 1.442695, %v2534_v18  ;;  %v2535_v25 = vsub.f32 %v2527_v4, %v2533_v20  ;;  %v1618_v20 = vadd.f32 %v5845_v15, %v5781_v54 }
0x1918   :  { %5102 = vpow2.f32 %v2536_v24  ;;  %v2538_v27 = vmul.f32 1.442695, %v2535_v25  ;;  %v1622_v25 = vsel %vm363_vm5, %v1618_v20, 0.0 }
0x191a   :  { %5104 = vpow2.f32 %v2538_v27 }
0x1922   :  { %v5103_v28 = vpop.eup %5102 }
0x1923   :  { %v2540_v30 = vsel %vm461_vm7, %v5103_v28, 0.0 }
0x1924   :  { %v5105_v32 = vpop.eup %5104  ;;  %2541 = vadd.xlane.f32.xlu0 %v2540_v30 }
0x1925   :  { %v2543_v36 = vsel %vm461_vm7, %v5105_v32, 0.0 }
0x1926   :  { %2544 = vadd.xlane.f32.xlu1 %v2543_v36 }
0x1937   :  { %2600 = vrot.lane.b32.xlu1 %v5818_v51, %s5271_s11 }
0x193a   :  { %2552 = vrot.lane.b32.xlu0 %v5816_v43, %s5271_s11 }
0x193b   :  { %5001 = vrot.lane.b32.xlu1 %v5000_v35, %s5272_s15 }
0x193e   :  { %5006 = vrot.lane.b32.xlu0 %v5005_v40, %s5273_s16 }
0x195d   :  { %1620 = vadd.xlane.f32.xlu0 %v1619_v61 }
0x19b1   :  { %v2542_v37 = vpop.xlane.xlu0 %2541 }
0x19b2   :  { %5106 = vrcp.f32 %v2542_v37 }
0x19b3   :  { %v2545_v51 = vpop.xlane.xlu1 %2544 }
0x19b4   :  { %5108 = vrcp.f32 %v2545_v51 }
0x19b5   :  { %v2553_v43 = vpop.permute.xlu0 %2552 }
0x19b6   :  { %v2558_v41 = vsel %vm602_vm8, %v2553_v43, 0 }
0x19b7   :  { %v2601_v23 = vpop.permute.xlu1 %2600  ;;  %4746 = vmatpush3.bf16.msra.mxu0 %v2558_v41 }
0x19b8   :  { %v2606_v29 = vsel %vm602_vm8, %v2601_v23, 0  ;;  %4757 = vmatprep.subr.bf16.mxu0 %v5258_v13 }
0x19b9   :  { %4752 = vmatpush3.bf16.msra.mxu1 %v2606_v29  ;;  %v5007_v5 = vpop.permute.xlu0 %5006 }
0x19ba   :  { %4765 = vmatprep.subr.bf16.mxu1 %v5258_v13  ;;  %v5009_v47 = vunpack.i.h.bf16 %v5007_v5  ;;  %v5008_v52 = vunpack.i.l.bf16 %v5007_v5 }
0x19bb   :  { %v5002_v26 = vpop.permute.xlu1 %5001 }
0x19bc   :  { %v5107_v8 = vpop.eup %5106  ;;  %v5004_v33 = vunpack.i.h.bf16 %v5002_v26  ;;  %v5003_v35 = vunpack.i.l.bf16 %v5002_v26 }
0x19bd   :  { %v2548_v38 = vmul.f32 %v5107_v8, %v5103_v28 }
0x19be   :  { %v5109_v53 = vpop.eup %5108  ;;  %v2673_v39 = vsel %vm461_vm7, %v5891_v22, %v5004_v33  ;;  %v2672_v40 = vsel %vm461_vm7, %v5889_v16, %v5003_v35  ;;  %v174_v22 = vld [vmem:[%s6372_s21] sm:$0xff]  ;;  %v175_v16 = vld [vmem:[%s6372_s21 + $0x8] sm:$0xff] }
0x19bf   :  { %v2549_v42 = vmul.f32 %v5109_v53, %v5105_v32  ;;  %v2550_v45 = vpack.c.bf16 %v2548_v38, %v2548_v38  ;;  %v2674_v48 = vsel %vm1392_vm9, %v2672_v40, %v5008_v52  ;;  %v2675_v49 = vsel %vm1392_vm9, %v2673_v39, %v5009_v47  ;;  %v184_v53 = vld [vmem:[%s6374_s8] sm:$0xff]  ;;  %v185_v39 = vld [vmem:[%s6374_s8 + $0x8] sm:$0xff]  ;;  %v186_v40 = vld [vmem:[%s6374_s8 + $0x10] sm:$0xff] }
0x19c0   :  { %v2679_v34 = vpack.c.bf16 %v175_v16, %v174_v22 }
0x19c1   :  { %4748 = vmatmul.mubr.msk.bf16.vlgmr.msra.gmra.mrb[68].mxu0 %vm461_vm7, %v2550_v45  ;;  %v2551_v11 = vpack.c.bf16 %v2549_v42, %v2549_v42  ;;  %v187_v42 = vld [vmem:[%s6374_s8 + $0x18] sm:$0xff] }
0x19c2   :  { %4761 = vmatprep.mubr.msk.bf16.mxu0 %vm5259_vm6, %v5258_v13  ;;  %4758 = vmatpush3.bf16.msra.mxu0 %v2679_v34  ;;  %v2826_v45 = vpack.c.bf16 %v187_v42, %v186_v40  ;;  %v4335_v42 = vld [vmem:[%s6378_s4] ss:$0 sm:$0xff] }
0x19c3   :  { %4754 = vmatmul.mubr.msk.bf16.vlgmr.msra.gmra.mrb[76].mxu1 %vm461_vm7, %v2551_v11  ;;  %4759 = vmatprep.subr.bf16.mxu0 %v5258_v13 }
0x19c4   :  { %4769 = vmatprep.mubr.msk.bf16.mxu1 %vm5259_vm6, %v5258_v13 }
0x19c6   :  { %4760 = vmatpush3.bf16.msra.mxu0 %v2680_v57 }
0x19c7   :  { %4773 = vmatprep.subr.bf16.mxu0 %v5258_v13 }
0x19ea   :  { %v1621_v9 = vpop.xlane.xlu0 %1620 }
0x19eb   :  { %v1625_v18 = vmul.f32 0.03125, %v1621_v9 }
0x19ed   :  { %v6019_v24 = vsub.f32 %v1617_v44, %v1625_v18  ;;  %v4331_v44 = vld [vmem:[%s6373_s25] ss:$0 sm:$0xff] }
0x19ef   :  { %v1629_v27 = vmul.f32 %v6019_v24, %v6019_v24 }
0x19f1   :  { %v1631_v28 = vsel %vm363_vm5, %v1629_v27, 0.0 }
0x1a94   :  { %v2594_v12 = vpop.f32.mrb[68].mxu0 }
0x1a95   :  { %v4749_v58 = vpop.f32.mrb[69].mxu0 }
0x1a96   :  { %v2597_v31 = vpop.f32.mrb[70].mxu0  ;;  %v2642_v60 = vpop.f32.mrb[76].mxu1 }
0x1a97   :  { %v5010_v63 = vpack.i.bf16 %v2642_v60, %v2594_v12  ;;  %v4750_v2 = vpop.f32.mrb[71].mxu0  ;;  %v4755_v3 = vpop.f32.mrb[77].mxu1 }
0x1a98   :  { %v2645_v4 = vpop.f32.mrb[78].mxu1 }
0x1a99   :  { %5011 = vrot.lane.b32.xlu1 %v5010_v63, %s5274_s18  ;;  %v4756_v6 = vpop.f32.mrb[79].mxu1  ;;  %v213_v4 = vld [vmem:[%s6375_s19] sm:$0x3] }
0x1a9a   :  { %v1648_v6 = vrot.slane %v213_v4, %v5539_v62  ;;  %v1654_v27 = vrot.slane %v213_v4, %v5543_v1 }
0x1abd   :  { %1623 = vadd.xlane.f32.xlu1 %v1622_v25 }
0x1ac1   :  { %1632 = vadd.xlane.f32.xlu1 %v1631_v28 }
0x1b0b   :  { %v5012_v30 = vpop.permute.xlu1 %5011 }
0x1b0c   :  { %v5014_v32 = vunpack.i.h.bf16 %v5012_v30  ;;  %v5013_v36 = vunpack.i.l.bf16 %v5012_v30 }
0x1b0e   :  { %v2677_v21 = vsel %vm1395_vm10, %v2675_v49, %v5014_v32  ;;  %v2676_v61 = vsel %vm1395_vm10, %v2674_v48, %v5013_v36 }
0x1b0f   :  { %v2678_v54 = vpack.c.bf16 %v2677_v21, %v2676_v61  ;;  %v194_v21 = vld [vmem:[%s6376_s6] sm:$0xff]  ;;  %v195_v61 = vld [vmem:[%s6376_s6 + $0x8] sm:$0xff] }
0x1b11   :  { %4762 = vmatmul.mubr.msk.bf16.vlgmr.msra.gmra.mrb[72].mxu0 %vm363_vm5, %v2678_v54  ;;  %v2772_v54 = vpack.c.bf16 %v195_v61, %v194_v21 }
0x1b12   :  { %4777 = vmatprep.mubr.msk.bf16.mxu0 %vm5259_vm6, %v5258_v13 }
0x1b13   :  { %4766 = vmatpush3.bf16.msra.mxu1 %v2772_v54 }
0x1b14   :  { %4767 = vmatprep.subr.bf16.mxu1 %v5258_v13 }
0x1b4a   :  { %v1624_v15 = vpop.xlane.xlu1 %1623 }
0x1b4b   :  { %v1626_v51 = vmul.f32 0.03125, %v1624_v15  ;;  %v197_v15 = vld [vmem:[%s6376_s6 + $0x18] sm:$0xff] }
0x1b4d   :  { %v1628_v8 = vsub.f32 %v1618_v20, %v1626_v51 }
0x1b4f   :  { %v1630_v47 = vmul.f32 %v1628_v8, %v1628_v8 }
0x1b51   :  { %v1634_v52 = vsel %vm363_vm5, %v1630_v47, 0.0 }
0x1be4   :  { %v2724_v37 = vpop.f32.mrb[72].mxu0 }
0x1be5   :  { %v2725_v43 = vadd.f32 %v4331_v44, %v2724_v37  ;;  %v4763_v41 = vpop.f32.mrb[73].mxu0 }
0x1be6   :  { %v2727_v23 = vpop.f32.mrb[74].mxu0 }
0x1be7   :  { %v2731_v29 = vadd.f32 %v2725_v43, %v5792_v59  ;;  %v2728_v5 = vadd.f32 %v4331_v44, %v2727_v23  ;;  %v4764_v26 = vpop.f32.mrb[75].mxu0  ;;  %v2825_v59 = vpack.c.bf16 %v185_v39, %v184_v53 }
0x1be9   :  { %v2732_v33 = vadd.f32 %v2728_v5, %v5794_v0  ;;  %v2733_v35 = vsel %vm363_vm5, %v2731_v29, 0.0  ;;  %4774 = vmatpush3.bf16.msra.mxu0 %v2825_v59  ;;  %v1633_v0 = vpop.xlane.xlu1 %1632  ;;  %v170_v5 = vld [vmem:[%s6377_s27] sm:$0x3] }
0x1bea   :  { %2734 = vadd.xlane.f32.xlu0 %v2733_v35  ;;  %4775 = vmatprep.subr.bf16.mxu0 %v5258_v13  ;;  %v1637_v48 = vmul.f32 0.03125, %v1633_v0 }
0x1beb   :  { %v2736_v38 = vsel %vm363_vm5, %v2732_v33, 0.0 }
0x1bec   :  { %v1639_v22 = vadd.f32 1e-05, %v1637_v48 }
0x1bed   :  { %4776 = vmatpush3.bf16.msra.mxu0 %v2826_v45 }
0x1bee   :  { %2737 = vadd.xlane.f32.xlu0 %v2736_v38  ;;  %4787 = vmatprep.subr.bf16.mxu0 %v5258_v13  ;;  %5110 = vrsqrt.f32 %v1639_v22 }
0x1bf2   :  { %1635 = vadd.xlane.f32.xlu0 %v1634_v52  ;;  %v2768_v52 = vrot.slane %v170_v5, %v5543_v1 }
0x1bf8   :  { %v5111_v3 = vpop.eup %5110 }
0x1bf9   :  { %v1643_v9 = vmul.f32 %v5111_v3, %v6019_v24  ;;  %v196_v24 = vld [vmem:[%s6376_s6 + $0x10] sm:$0xff] }
0x1bfa   :  { %v2773_v44 = vpack.c.bf16 %v197_v15, %v196_v24 }
0x1bfb   :  { %v1649_v20 = vmul.f32 %v1648_v6, %v1643_v9 }
0x1bfc   :  { %4768 = vmatpush3.bf16.msra.mxu1 %v2773_v44 }
0x1bfd   :  { %v1655_v30 = vadd.f32 %v1654_v27, %v1649_v20  ;;  %4781 = vmatprep.subr.bf16.mxu1 %v5258_v13 }
0x1c77   :  { %v2735_v49 = vpop.xlane.xlu0 %2734 }
0x1c78   :  { %v2739_v11 = vmul.f32 0.03125, %v2735_v49 }
0x1c7a   :  { %v2741_v16 = vsub.f32 %v2731_v29, %v2739_v11 }
0x1c7b   :  { %v2738_v34 = vpop.xlane.xlu0 %2737 }
0x1c7c   :  { %v2740_v55 = vmul.f32 0.03125, %v2738_v34  ;;  %v2743_v56 = vmul.f32 %v2741_v16, %v2741_v16 }
0x1c7e   :  { %v2742_v57 = vsub.f32 %v2732_v33, %v2740_v55  ;;  %v2745_v12 = vsel %vm363_vm5, %v2743_v56, 0.0  ;;  %v2762_v33 = vrot.slane %v170_v5, %v5539_v62 }
0x1c7f   :  { %2746 = vadd.xlane.f32.xlu1 %v2745_v12  ;;  %v1636_v58 = vpop.xlane.xlu0 %1635 }
0x1c80   :  { %v1638_v31 = vmul.f32 0.03125, %v1636_v58  ;;  %v2744_v60 = vmul.f32 %v2742_v57, %v2742_v57 }
0x1c82   :  { %v1640_v63 = vadd.f32 1e-05, %v1638_v31  ;;  %v2748_v2 = vsel %vm363_vm5, %v2744_v60, 0.0 }
0x1c83   :  { %2749 = vadd.xlane.f32.xlu0 %v2748_v2 }
0x1c84   :  { %5112 = vrsqrt.f32 %v1640_v63 }
0x1c8e   :  { %v5113_v18 = vpop.eup %5112 }
0x1c8f   :  { %v1644_v25 = vmul.f32 %v5113_v18, %v1628_v8 }
0x1c91   :  { %v1650_v28 = vmul.f32 %v1648_v6, %v1644_v25 }
0x1c93   :  { %v1656_v32 = vadd.f32 %v1654_v27, %v1650_v28 }
0x1c95   :  { %v2824_v36 = vpack.c.bf16 %v1656_v32, %v1655_v30 }
0x1c97   :  { %4778 = vmatmul.mubr.msk.bf16.vlgmr.msra.gmra.mrb[76].mxu0 %vm363_vm5, %v2824_v36 }
0x1c98   :  { %4789 = vmatprep.mubr.msk.bf16.mxu0 %vm5259_vm6, %v5258_v13 }
0x1d0c   :  { %v2747_v37 = vpop.xlane.xlu1 %2746 }
0x1d0d   :  { %v2751_v51 = vmul.f32 0.03125, %v2747_v37 }
0x1d0f   :  { %v2753_v43 = vadd.f32 1e-05, %v2751_v51 }
0x1d10   :  { %v2750_v41 = vpop.xlane.xlu0 %2749 }
0x1d11   :  { %5114 = vrsqrt.f32 %v2753_v43  ;;  %v2752_v23 = vmul.f32 0.03125, %v2750_v41 }
0x1d13   :  { %v2754_v29 = vadd.f32 1e-05, %v2752_v23 }
0x1d15   :  { %5116 = vrsqrt.f32 %v2754_v29 }
0x1d1b   :  { %v5115_v26 = vpop.eup %5114 }
0x1d1c   :  { %v2757_v8 = vmul.f32 %v5115_v26, %v2741_v16 }
0x1d1e   :  { %v2763_v38 = vmul.f32 %v2762_v33, %v2757_v8 }
0x1d1f   :  { %v5117_v35 = vpop.eup %5116 }
0x1d20   :  { %v2758_v47 = vmul.f32 %v5117_v35, %v2742_v57  ;;  %v6060_v39 = vadd.f32 %v2768_v52, %v2763_v38  ;;  %v4333_v57 = vld [vmem:[%s6379_s22] ss:$0 sm:$0xff] }
0x1d22   :  { %v2764_v53 = vmul.f32 %v2762_v33, %v2758_v47 }
0x1d24   :  { %v6062_v59 = vadd.f32 %v2768_v52, %v2764_v53 }
0x1d26   :  { %v2771_v40 = vpack.c.bf16 %v6062_v59, %v6060_v39 }
0x1d28   :  { %4770 = vmatmul.mubr.msk.bf16.vlgmr.msra.gmra.mrb[80].mxu1 %vm363_vm5, %v2771_v40 }
0x1d29   :  { %4783 = vmatprep.mubr.msk.bf16.mxu1 %vm5259_vm6, %v5258_v13 }
0x1d6a   :  { %v2870_v45 = vpop.f32.mrb[76].mxu0 }
0x1d6b   :  { %v2871_v0 = vadd.f32 %v4335_v42, %v2870_v45  ;;  %v4779_v48 = vpop.f32.mrb[77].mxu0 }
0x1d6c   :  { %v2873_v49 = vpop.f32.mrb[78].mxu0 }
0x1d6d   :  { %v6070_v11 = vpack.c.bf16 %v2871_v0, %v2871_v0  ;;  %v2874_v22 = vadd.f32 %v4335_v42, %v2873_v49  ;;  %v4780_v16 = vpop.f32.mrb[79].mxu0 }
0x1d6f   :  { %v6072_v34 = vpack.c.bf16 %v2874_v22, %v2874_v22  ;;  %v2885_v55 = vsel %vm461_vm7, %v6070_v11, 0 }
0x1d70   :  { %4782 = vmatpush3.bf16.xpose.msra.mxu1 %v2885_v55 }
0x1d71   :  { %v2931_v56 = vsel %vm461_vm7, %v6072_v34, 0  ;;  %4793 = vmatprep.subr.bf16.mxu1 %v5258_v13 }
0x1d72   :  { %4788 = vmatpush3.bf16.xpose.msra.mxu0 %v2931_v56 }
0x1d73   :  { %4799 = vmatprep.subr.bf16.mxu0 %v5258_v13 }
0x1dfb   :  { %v2817_v12 = vpop.f32.mrb[80].mxu1 }
0x1dfc   :  { %v2818_v58 = vadd.f32 %v4333_v57, %v2817_v12  ;;  %v4771_v31 = vpop.f32.mrb[81].mxu1 }
0x1dfd   :  { %v2820_v60 = vpop.f32.mrb[82].mxu1 }
0x1dfe   :  { %v6081_v63 = vpack.c.bf16 %v2818_v58, %v2818_v58  ;;  %v2821_v2 = vadd.f32 %v4333_v57, %v2820_v60  ;;  %v4772_v3 = vpop.f32.mrb[83].mxu1 }
0x1e00   :  { %v6083_v4 = vpack.c.bf16 %v2821_v2, %v2821_v2  ;;  %4784 = vmatmul.mubr.msk.bf16.vlgmr.msra.gmra.mrb[84].mxu1 %vm461_vm7, %v6081_v63 }
0x1e01   :  { %4795 = vmatprep.mubr.msk.bf16.mxu1 %vm5259_vm6, %v5258_v13 }
0x1e02   :  { %4790 = vmatmul.mubr.msk.bf16.vlgmr.msra.gmra.mrb[80].mxu0 %vm461_vm7, %v6083_v4 }
0x1e03   :  { %4801 = vmatprep.mubr.msk.bf16.mxu0 %vm5259_vm6, %v5258_v13 }
0x1ed3   :  { %v2921_v6 = vpop.f32.mrb[84].mxu1 }
0x1ed4   :  { %v2973_v9 = vmul.f32 0.35355338, %v2921_v6  ;;  %v4785_v18 = vpop.f32.mrb[85].mxu1 }
0x1ed5   :  { %v2924_v20 = vpop.f32.mrb[86].mxu1  ;;  %v2967_v25 = vpop.f32.mrb[80].mxu0 }
0x1ed6   :  { %v2975_v27 = vadd.f32 %v2973_v9, %v5580_v46  ;;  %v2974_v28 = vmul.f32 0.35355338, %v2967_v25  ;;  %v4786_v30 = vpop.f32.mrb[87].mxu1  ;;  %v4791_v32 = vpop.f32.mrb[81].mxu0 }
0x1ed7   :  { %v2970_v36 = vpop.f32.mrb[82].mxu0 }
0x1ed8   :  { %v2976_v21 = vadd.f32 %v2974_v28, %v5583_v50  ;;  %v4792_v61 = vpop.f32.mrb[83].mxu0  ;;  %v2977_v54 = vsel %vm461_vm7, %v2975_v27, -inf }
0x1ed9   :  { %2978 = vmax.xlane.f32.xlu1 %v2977_v54 }
0x1eda   :  { %v2980_v24 = vsel %vm461_vm7, %v2976_v21, -inf }
0x1edb   :  { %2981 = vmax.xlane.f32.xlu0 %v2980_v24 }
0x1eea   :  { %3002 = vrot.lane.b32.xlu1 %v6070_v11, %s5260_s0 }
0x1f66   :  { %v2979_v15 = vpop.xlane.xlu1 %2978 }
0x1f67   :  { %v2983_v44 = vsub.f32 %v2975_v27, %v2979_v15 }
0x1f68   :  { %v2982_v37 = vpop.xlane.xlu0 %2981 }
0x1f69   :  { %v2985_v51 = vmul.f32 1.442695, %v2983_v44  ;;  %v2984_v43 = vsub.f32 %v2976_v21, %v2982_v37 }
0x1f6a   :  { %v3003_v41 = vpop.permute.xlu1 %3002 }
0x1f6b   :  { %5118 = vpow2.f32 %v2985_v51  ;;  %v2987_v23 = vmul.f32 1.442695, %v2984_v43  ;;  %v3008_v29 = vsel %vm602_vm8, %v3003_v41, 0 }
0x1f6c   :  { %4794 = vmatpush3.bf16.msra.mxu1 %v3008_v29 }
0x1f6d   :  { %5120 = vpow2.f32 %v2987_v23  ;;  %4805 = vmatprep.subr.bf16.mxu1 %v5258_v13 }
0x1f75   :  { %v5119_v5 = vpop.eup %5118 }
0x1f76   :  { %v2989_v26 = vsel %vm461_vm7, %v5119_v5, 0.0 }
0x1f77   :  { %v5121_v8 = vpop.eup %5120  ;;  %2990 = vadd.xlane.f32.xlu1 %v2989_v26 }
0x1f78   :  { %v2992_v33 = vsel %vm461_vm7, %v5121_v8, 0.0 }
0x1f79   :  { %2993 = vadd.xlane.f32.xlu0 %v2992_v33 }
0x1f88   :  { %3102 = vrot.lane.b32.xlu1 %v6070_v11, %s5264_s3 }
0x1f8c   :  { %3153 = vrot.lane.b32.xlu1 %v6072_v34, %s5264_s3 }
0x1f8f   :  { %3051 = vrot.lane.b32.xlu0 %v6072_v34, %s5260_s0  ;;  %s6385_s0 = sld [smem:[#allocation9_spill]] }
0x1f90   :  { %3151 = vrot.lane.b32.xlu1 %v6083_v4, %s5264_s3 }
0x1f93   :  { %3100 = vrot.lane.b32.xlu0 %v6081_v63, %s5264_s3  ;;  %s6388_s3 = sld [smem:[#allocation27_spill]] }
0x2004   :  { %v2991_v35 = vpop.xlane.xlu1 %2990 }
0x2005   :  { %5122 = vrcp.f32 %v2991_v35 }
0x2006   :  { %v2994_v38 = vpop.xlane.xlu0 %2993 }
0x2007   :  { %5124 = vrcp.f32 %v2994_v38 }
0x2008   :  { %v3103_v53 = vpop.permute.xlu1 %3102 }
0x2009   :  { %v3108_v22 = vsel %vm461_vm7, %v3103_v53, 0 }
0x200a   :  { %v3052_v47 = vpop.permute.xlu0 %3051 }
0x200b   :  { %v3057_v52 = vsel %vm602_vm8, %v3052_v47, 0 }
0x200c   :  { %4800 = vmatpush3.bf16.msra.mxu0 %v3057_v52  ;;  %v3154_v49 = vpop.permute.xlu1 %3153 }
0x200d   :  { %4811 = vmatprep.subr.bf16.mxu0 %v5258_v13  ;;  %v3159_v55 = vsel %vm461_vm7, %v3154_v49, 0 }
0x200e   :  { %v3101_v56 = vpop.permute.xlu0 %3100 }
0x200f   :  { %v5123_v40 = vpop.eup %5122 }
0x2010   :  { %v2997_v42 = vmul.f32 %v5123_v40, %v5119_v5  ;;  %v3152_v57 = vpop.permute.xlu1 %3151 }
0x2011   :  { %v5125_v45 = vpop.eup %5124 }
0x2012   :  { %v2998_v0 = vmul.f32 %v5125_v45, %v5121_v8  ;;  %v2999_v48 = vpack.c.bf16 %v2997_v42, %v2997_v42 }
0x2014   :  { %4796 = vmatmul.mubr.msk.bf16.vlgmr.msra.gmra.mrb[88].mxu1 %vm461_vm7, %v2999_v48  ;;  %v3000_v16 = vpack.c.bf16 %v2998_v0, %v2998_v0 }
0x2015   :  { %4806 = vmatpush3.bf16.xpose.msra.mxu1 %v3108_v22  ;;  %4807 = vmatprep.mubr.msk.bf16.mxu1 %vm5259_vm6, %v5258_v13 }
0x2016   :  { %4802 = vmatmul.mubr.msk.bf16.vlgmr.msra.gmra.mrb[84].mxu0 %vm461_vm7, %v3000_v16  ;;  %4817 = vmatprep.subr.bf16.mxu1 %v5258_v13 }
0x2017   :  { %4812 = vmatpush3.bf16.xpose.msra.mxu0 %v3159_v55  ;;  %4813 = vmatprep.mubr.msk.bf16.mxu0 %vm5259_vm6, %v5258_v13 }
0x2018   :  { %4823 = vmatprep.subr.bf16.mxu0 %v5258_v13 }
0x201c   :  { %4808 = vmatmul.mubr.msk.bf16.vlgmr.msra.gmra.mrb[92].mxu1 %vm461_vm7, %v3101_v56 }
0x201d   :  { %4819 = vmatprep.mubr.msk.bf16.mxu1 %vm5259_vm6, %v5258_v13 }
0x201e   :  { %4814 = vmatmul.mubr.msk.bf16.vlgmr.msra.gmra.mrb[88].mxu0 %vm461_vm7, %v3152_v57 }
0x201f   :  { %4825 = vmatprep.mubr.msk.bf16.mxu0 %vm5259_vm6, %v5258_v13 }
0x20e7   :  { %v6131_v12 = vpop.f32.mrb[88].mxu1 }
0x20e8   :  { %v4797_v58 = vpop.f32.mrb[89].mxu1 }
0x20e9   :  { %v3047_v31 = vpop.f32.mrb[90].mxu1  ;;  %v6133_v60 = vpop.f32.mrb[84].mxu0 }
0x20ea   :  { %v4798_v2 = vpop.f32.mrb[91].mxu1  ;;  %v4803_v3 = vpop.f32.mrb[85].mxu0 }
0x20eb   :  { %v3096_v6 = vpop.f32.mrb[86].mxu0 }
0x20ec   :  { %v4804_v9 = vpop.f32.mrb[87].mxu0 }
0x20ef   :  { %v3144_v18 = vpop.f32.mrb[92].mxu1 }
0x20f0   :  { %v3201_v20 = vmul.f32 0.35355338, %v3144_v18  ;;  %v4809_v25 = vpop.f32.mrb[93].mxu1 }
0x20f1   :  { %v3147_v27 = vpop.f32.mrb[94].mxu1  ;;  %v3195_v28 = vpop.f32.mrb[88].mxu0 }
0x20f2   :  { %v3203_v30 = vadd.f32 %v3201_v20, %v5580_v46  ;;  %v3202_v32 = vmul.f32 0.35355338, %v3195_v28  ;;  %v4810_v36 = vpop.f32.mrb[95].mxu1  ;;  %v4815_v21 = vpop.f32.mrb[89].mxu0 }
0x20f3   :  { %v3198_v61 = vpop.f32.mrb[90].mxu0 }
0x20f4   :  { %v3204_v54 = vadd.f32 %v3202_v32, %v5583_v50  ;;  %v4816_v24 = vpop.f32.mrb[91].mxu0  ;;  %v3205_v15 = vsel %vm461_vm7, %v3203_v30, -inf }
0x20f5   :  { %3206 = vmax.xlane.f32.xlu0 %v3205_v15 }
0x20f6   :  { %v3208_v44 = vsel %vm461_vm7, %v3204_v54, -inf }
0x20f7   :  { %3209 = vmax.xlane.f32.xlu1 %v3208_v44 }
0x2108   :  { %3229 = vrot.lane.b32.xlu1 %v6070_v11, %s5263_s9 }
0x210c   :  { %3327 = vrot.lane.b32.xlu1 %v6070_v11, %s5267_s12 }
0x2110   :  { %3377 = vrot.lane.b32.xlu1 %v6072_v34, %s5267_s12 }
0x2114   :  { %3375 = vrot.lane.b32.xlu1 %v6083_v4, %s5267_s12 }
0x2182   :  { %v3207_v37 = vpop.xlane.xlu0 %3206 }
0x2183   :  { %v3211_v51 = vsub.f32 %v3203_v30, %v3207_v37 }
0x2184   :  { %v3210_v43 = vpop.xlane.xlu1 %3209 }
0x2185   :  { %v3213_v41 = vmul.f32 1.442695, %v3211_v51  ;;  %v3212_v23 = vsub.f32 %v3204_v54, %v3210_v43 }
0x2187   :  { %5126 = vpow2.f32 %v3213_v41  ;;  %v3215_v29 = vmul.f32 1.442695, %v3212_v23 }
0x2188   :  { %v3230_v5 = vpop.permute.xlu1 %3229 }
0x2189   :  { %5128 = vpow2.f32 %v3215_v29  ;;  %v3235_v26 = vsel %vm602_vm8, %v3230_v5, 0 }
0x218a   :  { %4818 = vmatpush3.bf16.msra.mxu1 %v3235_v26 }
0x218b   :  { %4829 = vmatprep.subr.bf16.mxu1 %v5258_v13 }
0x218c   :  { %v3328_v45 = vpop.permute.xlu1 %3327 }
0x218d   :  { %v3333_v22 = vsel %vm461_vm7, %v3328_v45, 0 }
0x2190   :  { %v3378_v55 = vpop.permute.xlu1 %3377 }
0x2191   :  { %v5127_v8 = vpop.eup %5126  ;;  %v3383_v57 = vsel %vm461_vm7, %v3378_v55, 0 }
0x2192   :  { %v3217_v33 = vsel %vm461_vm7, %v5127_v8, 0.0 }
0x2193   :  { %v5129_v35 = vpop.eup %5128  ;;  %3218 = vadd.xlane.f32.xlu0 %v3217_v33 }
0x2194   :  { %v3220_v38 = vsel %vm461_vm7, %v5129_v35, 0.0  ;;  %v3376_v31 = vpop.permute.xlu1 %3375 }
0x2197   :  { %3221 = vadd.xlane.f32.xlu0 %v3220_v38 }
0x21ad   :  { %3277 = vrot.lane.b32.xlu0 %v6072_v34, %s5263_s9  ;;  %s6387_s9 = sld [smem:[#allocation15_spill]] }
0x21b1   :  { %3325 = vrot.lane.b32.xlu0 %v6081_v63, %s5267_s12 }
0x2220   :  { %v3219_v47 = vpop.xlane.xlu0 %3218 }
0x2221   :  { %5130 = vrcp.f32 %v3219_v47 }
0x2224   :  { %v3222_v52 = vpop.xlane.xlu0 %3221 }
0x2225   :  { %5132 = vrcp.f32 %v3222_v52 }
0x2228   :  { %v3278_v53 = vpop.permute.xlu0 %3277 }
0x2229   :  { %v3283_v40 = vsel %vm602_vm8, %v3278_v53, 0 }
0x222a   :  { %4824 = vmatpush3.bf16.msra.mxu0 %v3283_v40 }
0x222b   :  { %v5131_v42 = vpop.eup %5130  ;;  %4835 = vmatprep.subr.bf16.mxu0 %v5258_v13 }
0x222c   :  { %v3225_v0 = vmul.f32 %v5131_v42, %v5127_v8  ;;  %v3326_v58 = vpop.permute.xlu0 %3325 }
0x222e   :  { %v3227_v48 = vpack.c.bf16 %v3225_v0, %v3225_v0 }
0x222f   :  { %v5133_v49 = vpop.eup %5132 }
0x2230   :  { %v3226_v16 = vmul.f32 %v5133_v49, %v5129_v35  ;;  %4820 = vmatmul.mubr.msk.bf16.vlgmr.msra.gmra.mrb[96].mxu1 %vm461_vm7, %v3227_v48 }
0x2231   :  { %4830 = vmatpush3.bf16.xpose.msra.mxu1 %v3333_v22  ;;  %4831 = vmatprep.mubr.msk.bf16.mxu1 %vm5259_vm6, %v5258_v13 }
0x2232   :  { %v3228_v56 = vpack.c.bf16 %v3226_v16, %v3226_v16  ;;  %4841 = vmatprep.subr.bf16.mxu1 %v5258_v13 }
0x2234   :  { %4826 = vmatmul.mubr.msk.bf16.vlgmr.msra.gmra.mrb[92].mxu0 %vm461_vm7, %v3228_v56 }
0x2235   :  { %4836 = vmatpush3.bf16.xpose.msra.mxu0 %v3383_v57  ;;  %4837 = vmatprep.mubr.msk.bf16.mxu0 %vm5259_vm6, %v5258_v13 }
0x2236   :  { %4847 = vmatprep.subr.bf16.mxu0 %v5258_v13 }
0x2238   :  { %4832 = vmatmul.mubr.msk.bf16.vlgmr.msra.gmra.mrb[100].mxu1 %vm461_vm7, %v3326_v58 }
0x2239   :  { %4843 = vmatprep.mubr.msk.bf16.mxu1 %vm5259_vm6, %v5258_v13 }
0x223c   :  { %4838 = vmatmul.mubr.msk.bf16.vlgmr.msra.gmra.mrb[96].mxu0 %vm461_vm7, %v3376_v31 }
0x223d   :  { %4849 = vmatprep.mubr.msk.bf16.mxu0 %vm5259_vm6, %v5258_v13 }
0x2303   :  { %v6173_v2 = vpop.f32.mrb[96].mxu1 }
0x2304   :  { %v4821_v3 = vpop.f32.mrb[97].mxu1 }
0x2305   :  { %v3274_v6 = vpop.f32.mrb[98].mxu1 }
0x2306   :  { %v4822_v9 = vpop.f32.mrb[99].mxu1 }
0x2307   :  { %v6175_v18 = vpop.f32.mrb[92].mxu0 }
0x2308   :  { %v5015_v20 = vpack.i.bf16 %v6175_v18, %v6173_v2  ;;  %v4827_v25 = vpop.f32.mrb[93].mxu0 }
0x2309   :  { %v3322_v27 = vpop.f32.mrb[94].mxu0 }
0x230a   :  { %v4828_v28 = vpop.f32.mrb[95].mxu0 }
0x230b   :  { %v3369_v30 = vpop.f32.mrb[100].mxu1 }
0x230c   :  { %v3425_v32 = vmul.f32 0.35355338, %v3369_v30  ;;  %v4833_v36 = vpop.f32.mrb[101].mxu1 }
0x230d   :  { %v3372_v21 = vpop.f32.mrb[102].mxu1 }
0x230e   :  { %v3427_v61 = vadd.f32 %v3425_v32, %v5580_v46  ;;  %v4834_v54 = vpop.f32.mrb[103].mxu1 }
0x230f   :  { %v3419_v24 = vpop.f32.mrb[96].mxu0 }
0x2310   :  { %v3426_v15 = vmul.f32 0.35355338, %v3419_v24  ;;  %v4839_v44 = vpop.f32.mrb[97].mxu0  ;;  %v3429_v37 = vsel %vm461_vm7, %v3427_v61, -inf }
0x2311   :  { %v3422_v51 = vpop.f32.mrb[98].mxu0  ;;  %3430 = vmax.xlane.f32.xlu0 %v3429_v37 }
0x2312   :  { %v3428_v43 = vadd.f32 %v3426_v15, %v5583_v50  ;;  %v4840_v41 = vpop.f32.mrb[99].mxu0 }
0x2314   :  { %v3432_v23 = vsel %vm461_vm7, %v3428_v43, -inf }
0x2315   :  { %3433 = vmax.xlane.f32.xlu1 %v3432_v23 }
0x2326   :  { %3453 = vrot.lane.b32.xlu1 %v6070_v11, %s5266_s24 }
0x232a   :  { %3551 = vrot.lane.b32.xlu1 %v6070_v11, %s5270_s10 }
0x232e   :  { %3601 = vrot.lane.b32.xlu1 %v6072_v34, %s5270_s10 }
0x2332   :  { %3599 = vrot.lane.b32.xlu1 %v6083_v4, %s5270_s10 }
0x239e   :  { %v3431_v29 = vpop.xlane.xlu0 %3430 }
0x239f   :  { %v3435_v5 = vsub.f32 %v3427_v61, %v3431_v29 }
0x23a1   :  { %v3437_v26 = vmul.f32 1.442695, %v3435_v5 }
0x23a2   :  { %v3434_v8 = vpop.xlane.xlu1 %3433 }
0x23a3   :  { %5134 = vpow2.f32 %v3437_v26  ;;  %v3436_v33 = vsub.f32 %v3428_v43, %v3434_v8 }
0x23a5   :  { %v3439_v35 = vmul.f32 1.442695, %v3436_v33 }
0x23a6   :  { %v3454_v38 = vpop.permute.xlu1 %3453 }
0x23a7   :  { %5136 = vpow2.f32 %v3439_v35  ;;  %v3459_v47 = vsel %vm602_vm8, %v3454_v38, 0 }
0x23a8   :  { %4842 = vmatpush3.bf16.msra.mxu1 %v3459_v47 }
0x23a9   :  { %4853 = vmatprep.subr.bf16.mxu1 %v5258_v13 }
0x23aa   :  { %v3552_v22 = vpop.permute.xlu1 %3551 }
0x23ab   :  { %v3557_v57 = vsel %vm461_vm7, %v3552_v22, 0 }
0x23ad   :  { %v5135_v52 = vpop.eup %5134 }
0x23ae   :  { %v3441_v53 = vsel %vm461_vm7, %v5135_v52, 0.0 }
0x23af   :  { %3442 = vadd.xlane.f32.xlu0 %v3441_v53 }
0x23b1   :  { %v5137_v40 = vpop.eup %5136 }
0x23b2   :  { %v3444_v4 = vsel %vm461_vm7, %v5137_v40, 0.0 }
0x23b3   :  { %3445 = vadd.xlane.f32.xlu0 %v3444_v4 }
0x23c9   :  { %3501 = vrot.lane.b32.xlu0 %v6072_v34, %s5266_s24  ;;  %s5276_s24 = smov [#allocation2]  }
0x23ca   :  { %s4221_s12 = sshll.u32 %s5276_s24, 4  ;;  %s4222_s12 = int_to_ptr.vmem [resolvable:$true] %s4221_s12 }
0x23cb   :  { %s5172_s20 = scalar_lea.vmem %s4222_s12, 256  ;;  %p5177_p1 = scmp.lt.s32.totalorder %s4222_s12, %s4222_s12 }
0x23cc   :  { %p5173_p0 = scmp.ne.s32.totalorder %s4222_s12, %s5172_s20  ;;  %p5178_p2 = scmp.lt.s32.totalorder %s5172_s20, %s5172_s20 }
0x23cd   :  { %3549 = vrot.lane.b32.xlu0 %v6081_v63, %s5270_s10  ;;  %v3602_v63 = vpop.permute.xlu1 %3601 }
0x23ce   :  { %v3607_v3 = vsel %vm461_vm7, %v3602_v63, 0  ;;  %p5179_p3 = por %p5178_p2, %p5177_p1 }
0x23d0   :  { %p5180_p4 = pnand %p5179_p3, %p5173_p0 }
0x23d1   :  { %v3600_v9 = vpop.permute.xlu1 %3599 }
0x243c   :  { %v3443_v42 = vpop.xlane.xlu0 %3442 }
0x243d   :  { %5138 = vrcp.f32 %v3443_v42 }
0x2440   :  { %v3446_v45 = vpop.xlane.xlu0 %3445 }
0x2441   :  { %5140 = vrcp.f32 %v3446_v45 }
0x2444   :  { %v3502_v0 = vpop.permute.xlu0 %3501 }
0x2445   :  { %v3507_v48 = vsel %vm602_vm8, %v3502_v0, 0 }
0x2446   :  { %4848 = vmatpush3.bf16.msra.mxu0 %v3507_v48 }
0x2447   :  { %v5139_v49 = vpop.eup %5138  ;;  %4859 = vmatprep.subr.bf16.mxu0 %v5258_v13 }
0x2448   :  { %v3449_v16 = vmul.f32 %v5139_v49, %v5135_v52  ;;  %v3550_v6 = vpop.permute.xlu0 %3549 }
0x244a   :  { %v3451_v55 = vpack.c.bf16 %v3449_v16, %v3449_v16 }
0x244b   :  { %v5141_v56 = vpop.eup %5140 }
0x244c   :  { %v3450_v58 = vmul.f32 %v5141_v56, %v5137_v40  ;;  %4844 = vmatmul.mubr.msk.bf16.vlgmr.msra.gmra.mrb[104].mxu1 %vm461_vm7, %v3451_v55 }
0x244d   :  { %4854 = vmatpush3.bf16.xpose.msra.mxu1 %v3557_v57  ;;  %4855 = vmatprep.mubr.msk.bf16.mxu1 %vm5259_vm6, %v5258_v13  ;;  %v189_v57 = vld [vmem:[%s6380_s23] sm:$0xff] }
0x244e   :  { %v3452_v31 = vpack.c.bf16 %v3450_v58, %v3450_v58  ;;  %4865 = vmatprep.subr.bf16.mxu1 %v5258_v13  ;;  %v190_v58 = vld [vmem:[%s6380_s23 + $0x8] sm:$0xff] }
0x244f   :  { %v3804_v63 = vpack.c.bf16 %v190_v58, %v189_v57  ;;  %v160_v57 = vld [vmem:[%s6382_s28 + $0x18] sm:$0xff] }
0x2450   :  { %4850 = vmatmul.mubr.msk.bf16.vlgmr.msra.gmra.mrb[100].mxu0 %vm461_vm7, %v3452_v31  ;;  %v191_v31 = vld [vmem:[%s6380_s23 + $0x10] sm:$0xff] }
0x2451   :  { %4860 = vmatpush3.bf16.xpose.msra.mxu0 %v3607_v3  ;;  %4861 = vmatprep.mubr.msk.bf16.mxu0 %vm5259_vm6, %v5258_v13  ;;  %v192_v3 = vld [vmem:[%s6380_s23 + $0x18] sm:$0xff] }
0x2452   :  { %4871 = vmatprep.subr.bf16.mxu0 %v5258_v13 }
0x2454   :  { %4856 = vmatmul.mubr.msk.bf16.vlgmr.msra.gmra.mrb[108].mxu1 %vm461_vm7, %v3550_v6  ;;  %v3805_v6 = vpack.c.bf16 %v192_v3, %v191_v31 }
0x2455   :  { %4867 = vmatprep.mubr.msk.bf16.mxu1 %vm5259_vm6, %v5258_v13 }
0x2458   :  { %4862 = vmatmul.mubr.msk.bf16.vlgmr.msra.gmra.mrb[104].mxu0 %vm461_vm7, %v3600_v9 }
0x2459   :  { %4873 = vmatprep.mubr.msk.bf16.mxu0 %vm5259_vm6, %v5258_v13 }
0x251f   :  { %v3495_v25 = vpop.f32.mrb[104].mxu1 }
0x2520   :  { %v4845_v27 = vpop.f32.mrb[105].mxu1 }
0x2521   :  { %v3498_v28 = vpop.f32.mrb[106].mxu1 }
0x2522   :  { %v4846_v30 = vpop.f32.mrb[107].mxu1 }
0x2523   :  { %v3543_v32 = vpop.f32.mrb[100].mxu0 }
0x2524   :  { %v5020_v36 = vpack.i.bf16 %v3543_v32, %v3495_v25  ;;  %v4851_v21 = vpop.f32.mrb[101].mxu0 }
0x2525   :  { %v3546_v61 = vpop.f32.mrb[102].mxu0 }
0x2526   :  { %v4852_v54 = vpop.f32.mrb[103].mxu0 }
0x2527   :  { %v3593_v24 = vpop.f32.mrb[108].mxu1 }
0x2528   :  { %v3649_v15 = vmul.f32 0.35355338, %v3593_v24  ;;  %v4857_v44 = vpop.f32.mrb[109].mxu1 }
0x2529   :  { %v3596_v37 = vpop.f32.mrb[110].mxu1 }
0x252a   :  { %v3651_v51 = vadd.f32 %v3649_v15, %v5580_v46  ;;  %v4858_v43 = vpop.f32.mrb[111].mxu1 }
0x252b   :  { %v3643_v41 = vpop.f32.mrb[104].mxu0 }
0x252c   :  { %v3650_v23 = vmul.f32 0.35355338, %v3643_v41  ;;  %v4863_v29 = vpop.f32.mrb[105].mxu0  ;;  %v3653_v5 = vsel %vm461_vm7, %v3651_v51, -inf }
0x252d   :  { %v3646_v26 = vpop.f32.mrb[106].mxu0  ;;  %3654 = vmax.xlane.f32.xlu0 %v3653_v5 }
0x252e   :  { %v3652_v8 = vadd.f32 %v3650_v23, %v5583_v50  ;;  %v4864_v33 = vpop.f32.mrb[107].mxu0 }
0x2530   :  { %v3656_v35 = vsel %vm461_vm7, %v3652_v8, -inf }
0x2531   :  { %3657 = vmax.xlane.f32.xlu1 %v3656_v35 }
0x2542   :  { %3677 = vrot.lane.b32.xlu1 %v6070_v11, %s5269_s7 }
0x2546   :  { %5016 = vrot.lane.b32.xlu1 %v5015_v20, %s5272_s15 }
0x254a   :  { %5021 = vrot.lane.b32.xlu1 %v5020_v36, %s5273_s16 }
0x25ba   :  { %v3655_v46 = vpop.xlane.xlu0 %3654 }
0x25bb   :  { %v3659_v38 = vsub.f32 %v3651_v51, %v3655_v46 }
0x25bd   :  { %v3661_v47 = vmul.f32 1.442695, %v3659_v38 }
0x25be   :  { %v3658_v52 = vpop.xlane.xlu1 %3657 }
0x25bf   :  { %5142 = vpow2.f32 %v3661_v47  ;;  %v3660_v50 = vsub.f32 %v3652_v8, %v3658_v52 }
0x25c1   :  { %v3663_v53 = vmul.f32 1.442695, %v3660_v50 }
0x25c2   :  { %v3678_v40 = vpop.permute.xlu1 %3677 }
0x25c3   :  { %5144 = vpow2.f32 %v3663_v53  ;;  %v3683_v4 = vsel %vm602_vm8, %v3678_v40, 0 }
0x25c4   :  { %4866 = vmatpush3.bf16.msra.mxu1 %v3683_v4 }
0x25c5   :  { %4877 = vmatprep.subr.bf16.mxu1 %v5258_v13 }
0x25c6   :  { %v5017_v54 = vpop.permute.xlu1 %5016 }
0x25c7   :  { %v5019_v15 = vunpack.i.h.bf16 %v5017_v54  ;;  %v5018_v44 = vunpack.i.l.bf16 %v5017_v54 }
0x25c9   :  { %v5143_v11 = vpop.eup %5142  ;;  %v3798_v41 = vsel %vm461_vm7, %v6133_v60, %v5019_v15  ;;  %v3797_v23 = vsel %vm461_vm7, %v6131_v12, %v5018_v44  ;;  %v4353_v60 = vld [vmem:[%s6381_s26] ss:$0 sm:$0xff] }
0x25ca   :  { %v3665_v2 = vsel %vm461_vm7, %v5143_v11, 0.0  ;;  %v5022_v24 = vpop.permute.xlu1 %5021 }
0x25cb   :  { %3666 = vadd.xlane.f32.xlu0 %v3665_v2  ;;  %v5024_v37 = vunpack.i.h.bf16 %v5022_v24  ;;  %v5023_v51 = vunpack.i.l.bf16 %v5022_v24 }
0x25cd   :  { %v5145_v18 = vpop.eup %5144  ;;  %v3800_v26 = vsel %vm1392_vm9, %v3798_v41, %v5024_v37  ;;  %v3799_v8 = vsel %vm1392_vm9, %v3797_v23, %v5023_v51  ;;  %v162_v51 = vld [vmem:[%s6384_s2] sm:$0xff]  ;;  %v164_v23 = vld [vmem:[%s6384_s2 + $0x10] sm:$0xff] }
0x25ce   :  { %v3668_v20 = vsel %vm461_vm7, %v5145_v18, 0.0 }
0x25cf   :  { %3669 = vadd.xlane.f32.xlu0 %v3668_v20 }
0x25e5   :  { %3725 = vrot.lane.b32.xlu0 %v6072_v34, %s5269_s7 }
0x2658   :  { %v3667_v42 = vpop.xlane.xlu0 %3666 }
0x2659   :  { %5146 = vrcp.f32 %v3667_v42 }
0x265c   :  { %v3670_v45 = vpop.xlane.xlu0 %3669 }
0x265d   :  { %5148 = vrcp.f32 %v3670_v45 }
0x2660   :  { %v3726_v0 = vpop.permute.xlu0 %3725 }
0x2661   :  { %v3731_v48 = vsel %vm602_vm8, %v3726_v0, 0 }
0x2662   :  { %4872 = vmatpush3.bf16.msra.mxu0 %v3731_v48 }
0x2663   :  { %v5147_v49 = vpop.eup %5146  ;;  %4885 = vmatprep.subr.bf16.mxu0 %v5258_v13 }
0x2664   :  { %v3673_v22 = vmul.f32 %v5147_v49, %v5143_v11 }
0x2666   :  { %v3675_v16 = vpack.c.bf16 %v3673_v22, %v3673_v22 }
0x2667   :  { %v5149_v55 = vpop.eup %5148 }
0x2668   :  { %v3674_v56 = vmul.f32 %v5149_v55, %v5145_v18  ;;  %4868 = vmatmul.mubr.msk.bf16.vlgmr.msra.gmra.mrb[112].mxu1 %vm461_vm7, %v3675_v16  ;;  %v157_v16 = vld [vmem:[%s6382_s28] sm:$0xff]  ;;  %v158_v55 = vld [vmem:[%s6382_s28 + $0x8] sm:$0xff] }
0x2669   :  { %4881 = vmatprep.mubr.msk.bf16.mxu1 %vm5259_vm6, %v5258_v13  ;;  %4878 = vmatpush3.bf16.msra.mxu1 %v3804_v63 }
0x266a   :  { %v3676_v34 = vpack.c.bf16 %v3674_v56, %v3674_v56  ;;  %4879 = vmatprep.subr.bf16.mxu1 %v5258_v13  ;;  %v3897_v56 = vpack.c.bf16 %v158_v55, %v157_v16 }
0x266c   :  { %4874 = vmatmul.mubr.msk.bf16.vlgmr.msra.gmra.mrb[108].mxu0 %vm461_vm7, %v3676_v34  ;;  %v159_v34 = vld [vmem:[%s6382_s28 + $0x10] sm:$0xff] }
0x266d   :  { %4889 = vmatprep.mubr.msk.bf16.mxu0 %vm5259_vm6, %v5258_v13  ;;  %4880 = vmatpush3.bf16.msra.mxu1 %v3805_v6  ;;  %v3898_v58 = vpack.c.bf16 %v160_v57, %v159_v34 }
0x266e   :  { %4893 = vmatprep.subr.bf16.mxu1 %v5258_v13  ;;  %4886 = vmatpush3.bf16.msra.mxu0 %v3897_v56 }
0x266f   :  { %4887 = vmatprep.subr.bf16.mxu0 %v5258_v13 }
0x2672   :  { %4888 = vmatpush3.bf16.msra.mxu0 %v3898_v58 }
0x2673   :  { %4905 = vmatprep.subr.bf16.mxu0 %v5258_v13 }
0x273b   :  { %v3719_v9 = vpop.f32.mrb[112].mxu1 }
0x273c   :  { %v4869_v25 = vpop.f32.mrb[113].mxu1 }
0x273d   :  { %v3722_v27 = vpop.f32.mrb[114].mxu1 }
0x273e   :  { %v4870_v28 = vpop.f32.mrb[115].mxu1  ;;  %v171_v27 = vld [vmem:[%s6383_s1] sm:$0x3] }
0x273f   :  { %v3767_v30 = vpop.f32.mrb[108].mxu0  ;;  %v3887_v28 = vrot.slane %v171_v27, %v5539_v62  ;;  %v3893_v54 = vrot.slane %v171_v27, %v5543_v1 }
0x2740   :  { %v5025_v32 = vpack.i.bf16 %v3767_v30, %v3719_v9  ;;  %v4875_v36 = vpop.f32.mrb[109].mxu0 }
0x2741   :  { %v3770_v21 = vpop.f32.mrb[110].mxu0 }
0x2742   :  { %v4876_v61 = vpop.f32.mrb[111].mxu0  ;;  %5026 = vrot.lane.b32.xlu0 %v5025_v32, %s5274_s18 }
0x27b4   :  { %v5027_v43 = vpop.permute.xlu0 %5026 }
0x27b5   :  { %v5029_v29 = vunpack.i.h.bf16 %v5027_v43  ;;  %v5028_v5 = vunpack.i.l.bf16 %v5027_v43  ;;  %v163_v43 = vld [vmem:[%s6384_s2 + $0x8] sm:$0xff] }
0x27b6   :  { %v3968_v41 = vpack.c.bf16 %v163_v43, %v162_v51 }
0x27b7   :  { %v3802_v33 = vsel %vm1395_vm10, %v3800_v26, %v5029_v29  ;;  %v3801_v35 = vsel %vm1395_vm10, %v3799_v8, %v5028_v5  ;;  %v165_v29 = vld [vmem:[%s6384_s2 + $0x18] sm:$0xff]  ;;  %v166_v26 = vld [vmem:[%s6384_s2 + $0x20] sm:$0xff]  ;;  %v167_v8 = vld [vmem:[%s6384_s2 + $0x28] sm:$0xff] }
0x27b8   :  { %v3803_v46 = vpack.c.bf16 %v3802_v33, %v3801_v35  ;;  %v3969_v5 = vpack.c.bf16 %v165_v29, %v164_v23  ;;  %v3970_v33 = vpack.c.bf16 %v167_v8, %v166_v26  ;;  %v168_v35 = vld [vmem:[%s6384_s2 + $0x30] sm:$0xff]  ;;  %v4079_v29 = vsel %vm363_vm5, %v5492_v14, 0 }
0x27ba   :  { %4882 = vmatmul.mubr.msk.bf16.vlgmr.msra.gmra.mrb[116].mxu1 %vm363_vm5, %v3803_v46  ;;  %v169_v46 = vld [vmem:[%s6384_s2 + $0x38] sm:$0xff] }
0x27bb   :  { %4901 = vmatprep.mubr.msk.bf16.mxu1 %vm5259_vm6, %v5258_v13  ;;  %4894 = vmatpush3.bf16.msra.mxu1 %v3968_v41 }
0x27bc   :  { %4895 = vmatprep.subr.bf16.mxu1 %v5258_v13 }
0x27bf   :  { %4896 = vmatpush3.bf16.msra.mxu1 %v3969_v5  ;;  %v4082_v5 = vsel %vm363_vm5, %v5499_v17, 0 }
0x27c0   :  { %4897 = vmatprep.subr.bf16.mxu1 %v5258_v13 }
0x27c3   :  { %4898 = vmatpush3.bf16.msra.mxu1 %v3970_v33 }
0x27c4   :  { %4899 = vmatprep.subr.bf16.mxu1 %v5258_v13 }
0x288d   :  { %v3849_v38 = vpop.f32.mrb[116].mxu1 }
0x288e   :  { %v3850_v47 = vadd.f32 %v4353_v60, %v3849_v38  ;;  %v4883_v12 = vpop.f32.mrb[117].mxu1  ;;  %v4355_v38 = vld [vmem:[%s6385_s0] ss:$0 sm:$0xff] }
0x288f   :  { %v3852_v52 = vpop.f32.mrb[118].mxu1 }
0x2890   :  { %v3856_v50 = vadd.f32 %v3850_v47, %v6060_v39  ;;  %v3853_v53 = vadd.f32 %v4353_v60, %v3852_v52  ;;  %v4884_v40 = vpop.f32.mrb[119].mxu1  ;;  %v3971_v60 = vpack.c.bf16 %v169_v46, %v168_v35 }
0x2892   :  { %v3857_v4 = vadd.f32 %v3853_v53, %v6062_v59  ;;  %v3858_v11 = vsel %vm363_vm5, %v3856_v50, 0.0  ;;  %4900 = vmatpush3.bf16.msra.mxu1 %v3971_v60  ;;  %v172_v60 = vld [vmem:[%s6387_s9] sm:$0x3] }
0x2893   :  { %3859 = vadd.xlane.f32.xlu1 %v3858_v11  ;;  %v4059_v17 = vrot.slane %v172_v60, %v5543_v1 }
0x2894   :  { %v3861_v2 = vsel %vm363_vm5, %v3857_v4, 0.0 }
0x2895   :  { %3862 = vadd.xlane.f32.xlu0 %v3861_v2 }
0x2920   :  { %v3860_v18 = vpop.xlane.xlu1 %3859 }
0x2921   :  { %v3864_v20 = vmul.f32 0.03125, %v3860_v18 }
0x2922   :  { %v3863_v42 = vpop.xlane.xlu0 %3862 }
0x2923   :  { %v3866_v45 = vsub.f32 %v3856_v50, %v3864_v20  ;;  %v3865_v0 = vmul.f32 0.03125, %v3863_v42 }
0x2925   :  { %v3867_v39 = vsub.f32 %v3857_v4, %v3865_v0  ;;  %v3868_v48 = vmul.f32 %v3866_v45, %v3866_v45 }
0x2927   :  { %v3870_v49 = vsel %vm363_vm5, %v3868_v48, 0.0  ;;  %v3869_v59 = vmul.f32 %v3867_v39, %v3867_v39 }
0x2928   :  { %3871 = vadd.xlane.f32.xlu0 %v3870_v49 }
0x2929   :  { %v3873_v22 = vsel %vm363_vm5, %v3869_v59, 0.0 }
0x292a   :  { %3874 = vadd.xlane.f32.xlu1 %v3873_v22 }
0x29b5   :  { %v3872_v63 = vpop.xlane.xlu0 %3871 }
0x29b6   :  { %v3876_v31 = vmul.f32 0.03125, %v3872_v63  ;;  %v4357_v63 = vld [vmem:[%s6386_s5] ss:$0 sm:$0xff] }
0x29b7   :  { %v3875_v3 = vpop.xlane.xlu1 %3874 }
0x29b8   :  { %v3878_v6 = vadd.f32 1e-05, %v3876_v31  ;;  %v3877_v9 = vmul.f32 0.03125, %v3875_v3 }
0x29ba   :  { %5150 = vrsqrt.f32 %v3878_v6  ;;  %v3879_v25 = vadd.f32 1e-05, %v3877_v9 }
0x29bc   :  { %5152 = vrsqrt.f32 %v3879_v25 }
0x29c4   :  { %v5151_v30 = vpop.eup %5150 }
0x29c5   :  { %v3882_v32 = vmul.f32 %v5151_v30, %v3866_v45 }
0x29c6   :  { %v5153_v36 = vpop.eup %5152 }
0x29c7   :  { %v3888_v21 = vmul.f32 %v3887_v28, %v3882_v32  ;;  %v3883_v61 = vmul.f32 %v5153_v36, %v3867_v39 }
0x29c9   :  { %v3889_v24 = vmul.f32 %v3887_v28, %v3883_v61  ;;  %v3894_v15 = vadd.f32 %v3893_v54, %v3888_v21  ;;  %v4073_v21 = vsel %vm363_vm5, %v5481_v7, 0  ;;  %v4076_v7 = vsel %vm363_vm5, %v5485_v10, 0 }
0x29cb   :  { %v3895_v44 = vadd.f32 %v3893_v54, %v3889_v24 }
0x29cd   :  { %v3896_v37 = vpack.c.bf16 %v3895_v44, %v3894_v15 }
0x29cf   :  { %4890 = vmatmul.mubr.msk.bf16.vlgmr.msra.gmra.mrb[112].mxu0 %vm363_vm5, %v3896_v37 }
0x29d0   :  { %4913 = vmatprep.mubr.msk.bf16.mxu0 %vm5259_vm6, %v5258_v13  ;;  %4906 = vmatpush3.bf16.xpose.msra.mxu0 %v4073_v21 }
0x29d1   :  { %4907 = vmatprep.subr.bf16.mxu0 %v5258_v13 }
0x29d8   :  { %4908 = vmatpush3.bf16.xpose.msra.mxu0 %v4076_v7 }
0x29d9   :  { %4909 = vmatprep.subr.bf16.mxu0 %v5258_v13 }
0x29e0   :  { %4910 = vmatpush3.bf16.xpose.msra.mxu0 %v4079_v29 }
0x29e1   :  { %4911 = vmatprep.subr.bf16.mxu0 %v5258_v13 }
0x29e8   :  { %4912 = vmatpush3.bf16.xpose.msra.mxu0 %v4082_v5 }
0x2aa2   :  { %v3942_v47 = vpop.f32.mrb[112].mxu0 }
0x2aa3   :  { %v3943_v12 = vadd.f32 %v4355_v38, %v3942_v47  ;;  %v4891_v52 = vpop.f32.mrb[113].mxu0 }
0x2aa4   :  { %v3945_v50 = vpop.f32.mrb[114].mxu0 }
0x2aa5   :  { %v3949_v53 = vmul.f32 %v3943_v12, %v3943_v12  ;;  %v3946_v40 = vadd.f32 %v4355_v38, %v3945_v50  ;;  %v4892_v4 = vpop.f32.mrb[115].mxu0  ;;  %v4053_v38 = vrot.slane %v172_v60, %v5539_v62 }
0x2aa7   :  { %v3951_v11 = vmul.f32 %v3949_v53, %v3943_v12  ;;  %v3950_v2 = vmul.f32 %v3946_v40, %v3946_v40 }
0x2aa9   :  { %v3953_v18 = vmul.f32 0.044715, %v3951_v11  ;;  %v3952_v20 = vmul.f32 %v3950_v2, %v3946_v40  ;;  %v4359_v2 = vld [vmem:[%s6388_s3] ss:$0 sm:$0xff] }
0x2aab   :  { %v3955_v42 = vadd.f32 %v3953_v18, %v3943_v12  ;;  %v3954_v45 = vmul.f32 0.044715, %v3952_v20 }
0x2aad   :  { %v3957_v0 = vmul.f32 0.7978846, %v3955_v42  ;;  %v3956_v39 = vadd.f32 %v3954_v45, %v3946_v40 }
0x2aaf   :  { %5154 = vtanh.f32 %v3957_v0  ;;  %v3958_v48 = vmul.f32 0.7978846, %v3956_v39 }
0x2ab1   :  { %5156 = vtanh.f32 %v3958_v48  ;;  %v4128_v48 = vld [vmem:[%s6389_s14 + $0x8] sm:$0xff] }
0x2ab2   :  { %vm4174_vm14 = vcmp.ne.s32.totalorder %v4128_v48, 4294967196 }
0x2ab9   :  { %v5155_v49 = vpop.eup %5154 }
0x2aba   :  { %v3961_v59 = vadd.f32 1.0, %v5155_v49  ;;  %v4127_v49 = vld [vmem:[%s6389_s14] sm:$0xff] }
0x2abb   :  { %v5157_v22 = vpop.eup %5156  ;;  %vm4173_vm15 = vcmp.ne.s32.totalorder %v4127_v49, 4294967196 }
0x2abc   :  { %v3963_v16 = vmul.f32 0.5, %v3961_v59  ;;  %v3962_v55 = vadd.f32 1.0, %v5157_v22 }
0x2abe   :  { %v3964_v56 = vmul.f32 0.5, %v3962_v55  ;;  %v3965_v34 = vmul.f32 %v3963_v16, %v3943_v12 }
0x2ac0   :  { %v3966_v57 = vmul.f32 %v3964_v56, %v3946_v40 }
0x2ac2   :  { %v3967_v58 = vpack.c.bf16 %v3966_v57, %v3965_v34 }
0x2ac4   :  { %4902 = vmatmul.mubr.msk.bf16.vlgmr.msra.gmra.mrb[120].mxu1 %vm273_vm4, %v3967_v58 }
0x2b97   :  { %v4015_v31 = vpop.f32.mrb[120].mxu1 }
0x2b98   :  { %v4016_v3 = vadd.f32 %v4357_v63, %v4015_v31  ;;  %v4903_v6 = vpop.f32.mrb[121].mxu1 }
0x2b99   :  { %v4018_v9 = vpop.f32.mrb[122].mxu1 }
0x2b9a   :  { %v4022_v25 = vadd.f32 %v4016_v3, %v3894_v15  ;;  %v4019_v27 = vadd.f32 %v4357_v63, %v4018_v9  ;;  %v4904_v28 = vpop.f32.mrb[123].mxu1 }
0x2b9c   :  { %v4023_v30 = vadd.f32 %v4019_v27, %v3895_v44  ;;  %v4024_v32 = vsel %vm363_vm5, %v4022_v25, 0.0 }
0x2b9d   :  { %4025 = vadd.xlane.f32.xlu0 %v4024_v32 }
0x2b9e   :  { %v4027_v36 = vsel %vm363_vm5, %v4023_v30, 0.0 }
0x2b9f   :  { %4028 = vadd.xlane.f32.xlu1 %v4027_v36  ;;  %v4363_v36 = vsel %vm4173_vm15, 1.0, %v5258_v13 }
0x2c2a   :  { %v4026_v61 = vpop.xlane.xlu0 %4025 }
0x2c2b   :  { %v4030_v54 = vmul.f32 0.03125, %v4026_v61  ;;  %v4196_v61 = vsel %vm4183_vm0, %v4363_v36, 0.0 }
0x2c2c   :  { %v4029_v24 = vpop.xlane.xlu1 %4028 }
0x2c2d   :  { %v4032_v37 = vsub.f32 %v4022_v25, %v4030_v54  ;;  %v4031_v15 = vmul.f32 0.03125, %v4029_v24 }
0x2c2f   :  { %v4033_v51 = vsub.f32 %v4023_v30, %v4031_v15  ;;  %v4034_v43 = vmul.f32 %v4032_v37, %v4032_v37 }
0x2c31   :  { %v4036_v44 = vsel %vm363_vm5, %v4034_v43, 0.0  ;;  %v4035_v41 = vmul.f32 %v4033_v51, %v4033_v51 }
0x2c32   :  { %4037 = vadd.xlane.f32.xlu0 %v4036_v44 }
0x2c33   :  { %v4039_v23 = vsel %vm363_vm5, %v4035_v41, 0.0 }
0x2c34   :  { %4040 = vadd.xlane.f32.xlu1 %v4039_v23 }
0x2cbf   :  { %v4038_v26 = vpop.xlane.xlu0 %4037 }
0x2cc0   :  { %v4042_v8 = vmul.f32 0.03125, %v4038_v26 }
0x2cc1   :  { %v4041_v33 = vpop.xlane.xlu1 %4040 }
0x2cc2   :  { %v4044_v35 = vadd.f32 1e-05, %v4042_v8  ;;  %v4043_v46 = vmul.f32 0.03125, %v4041_v33 }
0x2cc4   :  { %5158 = vrsqrt.f32 %v4044_v35  ;;  %v4045_v10 = vadd.f32 1e-05, %v4043_v46 }
0x2cc6   :  { %5160 = vrsqrt.f32 %v4045_v10 }
0x2cce   :  { %v5159_v14 = vpop.eup %5158 }
0x2ccf   :  { %v4048_v47 = vmul.f32 %v5159_v14, %v4032_v37 }
0x2cd0   :  { %v5161_v12 = vpop.eup %5160 }
0x2cd1   :  { %v4054_v52 = vmul.f32 %v4053_v38, %v4048_v47  ;;  %v4049_v50 = vmul.f32 %v5161_v12, %v4033_v51 }
0x2cd3   :  { %v4055_v53 = vmul.f32 %v4053_v38, %v4049_v50  ;;  %v4060_v40 = vadd.f32 %v4059_v17, %v4054_v52 }
0x2cd5   :  { %v4061_v4 = vadd.f32 %v4059_v17, %v4055_v53 }
0x2cd7   :  { %v4062_v11 = vpack.c.bf16 %v4061_v4, %v4060_v40 }
0x2cd9   :  { %4914 = vmatmul.mubr.msk.bf16.vlgmr.msra.gmra.mrb[116].mxu0 %vm363_vm5, %v4062_v11 }
0x2dac   :  { %v4118_v18 = vpop.f32.mrb[116].mxu0 }
0x2dad   :  { %v4119_v20 = vadd.f32 %v4359_v2, %v4118_v18  ;;  %v4915_v42 = vpop.f32.mrb[117].mxu0 }
0x2dae   :  { %v4121_v62 = vpop.f32.mrb[118].mxu0 }
0x2daf   :  { %4125 = vst.msk [vmem:[#allocation2] sm:$0xff] %vm273_vm4, %v4119_v20  ;;  %v4122_v45 = vadd.f32 %v4359_v2, %v4121_v62  ;;  %v4916_v0 = vpop.f32.mrb[119].mxu0  ;;  %v4129_v39 = vsel %vm273_vm4, %v4119_v20, -inf }
0x2db0   :  { %4130 = vmax.xlane.f32.xlu0 %v4129_v39 }
0x2db1   :  { %4126 = vst.msk [vmem:[#allocation2 + $0x8] sm:$0xff] %vm273_vm4, %v4122_v45  ;;  %v4132_v1 = vsel %vm273_vm4, %v4122_v45, -inf }
0x2db2   :  { %4133 = vmax.xlane.f32.xlu1 %v4132_v1 }
0x2dc3   :  { %4157 = vperm.xlu1 %4984, %v4128_v48  }
0x2dc6   :  { %4154 = vperm.xlu0 %4983, %v4127_v49  }
0x2e3d   :  { %v4131_v59 = vpop.xlane.xlu0 %4130 }
0x2e3e   :  { %v4135_v22 = vsub.f32 %v4119_v20, %v4131_v59 }
0x2e3f   :  { %v4134_v16 = vpop.xlane.xlu1 %4133 }
0x2e40   :  { %v4137_v55 = vmul.f32 1.442695, %v4135_v22  ;;  %v4136_v56 = vsub.f32 %v4122_v45, %v4134_v16 }
0x2e42   :  { %5162 = vpow2.f32 %v4137_v55  ;;  %v4139_v34 = vmul.f32 1.442695, %v4136_v56 }
0x2e43   :  { %v4158_v57 = vpop.permute.xlu1 %4157 }
0x2e44   :  { %5164 = vpow2.f32 %v4139_v34  ;;  %vm4160_vm12 = vcmp.eq.s32.totalorder %v5505_v19, %v4158_v57 }
0x2e45   :  { %v4155_v58 = vpop.permute.xlu0 %4154  ;;  %v4362_v63 = vsel %vm4160_vm12, 1.0, %v5258_v13 }
0x2e46   :  { %vm4159_vm13 = vcmp.eq.s32.totalorder %v5505_v19, %v4155_v58  ;;  %v4166_v6 = vmul.f32 %v4362_v63, %v4122_v45  ;;  %v4364_v19 = vsel %vm4174_vm14, 1.0, %v5258_v13 }
0x2e47   :  { %v4361_v3 = vsel %vm4159_vm13, 1.0, %v5258_v13  ;;  %v4197_v21 = vsel %vm4183_vm0, %v4364_v19, 0.0 }
0x2e48   :  { %v4165_v27 = vmul.f32 %v4361_v3, %v4119_v20  ;;  %v4170_v30 = vsel %vm273_vm4, %v4166_v6, 0.0  ;;  %v4198_v54 = vadd.f32 %v4197_v21, %v4196_v61 }
0x2e4a   :  { %v4167_v32 = vsel %vm273_vm4, %v4165_v27, 0.0 }
0x2e4c   :  { %v5163_v31 = vpop.eup %5162 }
0x2e4d   :  { %v4141_v9 = vsel %vm273_vm4, %v5163_v31, 0.0 }
0x2e4e   :  { %v5165_v25 = vpop.eup %5164  ;;  %4142 = vadd.xlane.f32.xlu1 %v4141_v9 }
0x2e4f   :  { %v4144_v28 = vsel %vm273_vm4, %v5165_v25, 0.0 }
0x2e50   :  { %4145 = vadd.xlane.f32.xlu0 %v4144_v28 }
0x2e52   :  { %4171 = vadd.xlane.f32.xlu1 %v4170_v30 }
0x2e54   :  { %4168 = vadd.xlane.f32.xlu0 %v4167_v32 }
0x2e56   :  { %4199 = vadd.xlane.f32.xlu1 %v4198_v54 }
0x2edb   :  { %v4143_v24 = vpop.xlane.xlu1 %4142 }
0x2edc   :  { %5166 = vlog2.f32 %v4143_v24 }
0x2edd   :  { %v4146_v37 = vpop.xlane.xlu0 %4145 }
0x2ede   :  { %5168 = vlog2.f32 %v4146_v37 }
0x2edf   :  { %v4172_v5 = vpop.xlane.xlu1 %4171 }
0x2ee1   :  { %v4169_v23 = vpop.xlane.xlu0 %4168 }
0x2ee3   :  { %v4200_v10 = vpop.xlane.xlu1 %4199 }
0x2ee4   :  { %v4201_v60 = vrot.slane %v4200_v10, 4 }
0x2ee6   :  { %v5167_v15 = vpop.eup %5166  ;;  %v4202_v38 = vadd.f32 %v4201_v60, %v4200_v10 }
0x2ee7   :  { %v4148_v51 = vmul.f32 0.6931472, %v5167_v15 }
0x2ee8   :  { %v5169_v43 = vpop.eup %5168  ;;  %v4203_v14 = vrot.slane %v4202_v38, 2 }
0x2ee9   :  { %v4150_v44 = vmul.f32 0.6931472, %v5169_v43  ;;  %v4151_v41 = vadd.f32 %v4148_v51, %v4131_v59 }
0x2eeb   :  { %v4152_v7 = vadd.f32 %v4150_v44, %v4134_v16  ;;  %v4179_v29 = vsub.f32 %v4151_v41, %v4169_v23 }
0x2eed   :  { %v4180_v13 = vsub.f32 %v4152_v7, %v4172_v5  ;;  %v4181_v26 = vmul.f32 %v4363_v36, %v4179_v29 }
0x2eef   :  { %v4182_v8 = vmul.f32 %v4364_v19, %v4180_v13  ;;  %v4184_v35 = vsel %vm4183_vm0, %v4181_v26, 0.0 }
0x2ef1   :  { %v4185_v33 = vsel %vm4183_vm0, %v4182_v8, 0.0 }
0x2ef2   :  { %v4186_v46 = vadd.f32 %v4185_v33, %v4184_v35 }
0x2ef4   :  { %4187 = vadd.xlane.f32.xlu0 %v4186_v46 }
0x2f81   :  { %v4188_v47 = vpop.xlane.xlu0 %4187 }
0x2f82   :  { %v4189_v12 = vrot.slane %v4188_v47, 4 }
0x2f84   :  { %v4190_v52 = vadd.f32 %v4189_v12, %v4188_v47 }
0x2f85   :  { %5183 = shalt.err (!%p5180_p4)
}
0x2f86   :  { %s5184_s7 = scalar_lea.hbm %s5468_s29, 256 }
0x2f87   :  { %p5185_p5 = scmp.ne.s32.totalorder %s5468_s29, %s5184_s7  ;;  %p5188_p6 = scmp.lt.u32.totalorder %s5184_s7, %s5468_s29 }
0x2f89   :  { %p5190_p7 = pnand %p5188_p6, %p5185_p5 }
0x2f8b   :  { %5193 = shalt.err (!%p5190_p7)
}
0x2f8c   :  { %s5277_s10 = smov 128   ;;  %v4204_v50 = vadd.f32 %v4203_v14, %v4202_v38  ;;  %v4191_v17 = vrot.slane %v4190_v52, 2  ;;  %s5278_s18 = smov 1.0   ;;  %vm4214_vm1 = vcmask 0  }
0x2f8d   :  { %4227 = dma.vmem_to_hbm [thread:$0]  %s4222_s12, 256, %s5468_s29, [#allocation3], %s5277_s10, %s5277_s10, %s5272_s15  }
0x2f8e   :  { %v4192_v53 = vadd.f32 %v4191_v17, %v4190_v52  ;;  %v4205_v40 = vrot.slane %v4204_v50, 1  ;;  %s5279_s17 = smov [#allocation4]  }
0x2f8f   :  { %s4234_s21 = sshll.u32 %s5279_s17, 4  ;;  %s4235_s21 = int_to_ptr.vmem [resolvable:$true] %s4234_s21 }
0x2f90   :  { %v4193_v4 = vrot.slane %v4192_v53, 1  ;;  %v4206_v2 = vadd.f32 %v4205_v40, %v4204_v50  ;;  %s5194_s25 = scalar_lea.vmem %s4235_s21, 16  ;;  %s5198_s8 = scalar_lea.vmem %s4235_s21, 32 }
0x2f91   :  { %p5195_p8 = scmp.ne.s32.totalorder %s4235_s21, %s5194_s25  ;;  %p5199_p9 = scmp.lt.s32.totalorder %s4235_s21, %s4235_s21 }
0x2f92   :  { %v4194_v11 = vadd.f32 %v4193_v4, %v4192_v53  ;;  %p5200_p10 = scmp.lt.s32.totalorder %s5198_s8, %s5194_s25 }
0x2f94   :  { %4917 = vpush %v4194_v11  ;;  %p5201_p11 = por %p5200_p10, %p5199_p9 }
0x2f95   :  { %4919 = vpush %v4206_v2 }
0x2f96   :  { %p5202_p12 = pnand %p5201_p11, %p5195_p8 }
0x2fc5   :  { %s4918_s11 = spop %4917 }
0x2fc6   :  { %s4920_s16 = spop %4919 }
0x2fc7   :  { %s4208_s13 = smax.f32 %s5278_s18, %s4920_s16 }
0x2fc8   :  { %v4209_v18 = vstv %s4208_s13 }
0x2fc9   :  { %5170 = vrcp.f32 %v4209_v18 }
0x2fd3   :  { %v5171_v20 = vpop.eup %5170 }
0x2fd4   :  { %4921 = vpush %v5171_v20 }
0x3005   :  { %s4922_s29 = spop %4921 }
0x3006   :  { %s4212_s15 = smul.f32 %s4922_s29, %s4918_s11 }
0x3008   :  { %v4213_v42 = vstv %s4212_s15 }
0x3009   :  { %4215 = vst.msk [vmem:[#allocation4] sm:$0x1] %vm4214_vm1, %v4213_v42 }
0x300a   :  { %5205 = shalt.err (!%p5202_p12)
}
0x300b   :  { %s5206_s19 = scalar_lea.hbm %s5473_s30, 16 }
0x300c   :  { %p5207_p13 = scmp.ne.s32.totalorder %s5473_s30, %s5206_s19  ;;  %p5210_p0 = scmp.lt.u32.totalorder %s5206_s19, %s5473_s30 }
0x300e   :  { %p5212_p1 = pnand %p5210_p0, %p5207_p13 }
0x3010   :  { %5215 = shalt.err (!%p5212_p1)
}
0x3011   :  { %4237 = dma.vmem_to_hbm [thread:$0]  %s4235_s21, 16, %s5473_s30, [#allocation5]  }
0x3012   :  { %5216 = dma.done.wait [#allocation3], 256  }
0x3013   :  { %5217 = vsyncadd [#allocation3], 4294967040 }
0x3014   :  { %5218 = dma.done.wait [#allocation5], 16  }
0x3015   :  { %5219 = vsyncadd [#allocation5], 4294967280 }
0x3016   :  { %4244 = vsyncpa [#allocation3], 1 }
0x3017   :  { %4245 = vsyncpa [#allocation5], 1 }

</bundles_post_ra>
